<compile_context>
chip_gen: v6e
topology: v6e:2x2x1
jax: 0.10.0
libtpu: 0.0.40
codegen_flags: <defaults>
</compile_context>

<pallas_src>
import functools

import jax
import jax.numpy as jnp
from jax.experimental import pallas as pl
from jax.experimental.pallas import tpu as pltpu


def _round_up(x, m):
    return (x + m - 1) // m * m


def _cdiv(a, b):
    return -(-a // b)


def _vmem_budget_caps():
    """(tile_budget_bytes, vmem_limit_cap_bytes) for the current TPU generation."""
    kind = ""
    try:
        kind = jax.devices()[0].device_kind.lower()
    except Exception:
        pass
    if any(t in kind for t in ("v2", "v3", "v4", "v5", "v6")):
        return 80 * 2**20, 110 * 2**20          # 128 MiB VMEM per core
    return 36 * 2**20, 48 * 2**20               # v7x (64 MiB / TC) or unknown


def _make_conv_stats_kernel(K, dil, TH, Wo, Ho, need_mask):
    """Pass 1: in-VMEM im2col conv tile + per-tile partial BN statistics.

    x_ref    : (Hp_pad, Wp, Cin)   resident padded image (bf16), fetched once per n
    w_ref    : (K*K, Cin, C_pad)   resident repacked conv weight (bf16)
    y_ref    : (TH*Wo, C_pad)      bf16 conv output tile
    stats_ref: (2, C_pad)          row 0 = partial sum, row 1 = partial sum-of-squares
    """

    def kernel(x_ref, w_ref, y_ref, stats_ref):
        r = pl.program_id(1)
        row0 = r * TH
        acc = None
        for kh in range(K):
            rows = x_ref[pl.ds(row0 + kh * dil, TH)]            # (TH, Wp, Cin)
            for kw in range(K):
                patch = rows[:, kw * dil: kw * dil + Wo, :]      # (TH, Wo, Cin)
                patch = patch.reshape(TH * Wo, patch.shape[-1])
                contrib = jnp.dot(patch, w_ref[kh * K + kw],
                                  preferred_element_type=jnp.float32)
                acc = contrib if acc is None else acc + contrib

        if need_mask:
            # Rows >= Ho exist only because Ho was padded up to a TH multiple; they
            # read real image data through the halo, so zero them before the stats.
            rid = jax.lax.broadcasted_iota(jnp.int32, (TH * Wo, 1), 0)
            h_global = row0 + rid // Wo
            acc = jnp.where(h_global < Ho, acc, 0.0)

        s = jnp.sum(acc, axis=0, keepdims=True)                  # (1, C_pad)
        q = jnp.sum(acc * acc, axis=0, keepdims=True)            # (1, C_pad)
        stats_ref[...] = jnp.concatenate([s, q], axis=0)
        y_ref[...] = acc.astype(y_ref.dtype)

    return kernel


def _bn_relu_kernel(y_ref, scale_ref, shift_ref, o_ref):
    """Pass 2: per-channel affine (folded train-mode BN) + ReLU, lane-dense tiles."""
    y = y_ref[...].astype(jnp.float32)                           # f32 math (v5e-safe)
    o_ref[...] = jnp.maximum(y * scale_ref[...] + shift_ref[...], 0.0).astype(o_ref.dtype)


def conv_bn_relu(x_nchw, weight_oihw, gamma, beta, *, kernel_size=3, dilation=1,
                 eps=1e-5):
    """Matches ConvBNReLU.forward (conv bias=False -> train-mode BN -> ReLU), NCHW."""
    N, Cin, H, W = x_nchw.shape
    Cout = weight_oihw.shape[0]
    K = kernel_size
    dil = dilation
    pad = K // 2 if dil == 1 else dil                    # exactly the PyTorch module
    Ho = H + 2 * pad - dil * (K - 1)
    Wo = W + 2 * pad - dil * (K - 1)
    Wp = W + 2 * pad
    KK = K * K
    C_pad = _round_up(Cout, 128)                         # lane-dense output channels
    out_dtype = x_nchw.dtype
    out_bytes = jnp.dtype(out_dtype).itemsize

    tile_budget, vmem_cap = _vmem_budget_caps()

    # ---- pass-1 row tile (TH output rows per grid step) -----------------------------
    def p1_vmem(th):
        rb = _cdiv(Ho, th)
        hp = rb * th + dil * (K - 1)
        x_blk = hp * _round_up(Wp, 16) * _round_up(max(Cin, 1), 128) * 2   # bf16, tiled
        w_blk = KK * _round_up(Cin, 16) * C_pad * 2
        y_blk = th * Wo * C_pad * 2
        st_blk = 8 * C_pad * 4
        acc = th * Wo * C_pad * 4
        tmp = 2 * th * Wo * _round_up(max(Cin, 1), 128) * 2 \
            + th * _round_up(Wp, 16) * _round_up(max(Cin, 1), 128) * 2
        return 2 * (x_blk + w_blk + y_blk + st_blk) + acc + tmp

    target_rows_p1 = 512                                   # ~512 GEMM rows per step
    TH = min(_round_up(Ho, 8), _round_up(max(8, _cdiv(target_rows_p1, Wo)), 8))
    if N == 1 and Ho > 8:                                  # keep >= 2 grid steps (v7x)
        TH = min(TH, _round_up(_cdiv(Ho, 2), 8))
    TH = max(8, TH)
    while TH > 8 and p1_vmem(TH) > tile_budget:
        TH = max(8, _round_up(TH // 2, 8))

    RB = _cdiv(Ho, TH)
    Ho_pad = RB * TH
    need_mask = Ho_pad != Ho
    Hp_pad = Ho_pad + dil * (K - 1)                        # rows the kernel may touch

    # ---- wrapper-side layout plumbing: NCHW -> padded NHWC (bf16), repack weight ----
    x = jnp.transpose(x_nchw.astype(jnp.bfloat16), (0, 2, 3, 1))              # NHWC
    xp = jnp.pad(x, ((0, 0), (pad, pad + (Ho_pad - Ho)), (pad, pad), (0, 0)))
    # weight OIHW -> (kh*K+kw, cin, cout), padded to C_pad, bf16 for the MXU.
    w = jnp.transpose(weight_oihw, (2, 3, 1, 0)).reshape(KK, Cin, Cout)
    w = jnp.pad(w, ((0, 0), (0, 0), (0, C_pad - Cout))).astype(jnp.bfloat16)

    cparams1 = pltpu.CompilerParams(
        dimension_semantics=("parallel", "parallel"),
        vmem_limit_bytes=int(min(vmem_cap, max(32 << 20, 2 * p1_vmem(TH) + (16 << 20)))),
    )

    kernel1 = _make_conv_stats_kernel(K, dil, TH, Wo, Ho, need_mask)

    # ---- pass 1: conv (in-VMEM im2col) + partial per-channel sums --------------------
    y_flat, stats = pl.pallas_call(
        kernel1,
        out_shape=(jax.ShapeDtypeStruct((N, RB * TH * Wo, C_pad), jnp.bfloat16),
                   jax.ShapeDtypeStruct((N, RB, 2, C_pad), jnp.float32)),
        grid=(N, RB),
        in_specs=[
            pl.BlockSpec((None, Hp_pad, Wp, Cin), lambda n, r: (n, 0, 0, 0)),
            pl.BlockSpec((KK, Cin, C_pad), lambda n, r: (0, 0, 0)),
        ],
        out_specs=(
            pl.BlockSpec((None, TH * Wo, C_pad), lambda n, r: (n, r, 0)),
            pl.BlockSpec((None, None, 2, C_pad), lambda n, r: (n, r, 0, 0)),
        ),
        compiler_params=cparams1,
    )(xp, w)

    # ---- fold BN (train-mode batch stats) into per-channel scale/shift ---------------
    cnt = N * Ho * Wo
    total_sum = jnp.sum(stats[:, :, 0, :], axis=(0, 1))
    total_ssq = jnp.sum(stats[:, :, 1, :], axis=(0, 1))
    mean = total_sum / cnt
    var = jnp.maximum(total_ssq / cnt - mean * mean, 0.0)   # biased variance (BN fwd)
    inv = jax.lax.rsqrt(var + eps)
    gamma_p = jnp.pad(gamma.astype(jnp.float32), (0, C_pad - Cout))
    beta_p = jnp.pad(beta.astype(jnp.float32), (0, C_pad - Cout))
    scale = (gamma_p * inv).reshape(1, C_pad)
    shift = (beta_p - mean * gamma_p * inv).reshape(1, C_pad)

    # ---- pass-2 tile: large, independent of pass-1 (tiny working set) ----------------
    rows_per_block = TH * Wo
    blocks_total = N * RB

    def p2_vmem(rows):
        return 2 * rows * C_pad * (2 + out_bytes) + 4 * C_pad * 4 * 2

    target_rows_p2 = 2048
    best_d = 1
    for d in range(1, blocks_total + 1):
        if blocks_total % d:
            continue
        rows = d * rows_per_block
        if rows > max(target_rows_p2, rows_per_block):
            continue
        if p2_vmem(rows) > tile_budget:
            continue
        if blocks_total // d < min(2, blocks_total):        # keep >= 2 steps (v7x)
            continue
        best_d = d
    tm2 = best_d * rows_per_block
    G2 = blocks_total // best_d
    M_pad2 = blocks_total * rows_per_block

    cparams2 = pltpu.CompilerParams(
        dimension_semantics=("parallel",),
        vmem_limit_bytes=int(min(vmem_cap, max(32 << 20, 2 * p2_vmem(tm2) + (16 << 20)))),
    )

    y2 = y_flat.reshape(M_pad2, C_pad)

    # ---- pass 2: normalize + ReLU ------------------------------------------------------
    out_pad = pl.pallas_call(
        _bn_relu_kernel,
        out_shape=jax.ShapeDtypeStruct((M_pad2, C_pad), out_dtype),
        grid=(G2,),
        in_specs=[
            pl.BlockSpec((tm2, C_pad), lambda i: (i, 0)),
            pl.BlockSpec((1, C_pad), lambda i: (0, 0)),
            pl.BlockSpec((1, C_pad), lambda i: (0, 0)),
        ],
        out_specs=pl.BlockSpec((tm2, C_pad), lambda i: (i, 0)),
        compiler_params=cparams2,
    )(y2, scale, shift)

    # TODO(synk): fold this slice + NCHW transpose into pass 2 (transposed store).
    out_nhwc = out_pad.reshape(N, Ho_pad, Wo, C_pad)[:, :Ho, :, :Cout]
    return jnp.transpose(out_nhwc, (0, 3, 1, 2))             # NCHW


if __name__ == "__main__":
    key = jax.random.PRNGKey(0)
    k_x, k_w, k_g, k_b = jax.random.split(key, 4)

    N, Cin, H, W = 2, 4, 16, 16
    Cout, K = 8, 3

    x = jax.random.normal(k_x, (N, Cin, H, W), jnp.float32)
    weight = 0.1 * jax.random.normal(k_w, (Cout, Cin, K, K), jnp.float32)  # bias=False
    gamma = 1.0 + 0.1 * jax.random.normal(k_g, (Cout,), jnp.float32)       # BN weight
    beta = 0.1 * jax.random.normal(k_b, (Cout,), jnp.float32)              # BN bias

    fn = jax.jit(functools.partial(conv_bn_relu, kernel_size=K, dilation=1))
    out = jax.block_until_ready(fn(x, weight, gamma, beta))

    # Pure-JAX reference: conv -> train-mode BN -> ReLU, in f32 on the same
    # bf16-rounded operands the MXU consumes (kernel accumulates in f32).
    xr = x.astype(jnp.bfloat16).astype(jnp.float32)
    wr = weight.astype(jnp.bfloat16).astype(jnp.float32)
    conv_ref = jax.lax.conv_general_dilated(
        xr, wr, window_strides=(1, 1), padding=[(1, 1), (1, 1)],
        rhs_dilation=(1, 1), dimension_numbers=("NCHW", "OIHW", "NCHW"))
    m = jnp.mean(conv_ref, axis=(0, 2, 3), keepdims=True)
    v = jnp.mean((conv_ref - m) ** 2, axis=(0, 2, 3), keepdims=True)
    ref = (conv_ref - m) * jax.lax.rsqrt(v + 1e-5)
    ref = ref * gamma.reshape(1, -1, 1, 1) + beta.reshape(1, -1, 1, 1)
    ref = jnp.maximum(ref, 0.0)

    assert out.shape == (N, Cout, H, W)
    err = float(jnp.max(jnp.abs(out - ref)))
    assert err < 2e-2, err            # bf16 y-intermediate rounding bound
    print("KERNEL_OK")
</pallas_src>

<mosaic_0001>
module attributes {stable_mosaic.version = 11 : i64} {
  func.func @kernel(%arg0: i32, %arg1: i32, %arg2: memref<1x18x18x4xbf16, #tpu.memory_space<vmem>>, %arg3: memref<9x4x128xbf16, #tpu.memory_space<vmem>>, %arg4: memref<1x256x128xbf16, #tpu.memory_space<vmem>>, %arg5: memref<1x1x2x128xf32, #tpu.memory_space<vmem>>) attributes {dimension_semantics = [#tpu.dimension_semantics<parallel>, #tpu.dimension_semantics<parallel>], iteration_bounds = array<i64: 2, 1>, scalar_prefetch = 0 : i64, scratch_operands = 0 : i64, tpu.core_type = #tpu.core_type<tc>, window_params = [{transform_indices = @transform_0, window_bounds = array<i64: 1, 18, 18, 4>}, {pipeline_mode = #tpu.pipeline_mode<synchronous>, transform_indices = @transform_1, window_bounds = array<i64: 9, 4, 128>}, {transform_indices = @transform_2, window_bounds = array<i64: 1, 256, 128>}, {transform_indices = @transform_3, window_bounds = array<i64: 1, 1, 2, 128>}]} {
    %c16_i32 = arith.constant 16 : i32
    %0 = arith.muli %arg1, %c16_i32 : i32
    %c0_i32 = arith.constant 0 : i32
    %1 = arith.addi %0, %c0_i32 : i32
    %c0 = arith.constant 0 : index
    %2 = arith.index_cast %1 : i32 to index
    %c0_0 = arith.constant 0 : index
    %c0_1 = arith.constant 0 : index
    %3 = vector.load %arg2[%c0, %2, %c0_0, %c0_1] : memref<1x18x18x4xbf16, #tpu.memory_space<vmem>>, vector<1x16x18x4xbf16>
    %4 = vector.shape_cast %3 : vector<1x16x18x4xbf16> to vector<16x18x4xbf16>
    %5 = vector.extract_strided_slice %4 {offsets = [0, 0, 0], sizes = [16, 16, 4], strides = [1, 1, 1]} : vector<16x18x4xbf16> to vector<16x16x4xbf16>
    %6 = vector.shape_cast %5 : vector<16x16x4xbf16> to vector<256x4xbf16>
    %c0_2 = arith.constant 0 : index
    %c0_3 = arith.constant 0 : index
    %c0_4 = arith.constant 0 : index
    %7 = vector.load %arg3[%c0_2, %c0_3, %c0_4] : memref<9x4x128xbf16, #tpu.memory_space<vmem>>, vector<1x4x128xbf16>
    %8 = vector.shape_cast %7 : vector<1x4x128xbf16> to vector<4x128xbf16>
    %cst = arith.constant dense<0.000000e+00> : vector<256x128xf32>
    %9 = tpu.matmul %6, %8, %cst {dimension_numbers = #tpu.dot_dimension_numbers<[1], [0], [0], [1], [0, 0, 1, 1], [], []>} : vector<256x4xbf16>, vector<4x128xbf16>, vector<256x128xf32> -> vector<256x128xf32>
    %10 = vector.extract_strided_slice %4 {offsets = [0, 1, 0], sizes = [16, 16, 4], strides = [1, 1, 1]} : vector<16x18x4xbf16> to vector<16x16x4xbf16>
    %11 = vector.shape_cast %10 : vector<16x16x4xbf16> to vector<256x4xbf16>
    %c1 = arith.constant 1 : index
    %c0_5 = arith.constant 0 : index
    %c0_6 = arith.constant 0 : index
    %12 = vector.load %arg3[%c1, %c0_5, %c0_6] : memref<9x4x128xbf16, #tpu.memory_space<vmem>>, vector<1x4x128xbf16>
    %13 = vector.shape_cast %12 : vector<1x4x128xbf16> to vector<4x128xbf16>
    %cst_7 = arith.constant dense<0.000000e+00> : vector<256x128xf32>
    %14 = tpu.matmul %11, %13, %cst_7 {dimension_numbers = #tpu.dot_dimension_numbers<[1], [0], [0], [1], [0, 0, 1, 1], [], []>} : vector<256x4xbf16>, vector<4x128xbf16>, vector<256x128xf32> -> vector<256x128xf32>
    %15 = arith.addf %9, %14 : vector<256x128xf32>
    %16 = vector.extract_strided_slice %4 {offsets = [0, 2, 0], sizes = [16, 16, 4], strides = [1, 1, 1]} : vector<16x18x4xbf16> to vector<16x16x4xbf16>
    %17 = vector.shape_cast %16 : vector<16x16x4xbf16> to vector<256x4xbf16>
    %c2 = arith.constant 2 : index
    %c0_8 = arith.constant 0 : index
    %c0_9 = arith.constant 0 : index
    %18 = vector.load %arg3[%c2, %c0_8, %c0_9] : memref<9x4x128xbf16, #tpu.memory_space<vmem>>, vector<1x4x128xbf16>
    %19 = vector.shape_cast %18 : vector<1x4x128xbf16> to vector<4x128xbf16>
    %cst_10 = arith.constant dense<0.000000e+00> : vector<256x128xf32>
    %20 = tpu.matmul %17, %19, %cst_10 {dimension_numbers = #tpu.dot_dimension_numbers<[1], [0], [0], [1], [0, 0, 1, 1], [], []>} : vector<256x4xbf16>, vector<4x128xbf16>, vector<256x128xf32> -> vector<256x128xf32>
    %21 = arith.addf %15, %20 : vector<256x128xf32>
    %c1_i32 = arith.constant 1 : i32
    %22 = arith.addi %0, %c1_i32 : i32
    %c0_11 = arith.constant 0 : index
    %23 = arith.index_cast %22 : i32 to index
    %c0_12 = arith.constant 0 : index
    %c0_13 = arith.constant 0 : index
    %24 = vector.load %arg2[%c0_11, %23, %c0_12, %c0_13] : memref<1x18x18x4xbf16, #tpu.memory_space<vmem>>, vector<1x16x18x4xbf16>
    %25 = vector.shape_cast %24 : vector<1x16x18x4xbf16> to vector<16x18x4xbf16>
    %26 = vector.extract_strided_slice %25 {offsets = [0, 0, 0], sizes = [16, 16, 4], strides = [1, 1, 1]} : vector<16x18x4xbf16> to vector<16x16x4xbf16>
    %27 = vector.shape_cast %26 : vector<16x16x4xbf16> to vector<256x4xbf16>
    %c3 = arith.constant 3 : index
    %c0_14 = arith.constant 0 : index
    %c0_15 = arith.constant 0 : index
    %28 = vector.load %arg3[%c3, %c0_14, %c0_15] : memref<9x4x128xbf16, #tpu.memory_space<vmem>>, vector<1x4x128xbf16>
    %29 = vector.shape_cast %28 : vector<1x4x128xbf16> to vector<4x128xbf16>
    %cst_16 = arith.constant dense<0.000000e+00> : vector<256x128xf32>
    %30 = tpu.matmul %27, %29, %cst_16 {dimension_numbers = #tpu.dot_dimension_numbers<[1], [0], [0], [1], [0, 0, 1, 1], [], []>} : vector<256x4xbf16>, vector<4x128xbf16>, vector<256x128xf32> -> vector<256x128xf32>
    %31 = arith.addf %21, %30 : vector<256x128xf32>
    %32 = vector.extract_strided_slice %25 {offsets = [0, 1, 0], sizes = [16, 16, 4], strides = [1, 1, 1]} : vector<16x18x4xbf16> to vector<16x16x4xbf16>
    %33 = vector.shape_cast %32 : vector<16x16x4xbf16> to vector<256x4xbf16>
    %c4 = arith.constant 4 : index
    %c0_17 = arith.constant 0 : index
    %c0_18 = arith.constant 0 : index
    %34 = vector.load %arg3[%c4, %c0_17, %c0_18] : memref<9x4x128xbf16, #tpu.memory_space<vmem>>, vector<1x4x128xbf16>
    %35 = vector.shape_cast %34 : vector<1x4x128xbf16> to vector<4x128xbf16>
    %cst_19 = arith.constant dense<0.000000e+00> : vector<256x128xf32>
    %36 = tpu.matmul %33, %35, %cst_19 {dimension_numbers = #tpu.dot_dimension_numbers<[1], [0], [0], [1], [0, 0, 1, 1], [], []>} : vector<256x4xbf16>, vector<4x128xbf16>, vector<256x128xf32> -> vector<256x128xf32>
    %37 = arith.addf %31, %36 : vector<256x128xf32>
    %38 = vector.extract_strided_slice %25 {offsets = [0, 2, 0], sizes = [16, 16, 4], strides = [1, 1, 1]} : vector<16x18x4xbf16> to vector<16x16x4xbf16>
    %39 = vector.shape_cast %38 : vector<16x16x4xbf16> to vector<256x4xbf16>
    %c5 = arith.constant 5 : index
    %c0_20 = arith.constant 0 : index
    %c0_21 = arith.constant 0 : index
    %40 = vector.load %arg3[%c5, %c0_20, %c0_21] : memref<9x4x128xbf16, #tpu.memory_space<vmem>>, vector<1x4x128xbf16>
    %41 = vector.shape_cast %40 : vector<1x4x128xbf16> to vector<4x128xbf16>
    %cst_22 = arith.constant dense<0.000000e+00> : vector<256x128xf32>
    %42 = tpu.matmul %39, %41, %cst_22 {dimension_numbers = #tpu.dot_dimension_numbers<[1], [0], [0], [1], [0, 0, 1, 1], [], []>} : vector<256x4xbf16>, vector<4x128xbf16>, vector<256x128xf32> -> vector<256x128xf32>
    %43 = arith.addf %37, %42 : vector<256x128xf32>
    %c2_i32 = arith.constant 2 : i32
    %44 = arith.addi %0, %c2_i32 : i32
    %c0_23 = arith.constant 0 : index
    %45 = arith.index_cast %44 : i32 to index
    %c0_24 = arith.constant 0 : index
    %c0_25 = arith.constant 0 : index
    %46 = vector.load %arg2[%c0_23, %45, %c0_24, %c0_25] : memref<1x18x18x4xbf16, #tpu.memory_space<vmem>>, vector<1x16x18x4xbf16>
    %47 = vector.shape_cast %46 : vector<1x16x18x4xbf16> to vector<16x18x4xbf16>
    %48 = vector.extract_strided_slice %47 {offsets = [0, 0, 0], sizes = [16, 16, 4], strides = [1, 1, 1]} : vector<16x18x4xbf16> to vector<16x16x4xbf16>
    %49 = vector.shape_cast %48 : vector<16x16x4xbf16> to vector<256x4xbf16>
    %c6 = arith.constant 6 : index
    %c0_26 = arith.constant 0 : index
    %c0_27 = arith.constant 0 : index
    %50 = vector.load %arg3[%c6, %c0_26, %c0_27] : memref<9x4x128xbf16, #tpu.memory_space<vmem>>, vector<1x4x128xbf16>
    %51 = vector.shape_cast %50 : vector<1x4x128xbf16> to vector<4x128xbf16>
    %cst_28 = arith.constant dense<0.000000e+00> : vector<256x128xf32>
    %52 = tpu.matmul %49, %51, %cst_28 {dimension_numbers = #tpu.dot_dimension_numbers<[1], [0], [0], [1], [0, 0, 1, 1], [], []>} : vector<256x4xbf16>, vector<4x128xbf16>, vector<256x128xf32> -> vector<256x128xf32>
    %53 = arith.addf %43, %52 : vector<256x128xf32>
    %54 = vector.extract_strided_slice %47 {offsets = [0, 1, 0], sizes = [16, 16, 4], strides = [1, 1, 1]} : vector<16x18x4xbf16> to vector<16x16x4xbf16>
    %55 = vector.shape_cast %54 : vector<16x16x4xbf16> to vector<256x4xbf16>
    %c7 = arith.constant 7 : index
    %c0_29 = arith.constant 0 : index
    %c0_30 = arith.constant 0 : index
    %56 = vector.load %arg3[%c7, %c0_29, %c0_30] : memref<9x4x128xbf16, #tpu.memory_space<vmem>>, vector<1x4x128xbf16>
    %57 = vector.shape_cast %56 : vector<1x4x128xbf16> to vector<4x128xbf16>
    %cst_31 = arith.constant dense<0.000000e+00> : vector<256x128xf32>
    %58 = tpu.matmul %55, %57, %cst_31 {dimension_numbers = #tpu.dot_dimension_numbers<[1], [0], [0], [1], [0, 0, 1, 1], [], []>} : vector<256x4xbf16>, vector<4x128xbf16>, vector<256x128xf32> -> vector<256x128xf32>
    %59 = arith.addf %53, %58 : vector<256x128xf32>
    %60 = vector.extract_strided_slice %47 {offsets = [0, 2, 0], sizes = [16, 16, 4], strides = [1, 1, 1]} : vector<16x18x4xbf16> to vector<16x16x4xbf16>
    %61 = vector.shape_cast %60 : vector<16x16x4xbf16> to vector<256x4xbf16>
    %c8 = arith.constant 8 : index
    %c0_32 = arith.constant 0 : index
    %c0_33 = arith.constant 0 : index
    %62 = vector.load %arg3[%c8, %c0_32, %c0_33] : memref<9x4x128xbf16, #tpu.memory_space<vmem>>, vector<1x4x128xbf16>
    %63 = vector.shape_cast %62 : vector<1x4x128xbf16> to vector<4x128xbf16>
    %cst_34 = arith.constant dense<0.000000e+00> : vector<256x128xf32>
    %64 = tpu.matmul %61, %63, %cst_34 {dimension_numbers = #tpu.dot_dimension_numbers<[1], [0], [0], [1], [0, 0, 1, 1], [], []>} : vector<256x4xbf16>, vector<4x128xbf16>, vector<256x128xf32> -> vector<256x128xf32>
    %65 = arith.addf %59, %64 : vector<256x128xf32>
    %cst_35 = arith.constant dense<0.000000e+00> : vector<128xf32>
    %66 = vector.multi_reduction <add>, %65, %cst_35 [0] : vector<256x128xf32> to vector<128xf32>
    %67 = vector.shape_cast %66 : vector<128xf32> to vector<1x128xf32>
    %68 = arith.mulf %65, %65 : vector<256x128xf32>
    %cst_36 = arith.constant dense<0.000000e+00> : vector<128xf32>
    %69 = vector.multi_reduction <add>, %68, %cst_36 [0] : vector<256x128xf32> to vector<128xf32>
    %70 = vector.shape_cast %69 : vector<128xf32> to vector<1x128xf32>
    %71 = tpu.concatenate %67, %70 in 0 : vector<1x128xf32>, vector<1x128xf32> -> vector<2x128xf32>
    %c0_37 = arith.constant 0 : index
    %c0_38 = arith.constant 0 : index
    %c0_39 = arith.constant 0 : index
    %c0_40 = arith.constant 0 : index
    %72 = vector.load %arg5[%c0_37, %c0_38, %c0_39, %c0_40] : memref<1x1x2x128xf32, #tpu.memory_space<vmem>>, vector<1x1x2x128xf32>
    %73 = vector.shape_cast %72 : vector<1x1x2x128xf32> to vector<2x128xf32>
    %74 = vector.shape_cast %71 : vector<2x128xf32> to vector<1x1x2x128xf32>
    tpu.vector_store %arg5[%c0_37, %c0_38, %c0_39, %c0_40], %74 {strides = array<i32>} : memref<1x1x2x128xf32, #tpu.memory_space<vmem>>, vector<1x1x2x128xf32>,
    %75 = arith.truncf %65 : vector<256x128xf32> to vector<256x128xbf16>
    %c0_41 = arith.constant 0 : index
    %c0_42 = arith.constant 0 : index
    %c0_43 = arith.constant 0 : index
    %76 = vector.load %arg4[%c0_41, %c0_42, %c0_43] : memref<1x256x128xbf16, #tpu.memory_space<vmem>>, vector<1x256x128xbf16>
    %77 = vector.shape_cast %76 : vector<1x256x128xbf16> to vector<256x128xbf16>
    %78 = vector.shape_cast %75 : vector<256x128xbf16> to vector<1x256x128xbf16>
    tpu.vector_store %arg4[%c0_41, %c0_42, %c0_43], %78 {strides = array<i32>} : memref<1x256x128xbf16, #tpu.memory_space<vmem>>, vector<1x256x128xbf16>,
    return
  }
  func.func @transform_0(%arg0: i32, %arg1: i32) -> (i32, i32, i32, i32) {
    %c0_i32 = arith.constant 0 : i32
    %c0_i32_0 = arith.constant 0 : i32
    %c0_i32_1 = arith.constant 0 : i32
    %c0_i32_2 = arith.constant 0 : i32
    return %arg0, %c0_i32, %c0_i32_0, %c0_i32_1 : i32, i32, i32, i32
  }
  func.func @transform_1(%arg0: i32, %arg1: i32) -> (i32, i32, i32) {
    %c0_i32 = arith.constant 0 : i32
    %c0_i32_0 = arith.constant 0 : i32
    %c0_i32_1 = arith.constant 0 : i32
    %c0_i32_2 = arith.constant 0 : i32
    return %c0_i32, %c0_i32_0, %c0_i32_1 : i32, i32, i32
  }
  func.func @transform_2(%arg0: i32, %arg1: i32) -> (i32, i32, i32) {
    %c0_i32 = arith.constant 0 : i32
    %c0_i32_0 = arith.constant 0 : i32
    return %arg0, %arg1, %c0_i32 : i32, i32, i32
  }
  func.func @transform_3(%arg0: i32, %arg1: i32) -> (i32, i32, i32, i32) {
    %c0_i32 = arith.constant 0 : i32
    %c0_i32_0 = arith.constant 0 : i32
    %c0_i32_1 = arith.constant 0 : i32
    return %arg0, %arg1, %c0_i32, %c0_i32_0 : i32, i32, i32, i32
  }
}

module attributes {stable_mosaic.version = 11 : i64} {
  func.func @_bn_relu_kernel(%arg0: i32, %arg1: memref<256x128xbf16, #tpu.memory_space<vmem>>, %arg2: memref<1x128xf32, #tpu.memory_space<vmem>>, %arg3: memref<1x128xf32, #tpu.memory_space<vmem>>, %arg4: memref<256x128xf32, #tpu.memory_space<vmem>>) attributes {dimension_semantics = [#tpu.dimension_semantics<parallel>], iteration_bounds = array<i64: 2>, scalar_prefetch = 0 : i64, scratch_operands = 0 : i64, tpu.core_type = #tpu.core_type<tc>, window_params = [{transform_indices = @transform_0, window_bounds = array<i64: 256, 128>}, {pipeline_mode = #tpu.pipeline_mode<synchronous>, transform_indices = @transform_1, window_bounds = array<i64: 1, 128>}, {pipeline_mode = #tpu.pipeline_mode<synchronous>, transform_indices = @transform_2, window_bounds = array<i64: 1, 128>}, {transform_indices = @transform_3, window_bounds = array<i64: 256, 128>}]} {
    %c0 = arith.constant 0 : index
    %c0_0 = arith.constant 0 : index
    %0 = vector.load %arg1[%c0, %c0_0] : memref<256x128xbf16, #tpu.memory_space<vmem>>, vector<256x128xbf16>
    %1 = arith.extf %0 : vector<256x128xbf16> to vector<256x128xf32>
    %c0_1 = arith.constant 0 : index
    %c0_2 = arith.constant 0 : index
    %2 = vector.load %arg2[%c0_1, %c0_2] : memref<1x128xf32, #tpu.memory_space<vmem>>, vector<1x128xf32>
    %3 = vector.broadcast %2 : vector<1x128xf32> to vector<256x128xf32>
    %4 = arith.mulf %1, %3 : vector<256x128xf32>
    %c0_3 = arith.constant 0 : index
    %c0_4 = arith.constant 0 : index
    %5 = vector.load %arg3[%c0_3, %c0_4] : memref<1x128xf32, #tpu.memory_space<vmem>>, vector<1x128xf32>
    %6 = vector.broadcast %5 : vector<1x128xf32> to vector<256x128xf32>
    %7 = arith.addf %4, %6 : vector<256x128xf32>
    %cst = arith.constant 0.000000e+00 : f32
    %8 = vector.broadcast %cst : f32 to vector<256x128xf32>
    %9 = arith.maximumf %7, %8 : vector<256x128xf32>
    %c0_5 = arith.constant 0 : index
    %c0_6 = arith.constant 0 : index
    %10 = vector.load %arg4[%c0_5, %c0_6] : memref<256x128xf32, #tpu.memory_space<vmem>>, vector<256x128xf32>
    tpu.vector_store %arg4[%c0_5, %c0_6], %9 {strides = array<i32>} : memref<256x128xf32, #tpu.memory_space<vmem>>, vector<256x128xf32>,
    return
  }
  func.func @transform_0(%arg0: i32) -> (i32, i32) {
    %c0_i32 = arith.constant 0 : i32
    %c0_i32_0 = arith.constant 0 : i32
    return %arg0, %c0_i32 : i32, i32
  }
  func.func @transform_1(%arg0: i32) -> (i32, i32) {
    %c0_i32 = arith.constant 0 : i32
    %c0_i32_0 = arith.constant 0 : i32
    %c0_i32_1 = arith.constant 0 : i32
    return %c0_i32, %c0_i32_0 : i32, i32
  }
  func.func @transform_2(%arg0: i32) -> (i32, i32) {
    %c0_i32 = arith.constant 0 : i32
    %c0_i32_0 = arith.constant 0 : i32
    %c0_i32_1 = arith.constant 0 : i32
    return %c0_i32, %c0_i32_0 : i32, i32
  }
  func.func @transform_3(%arg0: i32) -> (i32, i32) {
    %c0_i32 = arith.constant 0 : i32
    %c0_i32_0 = arith.constant 0 : i32
    return %arg0, %c0_i32 : i32, i32
  }
}

</mosaic_0001>

<bundles_post_ra>
// kernel: conv_bn_relu.3
= control target key start
LH: loop header
LB: loop body
LE: loop exit
PB: predicated region body
PF: predicated region fallthrough
CT: control target
= control target key end

     0   :  { %s564_s12 = smov 0   ;;  %s711_s0 = inlined_call_operand.vmem [shape: bf16[512,128], index: 0, kind: input, shape index: {}]   ;;  %s712_s1 = inlined_call_operand.vmem [shape: f32[1,128], index: 1, kind: input, shape index: {}]   ;;  %s713_s2 = inlined_call_operand.vmem [shape: f32[1,128], index: 2, kind: input, shape index: {}]   ;;  %s714_s3 = inlined_call_operand.vmem [shape: f32[512,128], index: 3, kind: output, shape index: {}]  }
   0x1 LB: > { %s436_s13 = sadd.s32 4294967295, %s542_s12   ;;  %p440_p0 = scmp.ge.s32.totalorder %s542_s12, 1  ;;  %s542_s12 = sphi %s564_s12, %s13_s12  }
   0x2   : > { %p138_p1 = scmp.lt.s32.totalorder %s542_s12, 3 }
   0x4   : > { %p139_p2 = pnand %p440_p0, %p138_p1 }
   0x5   : > { %s441_s14 = sshll.u32 (!%p139_p2), %s436_s13, 5 }
   0x6   : > { %142 = sbr.rel (%p139_p2) target bundleno = 51 (0x33), region = 32  ;;  %p163_p3 = scmp.lt.s32.totalorder (!%p139_p2), %s441_s14, 63 }
   0xb   : > { %s716_s14 = smov (!%p163_p3, %s441_s14), 63  ;;  %v583_v0 = vld [vmem:[%s712_s1] ss:$0 sm:$0xff] }
   0xc   : > { %s442_s15 = sshll.u32 %s716_s14, 2  ;;  %v592_v9 = vld [vmem:[%s713_s2] ss:$0 sm:$0xff]  ;;  %s444_s23 = sshll.u32 %s716_s14, 3 }
   0xd   : > { %s578_s18 = scalar_lea.vmem %s711_s0, %s442_s15  ;;  %s610_s26 = scalar_lea.vmem %s714_s3, %s444_s23 }
   0xe   : > { %v450_v1 = vld [vmem:[%s578_s18] sm:$0xff]   ;;  %v513_v2 = vld [vmem:[%s578_s18 + $0x8] sm:$0xff]   ;;  %v514_v3 = vld [vmem:[%s578_s18 + $0x10] sm:$0xff]  }
   0xf   : > { %v451_v4 = vunpack.c.l.bf16 %v450_v1  ;;  %v452_v5 = vunpack.c.h.bf16 %v450_v1  ;;  %v455_v6 = vunpack.c.l.bf16 %v513_v2  ;;  %v456_v7 = vunpack.c.h.bf16 %v513_v2  ;;  %v515_v8 = vld [vmem:[%s578_s18 + $0x18] sm:$0xff]   ;;  %v516_v30 = vld [vmem:[%s578_s18 + $0x20] sm:$0xff]   ;;  %v517_v31 = vld [vmem:[%s578_s18 + $0x28] sm:$0xff]  }
  0x10   : > { %v459_v10 = vunpack.c.l.bf16 %v514_v3  ;;  %v460_v11 = vunpack.c.h.bf16 %v514_v3  ;;  %v463_v12 = vunpack.c.l.bf16 %v515_v8  ;;  %v464_v13 = vunpack.c.h.bf16 %v515_v8  ;;  %v518_v36 = vld [vmem:[%s578_s18 + $0x30] sm:$0xff]   ;;  %v519_v37 = vld [vmem:[%s578_s18 + $0x38] sm:$0xff]   ;;  %v520_v3 = vld [vmem:[%s578_s18 + $0x40] sm:$0xff]  }
  0x11   : > { %v245_v14 = vmul.f32 %v451_v4, %v583_v0  ;;  %v246_v15 = vmul.f32 %v452_v5, %v583_v0  ;;  %v247_v16 = vmul.f32 %v455_v6, %v583_v0  ;;  %v248_v17 = vmul.f32 %v456_v7, %v583_v0  ;;  %v521_v4 = vld [vmem:[%s578_s18 + $0x48] sm:$0xff]  }
  0x12   : > { %v249_v18 = vmul.f32 %v459_v10, %v583_v0  ;;  %v250_v19 = vmul.f32 %v460_v11, %v583_v0  ;;  %v251_v20 = vmul.f32 %v463_v12, %v583_v0  ;;  %v252_v21 = vmul.f32 %v464_v13, %v583_v0  ;;  %v522_v10 = vld [vmem:[%s578_s18 + $0x50] sm:$0xff]   ;;  %v523_v11 = vld [vmem:[%s578_s18 + $0x58] sm:$0xff]  }
  0x13   : > { %v284_v22 = vadd.f32 %v592_v9, %v245_v14  ;;  %v285_v23 = vadd.f32 %v592_v9, %v246_v15  ;;  %v286_v24 = vadd.f32 %v592_v9, %v247_v16  ;;  %v287_v25 = vadd.f32 %v592_v9, %v248_v17 }
  0x14   : > { %v288_v26 = vadd.f32 %v592_v9, %v249_v18  ;;  %v289_v27 = vadd.f32 %v592_v9, %v250_v19  ;;  %v290_v28 = vadd.f32 %v592_v9, %v251_v20  ;;  %v291_v29 = vadd.f32 %v592_v9, %v252_v21 }
  0x15   : > { %v316_v32 = vmax.f32 %v284_v22, 0.0  ;;  %v317_v33 = vmax.f32 %v285_v23, 0.0  ;;  %v318_v34 = vmax.f32 %v286_v24, 0.0  ;;  %v319_v35 = vmax.f32 %v287_v25, 0.0 }
  0x16   : > { %v320_v38 = vmax.f32 %v288_v26, 0.0  ;;  %v321_v39 = vmax.f32 %v289_v27, 0.0  ;;  %v322_v40 = vmax.f32 %v290_v28, 0.0  ;;  %v323_v41 = vmax.f32 %v291_v29, 0.0 }
  0x17   : > { %348 = vst [vmem:[%s610_s26] sm:$0xff] %v316_v32  ;;  %349 = vst [vmem:[%s610_s26 + $0x8] sm:$0xff] %v317_v33  ;;  %v467_v42 = vunpack.c.l.bf16 %v516_v30  ;;  %v468_v43 = vunpack.c.h.bf16 %v516_v30  ;;  %v471_v44 = vunpack.c.l.bf16 %v517_v31  ;;  %v472_v45 = vunpack.c.h.bf16 %v517_v31 }
  0x18   : > { %350 = vst [vmem:[%s610_s26 + $0x10] sm:$0xff] %v318_v34  ;;  %351 = vst [vmem:[%s610_s26 + $0x18] sm:$0xff] %v319_v35  ;;  %v475_v46 = vunpack.c.l.bf16 %v518_v36  ;;  %v476_v47 = vunpack.c.h.bf16 %v518_v36  ;;  %v479_v48 = vunpack.c.l.bf16 %v519_v37  ;;  %v480_v49 = vunpack.c.h.bf16 %v519_v37 }
  0x19   : > { %352 = vst [vmem:[%s610_s26 + $0x20] sm:$0xff] %v320_v38  ;;  %353 = vst [vmem:[%s610_s26 + $0x28] sm:$0xff] %v321_v39  ;;  %v253_v50 = vmul.f32 %v467_v42, %v583_v0  ;;  %v254_v51 = vmul.f32 %v468_v43, %v583_v0  ;;  %v255_v52 = vmul.f32 %v471_v44, %v583_v0  ;;  %v483_v16 = vunpack.c.l.bf16 %v520_v3 }
  0x1a   : > { %354 = vst [vmem:[%s610_s26 + $0x30] sm:$0xff] %v322_v40  ;;  %355 = vst [vmem:[%s610_s26 + $0x38] sm:$0xff] %v323_v41  ;;  %v256_v53 = vmul.f32 %v472_v45, %v583_v0  ;;  %v257_v54 = vmul.f32 %v475_v46, %v583_v0  ;;  %v258_v55 = vmul.f32 %v476_v47, %v583_v0  ;;  %v484_v17 = vunpack.c.h.bf16 %v520_v3  ;;  %v524_v40 = vld [vmem:[%s578_s18 + $0x60] sm:$0xff]   ;;  %v525_v41 = vld [vmem:[%s578_s18 + $0x68] sm:$0xff]  }
  0x1b   : > { %v259_v56 = vmul.f32 %v479_v48, %v583_v0  ;;  %v260_v57 = vmul.f32 %v480_v49, %v583_v0  ;;  %v292_v58 = vadd.f32 %v592_v9, %v253_v50  ;;  %v293_v59 = vadd.f32 %v592_v9, %v254_v51  ;;  %v526_v46 = vld [vmem:[%s578_s18 + $0x70] sm:$0xff]   ;;  %v527_v47 = vld [vmem:[%s578_s18 + $0x78] sm:$0xff]  }
  0x1c   : > { %v294_v60 = vadd.f32 %v592_v9, %v255_v52  ;;  %v295_v61 = vadd.f32 %v592_v9, %v256_v53  ;;  %v296_v62 = vadd.f32 %v592_v9, %v257_v54  ;;  %v297_v63 = vadd.f32 %v592_v9, %v258_v55 }
  0x1d   : > { %v298_v1 = vadd.f32 %v592_v9, %v259_v56  ;;  %v299_v2 = vadd.f32 %v592_v9, %v260_v57  ;;  %v324_v5 = vmax.f32 %v292_v58, 0.0  ;;  %v325_v6 = vmax.f32 %v293_v59, 0.0 }
  0x1e   : > { %v326_v7 = vmax.f32 %v294_v60, 0.0  ;;  %v327_v8 = vmax.f32 %v295_v61, 0.0  ;;  %v328_v12 = vmax.f32 %v296_v62, 0.0  ;;  %v329_v13 = vmax.f32 %v297_v63, 0.0 }
  0x1f   : > { %v330_v14 = vmax.f32 %v298_v1, 0.0  ;;  %v331_v15 = vmax.f32 %v299_v2, 0.0  ;;  %356 = vst [vmem:[%s610_s26 + $0x40] sm:$0xff] %v324_v5  ;;  %357 = vst [vmem:[%s610_s26 + $0x48] sm:$0xff] %v325_v6  ;;  %v487_v18 = vunpack.c.l.bf16 %v521_v4  ;;  %v488_v19 = vunpack.c.h.bf16 %v521_v4 }
  0x20   : > { %358 = vst [vmem:[%s610_s26 + $0x50] sm:$0xff] %v326_v7  ;;  %359 = vst [vmem:[%s610_s26 + $0x58] sm:$0xff] %v327_v8  ;;  %v491_v20 = vunpack.c.l.bf16 %v522_v10  ;;  %v492_v21 = vunpack.c.h.bf16 %v522_v10  ;;  %v495_v22 = vunpack.c.l.bf16 %v523_v11  ;;  %v496_v23 = vunpack.c.h.bf16 %v523_v11 }
  0x21   : > { %360 = vst [vmem:[%s610_s26 + $0x60] sm:$0xff] %v328_v12  ;;  %361 = vst [vmem:[%s610_s26 + $0x68] sm:$0xff] %v329_v13  ;;  %v261_v24 = vmul.f32 %v483_v16, %v583_v0  ;;  %v262_v25 = vmul.f32 %v484_v17, %v583_v0  ;;  %v263_v26 = vmul.f32 %v487_v18, %v583_v0  ;;  %v499_v52 = vunpack.c.l.bf16 %v524_v40 }
  0x22   : > { %362 = vst [vmem:[%s610_s26 + $0x70] sm:$0xff] %v330_v14  ;;  %363 = vst [vmem:[%s610_s26 + $0x78] sm:$0xff] %v331_v15  ;;  %v264_v27 = vmul.f32 %v488_v19, %v583_v0  ;;  %v265_v28 = vmul.f32 %v491_v20, %v583_v0  ;;  %v266_v29 = vmul.f32 %v492_v21, %v583_v0  ;;  %v500_v53 = vunpack.c.h.bf16 %v524_v40 }
  0x23   : > { %v267_v30 = vmul.f32 %v495_v22, %v583_v0  ;;  %v268_v31 = vmul.f32 %v496_v23, %v583_v0  ;;  %v300_v32 = vadd.f32 %v592_v9, %v261_v24  ;;  %v301_v33 = vadd.f32 %v592_v9, %v262_v25 }
  0x24   : > { %v302_v34 = vadd.f32 %v592_v9, %v263_v26  ;;  %v303_v35 = vadd.f32 %v592_v9, %v264_v27  ;;  %v304_v36 = vadd.f32 %v592_v9, %v265_v28  ;;  %v305_v37 = vadd.f32 %v592_v9, %v266_v29 }
  0x25   : > { %v306_v38 = vadd.f32 %v592_v9, %v267_v30  ;;  %v307_v39 = vadd.f32 %v592_v9, %v268_v31  ;;  %v332_v42 = vmax.f32 %v300_v32, 0.0  ;;  %v333_v43 = vmax.f32 %v301_v33, 0.0 }
  0x26   : > { %v334_v44 = vmax.f32 %v302_v34, 0.0  ;;  %v335_v45 = vmax.f32 %v303_v35, 0.0  ;;  %v336_v48 = vmax.f32 %v304_v36, 0.0  ;;  %v337_v49 = vmax.f32 %v305_v37, 0.0 }
  0x27   : > { %v338_v50 = vmax.f32 %v306_v38, 0.0  ;;  %v339_v51 = vmax.f32 %v307_v39, 0.0  ;;  %364 = vst [vmem:[%s610_s26 + $0x80] sm:$0xff] %v332_v42  ;;  %365 = vst [vmem:[%s610_s26 + $0x88] sm:$0xff] %v333_v43  ;;  %v503_v54 = vunpack.c.l.bf16 %v525_v41  ;;  %v504_v55 = vunpack.c.h.bf16 %v525_v41 }
  0x28   : > { %366 = vst [vmem:[%s610_s26 + $0x90] sm:$0xff] %v334_v44  ;;  %367 = vst [vmem:[%s610_s26 + $0x98] sm:$0xff] %v335_v45  ;;  %v507_v56 = vunpack.c.l.bf16 %v526_v46  ;;  %v508_v57 = vunpack.c.h.bf16 %v526_v46  ;;  %v511_v58 = vunpack.c.l.bf16 %v527_v47  ;;  %v512_v59 = vunpack.c.h.bf16 %v527_v47 }
  0x29   : > { %368 = vst [vmem:[%s610_s26 + $0xa0] sm:$0xff] %v336_v48  ;;  %369 = vst [vmem:[%s610_s26 + $0xa8] sm:$0xff] %v337_v49  ;;  %v269_v60 = vmul.f32 %v499_v52, %v583_v0  ;;  %v270_v61 = vmul.f32 %v500_v53, %v583_v0  ;;  %v271_v62 = vmul.f32 %v503_v54, %v583_v0 }
  0x2a   : > { %370 = vst [vmem:[%s610_s26 + $0xb0] sm:$0xff] %v338_v50  ;;  %371 = vst [vmem:[%s610_s26 + $0xb8] sm:$0xff] %v339_v51  ;;  %v272_v63 = vmul.f32 %v504_v55, %v583_v0  ;;  %v273_v1 = vmul.f32 %v507_v56, %v583_v0  ;;  %v274_v2 = vmul.f32 %v508_v57, %v583_v0 }
  0x2b   : > { %v275_v3 = vmul.f32 %v511_v58, %v583_v0  ;;  %v276_v4 = vmul.f32 %v512_v59, %v583_v0  ;;  %v308_v5 = vadd.f32 %v592_v9, %v269_v60  ;;  %v309_v6 = vadd.f32 %v592_v9, %v270_v61 }
  0x2c   : > { %v310_v7 = vadd.f32 %v592_v9, %v271_v62  ;;  %v311_v8 = vadd.f32 %v592_v9, %v272_v63  ;;  %v312_v10 = vadd.f32 %v592_v9, %v273_v1  ;;  %v313_v11 = vadd.f32 %v592_v9, %v274_v2 }
  0x2d   : > { %v314_v0 = vadd.f32 %v592_v9, %v275_v3  ;;  %v315_v12 = vadd.f32 %v592_v9, %v276_v4  ;;  %v340_v13 = vmax.f32 %v308_v5, 0.0  ;;  %v341_v14 = vmax.f32 %v309_v6, 0.0 }
  0x2e   : > { %v342_v15 = vmax.f32 %v310_v7, 0.0  ;;  %v343_v16 = vmax.f32 %v311_v8, 0.0  ;;  %v344_v17 = vmax.f32 %v312_v10, 0.0  ;;  %v345_v18 = vmax.f32 %v313_v11, 0.0 }
  0x2f   : > { %v346_v19 = vmax.f32 %v314_v0, 0.0  ;;  %v347_v20 = vmax.f32 %v315_v12, 0.0  ;;  %372 = vst [vmem:[%s610_s26 + $0xc0] sm:$0xff] %v340_v13  ;;  %373 = vst [vmem:[%s610_s26 + $0xc8] sm:$0xff] %v341_v14 }
  0x30   : > { %374 = vst [vmem:[%s610_s26 + $0xd0] sm:$0xff] %v342_v15  ;;  %375 = vst [vmem:[%s610_s26 + $0xd8] sm:$0xff] %v343_v16 }
  0x31   : > { %376 = vst [vmem:[%s610_s26 + $0xe0] sm:$0xff] %v344_v17  ;;  %377 = vst [vmem:[%s610_s26 + $0xe8] sm:$0xff] %v345_v18 }
  0x32   : > { %378 = vst [vmem:[%s610_s26 + $0xf0] sm:$0xff] %v346_v19  ;;  %379 = vst [vmem:[%s610_s26 + $0xf8] sm:$0xff] %v347_v20 }
  0x33 PF: > { %s13_s12 = sadd.s32 1, %s542_s12  }
  0x34   : > { %p10_p4 = scmp.ge.s32.totalorder %s13_s12, 4  }
  0x36   :  { %12 = sbr.rel (!%p10_p4) target bundleno = 1 (0x1), region = 62 }

// kernel: conv_bn_relu.2
= control target key start
LH: loop header
LB: loop body
LE: loop exit
PB: predicated region body
PF: predicated region fallthrough
CT: control target
= control target key end

     0   :  { %s6191_s12 = smov 0   ;;  %s6193_s13 = smov 0   ;;  %s8976_s0 = inlined_call_operand.vmem [shape: bf16[2,18,18,4], index: 0, kind: input, shape index: {}]   ;;  %s8977_s1 = inlined_call_operand.vmem [shape: bf16[9,4,128], index: 1, kind: input, shape index: {}]   ;;  %s8978_s2 = inlined_call_operand.vmem [shape: bf16[2,256,128], index: 2, kind: output, shape index: {0}]   ;;  %s8979_s3 = inlined_call_operand.vmem [shape: f32[2,1,2,128], index: 3, kind: output, shape index: {1}]  }
   0x1   :  { %s6195_s14 = smov 0  }
   0x2 LB: > { %s26_s15 = sadd.s32 1, %s6165_s13  ;;  %p4996_p0 = scmp.ge.s32.totalorder %s6169_s14, 1  ;;  %s6169_s14 = sphi %s6195_s14, %s14_s14   ;;  %s6165_s13 = sphi %s6193_s13, %s9426_s13   ;;  %s6161_s12 = sphi %s6191_s12, %s9425_s12  }
   0x3   : > { %p28_p1 = scmp.ge.s32.totalorder %s26_s15, 2  ;;  %p156_p2 = scmp.lt.s32.totalorder %s6169_s14, 3 }
   0x5   : > { %s9428_s15 = smov (%p28_p1, %s26_s15), 0  ;;  %p157_p3 = pnand %p4996_p0, %p156_p2 }
   0x7   : > { %160 = sbr.rel (%p157_p3) target bundleno = 581 (0x245), region = 28 }
   0xc   : > { %v5001_v0 = vld [vmem:[%s8977_s1 + $0x2] sm:$0x3]  ;;  %vm753_vm0 = vcmask 1041408   ;;  %p191_p4 = scmp.lt.s32.totalorder %s6161_s12, 1  ;;  %v266_v2 = vld [vmem:[%s8977_s1] sm:$0x3] }
   0xd   : > { %6065 = vmatprep.subr.msk.bf16.mxu1 %vm753_vm0, %v5001_v0  ;;  %6064 = vmatprep.subr.msk.bf16.mxu0 %vm753_vm0, %v5001_v0  ;;  %v755_v1 = vsel %vm753_vm0, %v5001_v0, 0  ;;  %v5082_v3 = vld [vmem:[%s8977_s1 + $0x4] sm:$0x3]  ;;  %vm267_vm1 = vsmask.f32 3328  ;;  %v6232_v4 = vsel %vm753_vm0, %v266_v2, 0 }
   0xe   : > { %6063 = vmatpush3.bf16.msra.mxu1 %v755_v1  ;;  %5757 = vmatpush3.bf16.msra.mxu0 %v755_v1  ;;  %s9430_s12 = smov (!%p191_p4, %s6161_s12), 1  ;;  %vm268_vm2 = vsmask.f32 7440  ;;  %v6235_v5 = vsel %vm753_vm0, %v5082_v3, 0  ;;  %vm704_vm3 = vcmask 31744   ;;  %v9048_v32 = vmov 0 }
   0xf   : > { %6066 = vmatprep.subr.msk.bf16.mxu1 %vm753_vm0, %v266_v2  ;;  %6067 = vmatprep.subr.msk.bf16.mxu0 %vm753_vm0, %v5082_v3  ;;  %s6074_s22 = smul.u32 216, %s9430_s12  ;;  %vm6274_vm4 = vmor %vm267_vm1, %vm268_vm2  ;;  %vm1226_vm5 = vcmask 1042432   ;;  %vm1227_vm6 = vcmask 1046532   ;;  %s5475_s11 = sshll.u32 %s9430_s12, 7  ;;  %vm4697_vm8 = vcmask 1040384  }
  0x10   : > { %v9049_v32 = vsel %vm6274_vm4, 4294967295, %v9048_v32  ;;  %vm6559_vm7 = vmor %vm1226_vm5, %vm1227_vm6  ;;  %s8881_s18 = scalar_lea.vmem %s8978_s2, %s5475_s11  ;;  %s5000_s19 = sshll.u32 %s9430_s12, 1 }
  0x11   : > { %s6229_s25 = scalar_lea.vmem %s8976_s0, %s6074_s22  ;;  %9050 = vst [vmem:[#allocation2_spill] sm:$0xff] %v9049_v32  ;;  %s212_s22 = scalar_lea.vmem %s8979_s3, %s5000_s19 }
  0x12   : > { %v6238_v6 = vld [vmem:[%s6229_s25] sm:$0xf]  ;;  %v6241_v7 = vld [vmem:[%s6229_s25 + $0x4] sm:$0xf]  ;;  %v6244_v8 = vld [vmem:[%s6229_s25 + $0x8] sm:$0x1] }
  0x13   : > { %v271_v9 = vshrl.u32 %v6238_v6, 16  ;;  %v274_v10 = vshll.u32 %v6238_v6, 16  ;;  %v280_v11 = vshll.u32 %v6241_v7, 16  ;;  %v284_v12 = vshrl.u32 %v6241_v7, 16  ;;  %v6251_v13 = vld [vmem:[%s6229_s25 + $0x60] sm:$0xf] }
  0x14   : > { %v290_v14 = vshll.u32 %v6244_v8, 16  ;;  %v6256_v16 = vld [vmem:[%s6229_s25 + $0x64] sm:$0xf]  ;;  %v6259_v17 = vld [vmem:[%s6229_s25 + $0x68] sm:$0x1]  ;;  %v463_v23 = vshrl.u32 %v6251_v13, 16 }
  0x15   : > { %v273_v18 = vrot.slane %v271_v9, 4  ;;  %v276_v19 = vrot.slane %v274_v10, 5  ;;  %v282_v20 = vrot.slane %v280_v11, 5  ;;  %v286_v21 = vrot.slane %v284_v12, 4  ;;  %v6267_v30 = vld [vmem:[%s6229_s25 + $0xc] sm:$0xf] }
  0x16   : > { %v292_v22 = vrot.slane %v290_v14, 5  ;;  %v466_v24 = vshll.u32 %v6251_v13, 16  ;;  %v472_v25 = vshll.u32 %v6256_v16, 16  ;;  %v476_v28 = vshrl.u32 %v6256_v16, 16  ;;  %v6270_v31 = vld [vmem:[%s6229_s25 + $0x10] sm:$0xf] }
  0x17   : > { %v277_v26 = vor.u32 %v276_v19, %v273_v18  ;;  %v287_v27 = vor.u32 %v286_v21, %v282_v20  ;;  %v482_v29 = vshll.u32 %v6259_v17, 16  ;;  %v465_v33 = vrot.slane %v463_v23, 4  ;;  %v6281_v42 = vld [vmem:[%s6229_s25 + $0x14] sm:$0x1]  ;;  %v6292_v54 = vld [vmem:[%s6229_s25 + $0x6c] sm:$0xf] }
  0x18   : > { %v468_v34 = vrot.slane %v466_v24, 5  ;;  %v474_v35 = vrot.slane %v472_v25, 5  ;;  %v478_v39 = vrot.slane %v476_v28, 4  ;;  %v295_v43 = vshrl.u32 %v6267_v30, 16  ;;  %9051 = vst [vmem:[#allocation3_spill] sm:$0xff] %v6292_v54 }
  0x19   : > { %v278_v37 = vrot.slane %v277_v26, 4  ;;  %v288_v38 = vrot.slane %v287_v27, 4  ;;  %v484_v40 = vrot.slane %v482_v29, 5  ;;  %v298_v44 = vshll.u32 %v6267_v30, 16  ;;  %v6296_v59 = vld [vmem:[%s6229_s25 + $0x70] sm:$0xf] }
  0x1a   : > { %v469_v41 = vor.u32 %v468_v34, %v465_v33  ;;  %v304_v45 = vshll.u32 %v6270_v31, 16  ;;  %v479_v48 = vor.u32 %v478_v39, %v474_v35  ;;  %v308_v49 = vshrl.u32 %v6270_v31, 16  ;;  %v6304_v0 = vld [vmem:[%s6229_s25 + $0x74] sm:$0x1]  ;;  %v6310_v10 = vld [vmem:[%s6229_s25 + $0x18] sm:$0xf] }
  0x1b   : > { %v283_v46 = vsel %vm6274_vm4, %v278_v37, %v282_v20  ;;  %v293_v47 = vsel %vm6274_vm4, %v288_v38, %v292_v22  ;;  %v297_v52 = vrot.slane %v295_v43, 4  ;;  %v300_v53 = vrot.slane %v298_v44, 5  ;;  %9052 = vst [vmem:[#allocation4_spill] sm:$0xff] %v6304_v0  ;;  %v6317_v23 = vld [vmem:[%s6229_s25 + $0x1c] sm:$0xf] }
  0x1c   : > { %v5002_v50 = vcombine.low %v283_v46, %v293_v47  ;;  %v470_v51 = vrot.slane %v469_v41, 4  ;;  %v480_v55 = vrot.slane %v479_v48, 4  ;;  %v306_v56 = vrot.slane %v304_v45, 5  ;;  %v6323_v27 = vld [vmem:[%s6229_s25 + $0x20] sm:$0x1] }
  0x1d   : > { %v310_v57 = vrot.slane %v308_v49, 4  ;;  %v314_v58 = vshll.u32 %v6281_v42, 16  ;;  %v301_v61 = vor.u32 %v300_v53, %v297_v52  ;;  %v487_v9 = vshrl.u32 %v6292_v54, 16  ;;  %v6330_v37 = vld [vmem:[%s6229_s25 + $0x78] sm:$0xf] }
  0x1e   : > { %5758 = vmatprep.mubr.msk.bf16.mxu0 %vm704_vm3, %v5002_v50  ;;  %v475_v60 = vsel %vm6274_vm4, %v470_v51, %v474_v35  ;;  %v485_v1 = vsel %vm6274_vm4, %v480_v55, %v484_v40  ;;  %v490_v14 = vshll.u32 %v6292_v54, 16  ;;  %v496_v18 = vshll.u32 %v6296_v59, 16  ;;  %9053 = vst [vmem:[#allocation5_spill] sm:$0xff] %v6330_v37  ;;  %v6336_v43 = vld [vmem:[%s8977_s1 + $0x8] sm:$0x3] }
  0x1f   : > { %v311_v2 = vor.u32 %v310_v57, %v306_v56  ;;  %v316_v3 = vrot.slane %v314_v58, 5  ;;  %v5010_v11 = vcombine.low %v475_v60, %v485_v1  ;;  %v302_v12 = vrot.slane %v301_v61, 4  ;;  %v6341_v48 = vld [vmem:[%s6229_s25 + $0x7c] sm:$0xf]  ;;  %v6348_v58 = vld [vmem:[%s6229_s25 + $0x80] sm:$0x1] }
  0x20   : > { %v489_v20 = vrot.slane %v487_v9, 4  ;;  %v500_v21 = vshrl.u32 %v6296_v59, 16  ;;  %v506_v22 = vshll.u32 %v6304_v0, 16  ;;  %v492_v25 = vrot.slane %v490_v14, 5  ;;  %9054 = vst [vmem:[#allocation6_spill] sm:$0xff] %v6341_v48  ;;  %9055 = vst [vmem:[#allocation7_spill] sm:$0xff] %v6348_v58 }
  0x21   : > { %v312_v19 = vrot.slane %v311_v2, 4  ;;  %5774 = vmatprep.mubr.msk.bf16.mxu1 %vm704_vm3, %v5010_v11  ;;  %v307_v24 = vsel %vm6274_vm4, %v302_v12, %v306_v56  ;;  %v498_v26 = vrot.slane %v496_v18, 5  ;;  %v319_v28 = vshrl.u32 %v6310_v10, 16  ;;  %v6362_v14 = vld [vmem:[%s6229_s25 + $0x28] sm:$0xf] }
  0x22   : > { %v502_v33 = vrot.slane %v500_v21, 4  ;;  %v508_v34 = vrot.slane %v506_v22, 5  ;;  %v322_v35 = vshll.u32 %v6310_v10, 16  ;;  %v493_v39 = vor.u32 %v492_v25, %v489_v20  ;;  %v6368_v22 = vld [vmem:[%s8977_s1 + $0x6] sm:$0x3] }
  0x23   : > { %v317_v29 = vsel %vm6274_vm4, %v312_v19, %v316_v3  ;;  %v321_v40 = vrot.slane %v319_v28, 4  ;;  %v328_v41 = vshll.u32 %v6317_v23, 16  ;;  %v332_v46 = vshrl.u32 %v6317_v23, 16  ;;  %v6354_v3 = vld [vmem:[%s6229_s25 + $0x24] sm:$0xf] }
  0x24   : > { %v5003_v38 = vcombine.low %v307_v24, %v317_v29  ;;  %v503_v44 = vor.u32 %v502_v33, %v498_v26  ;;  %v324_v45 = vrot.slane %v322_v35, 5  ;;  %v338_v47 = vshll.u32 %v6323_v27, 16  ;;  %v6373_v28 = vld [vmem:[%s6229_s25 + $0x2c] sm:$0x1] }
  0x25   : > { %v494_v49 = vrot.slane %v493_v39, 4  ;;  %v330_v50 = vrot.slane %v328_v41, 5  ;;  %v511_v51 = vshrl.u32 %v6330_v37, 16  ;;  %v514_v52 = vshll.u32 %v6330_v37, 16  ;;  %v6380_v39 = vld [vmem:[%s6229_s25 + $0x84] sm:$0xf] }
  0x26   : > { %5759 = vmatmul.mubr.msk.bf16.vlgmr.msra.gmra.mxu0 %vm704_vm3, %v5003_v38  ;;  %v504_v53 = vrot.slane %v503_v44, 4  ;;  %v325_v55 = vor.u32 %v324_v45, %v321_v40  ;;  %v334_v56 = vrot.slane %v332_v46, 4  ;;  %v340_v57 = vrot.slane %v338_v47, 5  ;;  %v6387_v46 = vld [vmem:[%s6229_s25 + $0x88] sm:$0xf] }
  0x27   : > { %5825 = vmatpush3.bf16.msra.mxu0 %v6235_v5  ;;  %v499_v60 = vsel %vm6274_vm4, %v494_v49, %v498_v26  ;;  %v513_v61 = vrot.slane %v511_v51, 4  ;;  %v516_v1 = vrot.slane %v514_v52, 5  ;;  %v520_v2 = vshll.u32 %v6341_v48, 16 }
  0x28   : > { %6069 = vmatprep.subr.msk.bf16.mxu0 %vm753_vm0, %v6336_v43  ;;  %v509_v5 = vsel %vm6274_vm4, %v504_v53, %v508_v34  ;;  %v326_v9 = vrot.slane %v325_v55, 4  ;;  %v335_v11 = vor.u32 %v334_v56, %v330_v50  ;;  %v524_v12 = vshrl.u32 %v6341_v48, 16  ;;  %v6395_v55 = vld [vmem:[%s6229_s25 + $0x8c] sm:$0x1]  ;;  %v6526_v48 = vld [vmem:[%s6229_s25 + $0x5c] sm:$0x1] }
  0x29   : > { %v5011_v18 = vcombine.low %v499_v60, %v509_v5  ;;  %v517_v19 = vor.u32 %v516_v1, %v513_v61  ;;  %v522_v20 = vrot.slane %v520_v2, 5  ;;  %v530_v21 = vshll.u32 %v6348_v58, 16  ;;  %v6403_v2 = vld [vmem:[%s6229_s25 + $0x30] sm:$0xf] }
  0x2a   : > { %v331_v24 = vsel %vm6274_vm4, %v326_v9, %v330_v50  ;;  %v336_v25 = vrot.slane %v335_v11, 4  ;;  %v526_v26 = vrot.slane %v524_v12, 4  ;;  %v343_v29 = vshrl.u32 %v6354_v3, 16 }
  0x2b   : > { %5775 = vmatmul.mubr.msk.bf16.vlgmr.msra.gmra.mxu1 %vm704_vm3, %v5011_v18  ;;  %v518_v33 = vrot.slane %v517_v19, 4  ;;  %v532_v34 = vrot.slane %v530_v21, 5  ;;  %v346_v35 = vshll.u32 %v6354_v3, 16  ;;  %v352_v38 = vshll.u32 %v6362_v14, 16  ;;  %v6408_v18 = vld [vmem:[%s6229_s25 + $0x34] sm:$0xf] }
  0x2c   : > { %5791 = vmatpush3.bf16.msra.mxu1 %v6232_v4  ;;  %v341_v40 = vsel %vm6274_vm4, %v336_v25, %v340_v57  ;;  %v527_v41 = vor.u32 %v526_v26, %v522_v20  ;;  %v345_v44 = vrot.slane %v343_v29, 4  ;;  %v356_v45 = vshrl.u32 %v6362_v14, 16 }
  0x2d   : > { %v5004_v47 = vcombine.low %v331_v24, %v341_v40  ;;  %v523_v49 = vsel %vm6274_vm4, %v518_v33, %v522_v20  ;;  %v348_v50 = vrot.slane %v346_v35, 5  ;;  %v354_v51 = vrot.slane %v352_v38, 5  ;;  %6068 = vmatprep.subr.msk.bf16.mxu1 %vm753_vm0, %v6368_v22  ;;  %v6416_v38 = vld [vmem:[%s6229_s25 + $0x38] sm:$0x1] }
  0x2e   : > { %v528_v4 = vrot.slane %v527_v41, 4  ;;  %v358_v52 = vrot.slane %v356_v45, 4  ;;  %v362_v53 = vshll.u32 %v6373_v28, 16  ;;  %v535_v56 = vshrl.u32 %v6380_v39, 16 }
  0x2f   : > { %5762 = vmatprep.mubr.msk.bf16.mxu0 %vm704_vm3, %v5004_v47  ;;  %v349_v57 = vor.u32 %v348_v50, %v345_v44  ;;  %v538_v60 = vshll.u32 %v6380_v39, 16  ;;  %v544_v61 = vshll.u32 %v6387_v46, 16  ;;  %v548_v1 = vshrl.u32 %v6387_v46, 16  ;;  %v6421_v44 = vld [vmem:[%s6229_s25 + $0x90] sm:$0xf] }
  0x30   : > { %v533_v5 = vsel %vm6274_vm4, %v528_v4, %v532_v34  ;;  %v359_v9 = vor.u32 %v358_v52, %v354_v51  ;;  %v364_v11 = vrot.slane %v362_v53, 5  ;;  %v537_v12 = vrot.slane %v535_v56, 4  ;;  %v6426_v4 = vld [vmem:[%s6229_s25 + $0x94] sm:$0xf] }
  0x31   : > { %v5012_v19 = vcombine.low %v523_v49, %v533_v5  ;;  %v350_v20 = vrot.slane %v349_v57, 4  ;;  %v540_v21 = vrot.slane %v538_v60, 5  ;;  %v546_v24 = vrot.slane %v544_v61, 5 }
  0x32   : > { %v360_v25 = vrot.slane %v359_v9, 4  ;;  %v550_v26 = vrot.slane %v548_v1, 4  ;;  %v554_v29 = vshll.u32 %v6395_v55, 16  ;;  %v367_v33 = vshrl.u32 %v6403_v2, 16 }
  0x33   : > { %5778 = vmatprep.mubr.msk.bf16.mxu1 %vm704_vm3, %v5012_v19  ;;  %v355_v34 = vsel %vm6274_vm4, %v350_v20, %v354_v51  ;;  %v541_v35 = vor.u32 %v540_v21, %v537_v12  ;;  %v370_v40 = vshll.u32 %v6403_v2, 16  ;;  %v376_v41 = vshll.u32 %v6408_v18, 16  ;;  %v6440_v20 = vld [vmem:[%s6229_s25 + $0x3c] sm:$0xf] }
  0x34   : > { %v365_v45 = vsel %vm6274_vm4, %v360_v25, %v364_v11  ;;  %v551_v47 = vor.u32 %v550_v26, %v546_v24  ;;  %v556_v49 = vrot.slane %v554_v29, 5  ;;  %v369_v50 = vrot.slane %v367_v33, 4  ;;  %v6435_v11 = vld [vmem:[%s6229_s25 + $0x98] sm:$0x1]  ;;  %v6445_v33 = vld [vmem:[%s6229_s25 + $0x40] sm:$0xf] }
  0x35   : > { %v5005_v51 = vcombine.low %v355_v34, %v365_v45  ;;  %v542_v52 = vrot.slane %v541_v35, 4  ;;  %v372_v53 = vrot.slane %v370_v40, 5  ;;  %v378_v56 = vrot.slane %v376_v41, 5 }
  0x36   : > { %v552_v57 = vrot.slane %v551_v47, 4  ;;  %v380_v60 = vshrl.u32 %v6408_v18, 16  ;;  %v386_v61 = vshll.u32 %v6416_v38, 16  ;;  %v559_v1 = vshrl.u32 %v6421_v44, 16 }
  0x37   : > { %5763 = vmatmul.mubr.msk.bf16.gmra.mxu0 %vm704_vm3, %v5005_v51  ;;  %v547_v5 = vsel %vm6274_vm4, %v542_v52, %v546_v24  ;;  %v373_v9 = vor.u32 %v372_v53, %v369_v50  ;;  %v562_v12 = vshll.u32 %v6421_v44, 16  ;;  %v568_v19 = vshll.u32 %v6426_v4, 16  ;;  %v6454_v52 = vld [vmem:[%s6229_s25 + $0x44] sm:$0x1] }
  0x38   : > { %v557_v21 = vsel %vm6274_vm4, %v552_v57, %v556_v49  ;;  %v382_v25 = vrot.slane %v380_v60, 4  ;;  %v388_v26 = vrot.slane %v386_v61, 5  ;;  %v561_v29 = vrot.slane %v559_v1, 4  ;;  %v6459_v60 = vld [vmem:[%s6229_s25 + $0x9c] sm:$0xf] }
  0x39   : > { %v5013_v24 = vcombine.low %v547_v5, %v557_v21  ;;  %v374_v34 = vrot.slane %v373_v9, 4  ;;  %v564_v35 = vrot.slane %v562_v12, 5  ;;  %v570_v40 = vrot.slane %v568_v19, 5  ;;  %9056 = vst [vmem:[#allocation8_spill] sm:$0xff] %v6459_v60 }
  0x3a   : > { %v383_v41 = vor.u32 %v382_v25, %v378_v56  ;;  %v572_v45 = vshrl.u32 %v6426_v4, 16  ;;  %v578_v47 = vshll.u32 %v6435_v11, 16  ;;  %v391_v50 = vshrl.u32 %v6440_v20, 16 }
  0x3b   : > { %5779 = vmatmul.mubr.msk.bf16.gmra.mxu1 %vm704_vm3, %v5013_v24  ;;  %v379_v49 = vsel %vm6274_vm4, %v374_v34, %v378_v56  ;;  %v565_v51 = vor.u32 %v564_v35, %v561_v29  ;;  %v394_v53 = vshll.u32 %v6440_v20, 16  ;;  %v400_v57 = vshll.u32 %v6445_v33, 16  ;;  %v6466_v34 = vld [vmem:[%s6229_s25 + $0xa0] sm:$0xf] }
  0x3c   : > { %v384_v61 = vrot.slane %v383_v41, 4  ;;  %v574_v1 = vrot.slane %v572_v45, 4  ;;  %v580_v5 = vrot.slane %v578_v47, 5  ;;  %v393_v9 = vrot.slane %v391_v50, 4 }
  0x3d   : > { %v566_v12 = vrot.slane %v565_v51, 4  ;;  %v396_v19 = vrot.slane %v394_v53, 5  ;;  %v402_v21 = vrot.slane %v400_v57, 5  ;;  %v404_v56 = vshrl.u32 %v6445_v33, 16  ;;  %v6472_v51 = vld [vmem:[%s6229_s25 + $0xa4] sm:$0x1] }
  0x3e   : > { %v389_v25 = vsel %vm6274_vm4, %v384_v61, %v388_v26  ;;  %v575_v29 = vor.u32 %v574_v1, %v570_v40  ;;  %v410_v24 = vshll.u32 %v6454_v52, 16  ;;  %v583_v35 = vshrl.u32 %v6459_v60, 16  ;;  %9057 = vst [vmem:[#allocation9_spill] sm:$0xff] %v6472_v51  ;;  %v6475_v53 = vld [vmem:[%s6229_s25 + $0x48] sm:$0xf] }
  0x3f   : > { %v5006_v41 = vcombine.low %v379_v49, %v389_v25  ;;  %v571_v45 = vsel %vm6274_vm4, %v566_v12, %v570_v40  ;;  %v397_v47 = vor.u32 %v396_v19, %v393_v9  ;;  %v406_v50 = vrot.slane %v404_v56, 4  ;;  %v6485_v56 = vld [vmem:[%s6229_s25 + $0x4c] sm:$0xf] }
  0x40   : > { %v576_v57 = vrot.slane %v575_v29, 4  ;;  %v412_v26 = vrot.slane %v410_v24, 5  ;;  %v585_v61 = vrot.slane %v583_v35, 4  ;;  %v586_v1 = vshll.u32 %v6459_v60, 16 }
  0x41   : > { %5766 = vmatprep.mubr.msk.bf16.mxu0 %vm704_vm3, %v5006_v41  ;;  %v398_v36 = vrot.slane %v397_v47, 4  ;;  %v407_v49 = vor.u32 %v406_v50, %v402_v21  ;;  %v592_v25 = vshll.u32 %v6466_v34, 16  ;;  %v596_v40 = vshrl.u32 %v6466_v34, 16  ;;  %v6491_v50 = vld [vmem:[%s6229_s25 + $0x50] sm:$0x1] }
  0x42   : > { %v581_v9 = vsel %vm6274_vm4, %v576_v57, %v580_v5  ;;  %v588_v12 = vrot.slane %v586_v1, 5  ;;  %v602_v19 = vshll.u32 %v6472_v51, 16  ;;  %v415_v29 = vshrl.u32 %v6475_v53, 16  ;;  %v6494_v57 = vld [vmem:[%s6229_s25 + $0xa8] sm:$0xf] }
  0x43   : > { %v5014_v24 = vcombine.low %v571_v45, %v581_v9  ;;  %v403_v35 = vsel %vm6274_vm4, %v398_v36, %v402_v21  ;;  %v408_v41 = vrot.slane %v407_v49, 4  ;;  %v594_v47 = vrot.slane %v592_v25, 5  ;;  %9058 = vst [vmem:[#allocation10_spill] sm:$0xff] %v6494_v57  ;;  %v6504_v9 = vld [vmem:[%s6229_s25 + $0xac] sm:$0xf] }
  0x44   : > { %v589_v63 = vor.u32 %v588_v12, %v585_v61  ;;  %v598_v15 = vrot.slane %v596_v40, 4  ;;  %v604_v62 = vrot.slane %v602_v19, 5  ;;  %v417_v5 = vrot.slane %v415_v29, 4  ;;  %9059 = vst [vmem:[#allocation11_spill] sm:$0xff] %v6504_v9 }
  0x45   : > { %5782 = vmatprep.mubr.msk.bf16.mxu1 %vm704_vm3, %v5014_v24  ;;  %v413_v45 = vsel %vm6274_vm4, %v408_v41, %v412_v26  ;;  %v418_v1 = vshll.u32 %v6475_v53, 16  ;;  %v424_v36 = vshll.u32 %v6485_v56, 16  ;;  %v428_v21 = vshrl.u32 %v6485_v56, 16  ;;  %v6507_v24 = vld [vmem:[%s6229_s25 + $0xb0] sm:$0x1] }
  0x46   : > { %v5007_v49 = vcombine.low %v403_v35, %v413_v45  ;;  %v590_v25 = vrot.slane %v589_v63, 4  ;;  %v599_v61 = vor.u32 %v598_v15, %v594_v47  ;;  %v434_v40 = vshll.u32 %v6491_v50, 16  ;;  %9060 = vst [vmem:[#allocation12_spill] sm:$0xff] %v6507_v24 }
  0x47   : > { %v420_v12 = vrot.slane %v418_v1, 5  ;;  %v426_v19 = vrot.slane %v424_v36, 5  ;;  %v430_v29 = vrot.slane %v428_v21, 4  ;;  %v607_v26 = vshrl.u32 %v6494_v57, 16  ;;  %v6516_v36 = vld [vmem:[%s6229_s25 + $0x54] sm:$0xf] }
  0x48   : > { %5767 = vmatmul.mubr.msk.bf16.gmra.mxu0 %vm704_vm3, %v5007_v49  ;;  %v595_v35 = vsel %vm6274_vm4, %v590_v25, %v594_v47  ;;  %v600_v63 = vrot.slane %v599_v61, 4  ;;  %v436_v15 = vrot.slane %v434_v40, 5  ;;  %v610_v41 = vshll.u32 %v6494_v57, 16  ;;  %v6523_v61 = vld [vmem:[%s6229_s25 + $0x58] sm:$0xf] }
  0x49   : > { %v421_v45 = vor.u32 %v420_v12, %v417_v5  ;;  %v431_v58 = vor.u32 %v430_v29, %v426_v19  ;;  %v609_v37 = vrot.slane %v607_v26, 4  ;;  %v616_v1 = vshll.u32 %v6504_v9, 16 }
  0x4a   : > { %v605_v21 = vsel %vm6274_vm4, %v600_v63, %v604_v62  ;;  %v612_v49 = vrot.slane %v610_v41, 5  ;;  %v620_v47 = vshrl.u32 %v6504_v9, 16  ;;  %v626_v25 = vshll.u32 %v6507_v24, 16  ;;  %v6550_v24 = vld [vmem:[%s6229_s25 + $0xbc] sm:$0x1] }
  0x4b   : > { %v5015_v5 = vcombine.low %v595_v35, %v605_v21  ;;  %v422_v40 = vrot.slane %v421_v45, 4  ;;  %v432_v12 = vrot.slane %v431_v58, 4  ;;  %v618_v29 = vrot.slane %v616_v1, 5  ;;  %v6537_v45 = vld [vmem:[%s6229_s25 + $0xb4] sm:$0xf] }
  0x4c   : > { %v613_v26 = vor.u32 %v612_v49, %v609_v37  ;;  %v622_v0 = vrot.slane %v620_v47, 4  ;;  %v628_v54 = vrot.slane %v626_v25, 5  ;;  %v439_v62 = vshrl.u32 %v6516_v36, 16  ;;  %9061 = vst [vmem:[#allocation13_spill] sm:$0xff] %v6537_v45  ;;  %v6540_v47 = vld [vmem:[%s6229_s25 + $0xb8] sm:$0xf] }
  0x4d   : > { %5783 = vmatmul.mubr.msk.bf16.gmra.mxu1 %vm704_vm3, %v5015_v5  ;;  %v427_v63 = vsel %vm6274_vm4, %v422_v40, %v426_v19  ;;  %v437_v41 = vsel %vm6274_vm4, %v432_v12, %v436_v15  ;;  %v442_v35 = vshll.u32 %v6516_v36, 16  ;;  %v448_v58 = vshll.u32 %v6523_v61, 16 }
  0x4e   : > { %v5008_v37 = vcombine.low %v427_v63, %v437_v41  ;;  %v614_v1 = vrot.slane %v613_v26, 4  ;;  %v623_v21 = vor.u32 %v622_v0, %v618_v29  ;;  %v441_v49 = vrot.slane %v439_v62, 4 }
  0x4f   : > { %v444_v25 = vrot.slane %v442_v35, 5  ;;  %v450_v5 = vrot.slane %v448_v58, 5  ;;  %v452_v19 = vshrl.u32 %v6523_v61, 16  ;;  %v458_v40 = vshll.u32 %v6526_v48, 16 }
  0x50   : > { %5770 = vmatprep.mubr.msk.bf16.mxu0 %vm704_vm3, %v5008_v37  ;;  %v619_v15 = vsel %vm6274_vm4, %v614_v1, %v618_v29  ;;  %v624_v12 = vrot.slane %v623_v21, 4  ;;  %v631_v63 = vshrl.u32 %v6537_v45, 16  ;;  %v634_v26 = vshll.u32 %v6537_v45, 16 }
  0x51   : > { %v445_v0 = vor.u32 %v444_v25, %v441_v49  ;;  %v454_v62 = vrot.slane %v452_v19, 4  ;;  %v460_v41 = vrot.slane %v458_v40, 5  ;;  %v640_v35 = vshll.u32 %v6540_v47, 16 }
  0x52   : > { %v629_v58 = vsel %vm6274_vm4, %v624_v12, %v628_v54  ;;  %v633_v57 = vrot.slane %v631_v63, 4  ;;  %v636_v37 = vrot.slane %v634_v26, 5  ;;  %v644_v9 = vshrl.u32 %v6540_v47, 16 }
  0x53   : > { %v5016_v29 = vcombine.low %v619_v15, %v629_v58  ;;  %v446_v1 = vrot.slane %v445_v0, 4  ;;  %v455_v21 = vor.u32 %v454_v62, %v450_v5  ;;  %v642_v51 = vrot.slane %v640_v35, 5 }
  0x54   : > { %v637_v60 = vor.u32 %v636_v37, %v633_v57  ;;  %v646_v45 = vrot.slane %v644_v9, 4  ;;  %v650_v49 = vshll.u32 %v6550_v24, 16  ;;  %v9062_v25 = vmov 0 }
  0x55   : > { %v9063_v25 = vsel %vm6559_vm7, 4294967295, %v9062_v25  ;;  %v5066_v54 = vrot.slane %v6238_v6, 9  ;;  %5786 = vmatprep.mubr.msk.bf16.mxu1 %vm704_vm3, %v5016_v29  ;;  %v451_v19 = vsel %vm6274_vm4, %v446_v1, %v450_v5  ;;  %v456_v40 = vrot.slane %v455_v21, 4 }
  0x56   : > { %9064 = vst [vmem:[#allocation14_spill] sm:$0xff] %v9063_v25  ;;  %v1231_v15 = vrot.slane %v6241_v7, 5  ;;  %v5035_v57 = vcombine.low %v6267_v30, %v6270_v31  ;;  %v638_v9 = vrot.slane %v637_v60, 4  ;;  %v647_v12 = vor.u32 %v646_v45, %v642_v51 }
  0x57   : > { %v652_v63 = vrot.slane %v650_v49, 5  ;;  %v5067_v26 = vrot.slane %v6267_v30, 9  ;;  %v461_v0 = vsel %vm6274_vm4, %v456_v40, %v460_v41  ;;  %v9065_v5 = vrot.slane %v6270_v31, 5 }
  0x58   : > { %v1232_v62 = vsel %vm6559_vm7, %v5066_v54, %v1231_v15  ;;  %v1233_v35 = vrot.slane %v1231_v15, 4  ;;  %v5009_v37 = vcombine.low %v451_v19, %v461_v0  ;;  %v643_v29 = vsel %vm6274_vm4, %v638_v9, %v642_v51 }
  0x59   : > { %v1240_v58 = vrot.slane %v9065_v5, 4  ;;  %v648_v1 = vrot.slane %v647_v12, 4  ;;  %v9066_v60 = vmov %v9065_v5  ;;  %v9067_v45 = vrot.slane %v6244_v8, 5 }
  0x5a   : > { %v1239_v30 = vsel %vm6559_vm7, %v5067_v26, %v9066_v60  ;;  %v9068_v21 = vrot.slane %v6281_v42, 5  ;;  %v5036_v54 = vcombine.low %v6310_v10, %v6317_v23  ;;  %v5068_v51 = vrot.slane %v6310_v10, 9  ;;  %5771 = vmatmul.mubr.msk.bf16.gmra.mxu0 %vm704_vm3, %v5009_v37 }
  0x5b   : > { %v1235_v41 = vsel %vm6559_vm7, %v1233_v35, %v9067_v45  ;;  %v653_v31 = vsel %vm6274_vm4, %v648_v1, %v652_v63  ;;  %v1245_v40 = vrot.slane %v6317_v23, 5  ;;  %v1248_v42 = vrot.slane %v6323_v27, 5 }
  0x5c   : > { %v1242_v49 = vsel %vm6559_vm7, %v1240_v58, %v9068_v21  ;;  %v5083_v19 = vcombine.low %v1232_v62, %v1235_v41  ;;  %v5017_v15 = vcombine.low %v643_v29, %v653_v31  ;;  %v1252_v10 = vrot.slane %v6362_v14, 5  ;;  %v6643_v31 = vld [vmem:[%s8977_s1 + $0xa] sm:$0x3] }
  0x5d   : > { %v5084_v8 = vcombine.low %v1239_v30, %v1242_v49  ;;  %v1246_v9 = vsel %vm6559_vm7, %v5068_v51, %v1245_v40  ;;  %v1247_v12 = vrot.slane %v1245_v40, 4  ;;  %v5069_v26 = vrot.slane %v6354_v3, 9 }
  0x5e   : > { %5826 = vmatprep.mubr.msk.bf16.mxu0 %vm704_vm3, %v5083_v19  ;;  %5787 = vmatmul.mubr.msk.bf16.gmra.mxu1 %vm704_vm3, %v5017_v15  ;;  %v5070_v63 = vrot.slane %v6403_v2, 9  ;;  %v1259_v0 = vrot.slane %v6408_v18, 5  ;;  %v9069_v23 = vcombine.low %v6238_v6, %v6241_v7  ;;  %v1254_v62 = vrot.slane %v1252_v10, 4 }
  0x5f   : > { %v1249_v27 = vsel %vm6559_vm7, %v1247_v12, %v1248_v42  ;;  %v1255_v35 = vrot.slane %v6373_v28, 5  ;;  %v1262_v5 = vrot.slane %v6416_v38, 5  ;;  %v2496_v29 = vsel %vm753_vm0, %v6336_v43, 0  ;;  %v6628_v38 = vld [vmem:[%s8977_s1 + $0xc] sm:$0x3] }
  0x60   : > { %5792 = vmatprep.mubr.msk.bf16.mxu1 %vm704_vm3, %v9069_v23  ;;  %v5085_v58 = vcombine.low %v1246_v9, %v1249_v27  ;;  %v1261_v37 = vrot.slane %v1259_v0, 4  ;;  %v1266_v1 = vrot.slane %v6445_v33, 5  ;;  %v1818_v6 = vsel %vm753_vm0, %v6368_v22, 0 }
  0x61   : > { %v1253_v7 = vsel %vm6559_vm7, %v5069_v26, %v1252_v10  ;;  %v1260_v60 = vsel %vm6559_vm7, %v5070_v63, %v1259_v0  ;;  %v1273_v28 = vrot.slane %v6485_v56, 5  ;;  %v1256_v43 = vsel %vm6559_vm7, %v1254_v62, %v1255_v35 }
  0x62   : > { %5827 = vmatmul.mubr.msk.bf16.vlgmr.msra.gmra.mxu0 %vm704_vm3, %v5084_v8  ;;  %v1263_v22 = vsel %vm6559_vm7, %v1261_v37, %v1262_v5  ;;  %v5071_v30 = vrot.slane %v6440_v20, 9  ;;  %v1269_v45 = vrot.slane %v6454_v52, 5  ;;  %v1268_v41 = vrot.slane %v1266_v1, 4 }
  0x63   : > { %5893 = vmatpush3.bf16.msra.mxu0 %v2496_v29  ;;  %5830 = vmatprep.mubr.msk.bf16.mxu0 %vm704_vm3, %v5085_v58  ;;  %v5072_v21 = vrot.slane %v6475_v53, 9  ;;  %v1275_v49 = vrot.slane %v1273_v28, 4  ;;  %v1276_v51 = vrot.slane %v6491_v50, 5  ;;  %v5086_v52 = vcombine.low %v1253_v7, %v1256_v43  ;;  %v9070_v29 = vld [vmem:[#allocation8_spill] sm:$0xff] }
  0x64   : > { %6071 = vmatprep.subr.msk.bf16.mxu0 %vm753_vm0, %v6628_v38  ;;  %v5087_v19 = vcombine.low %v1260_v60, %v1263_v22  ;;  %v1267_v8 = vsel %vm6559_vm7, %v5071_v30, %v1266_v1  ;;  %v1270_v50 = vsel %vm6559_vm7, %v1268_v41, %v1269_v45  ;;  %v1280_v42 = vrot.slane %v6523_v61, 5  ;;  %v9071_v30 = vld [vmem:[#allocation9_spill] sm:$0xff]  ;;  %v9072_v41 = vld [vmem:[#allocation11_spill] sm:$0xff] }
  0x65   : > { %v1274_v40 = vsel %vm6559_vm7, %v5072_v21, %v1273_v28  ;;  %v1277_v15 = vsel %vm6559_vm7, %v1275_v49, %v1276_v51  ;;  %v5074_v9 = vrot.slane %v6251_v13, 9  ;;  %v1287_v12 = vrot.slane %v6256_v16, 5  ;;  %v9073_v21 = vld [vmem:[#allocation10_spill] sm:$0xff]  ;;  %v6856_v49 = vld [vmem:[%s6229_s25 + $0x2c] sm:$0x1] }
  0x66   : > { %5793 = vmatmul.mubr.msk.bf16.vlgmr.msra.gmra.mxu1 %vm704_vm3, %v5035_v57  ;;  %v1290_v57 = vrot.slane %v6259_v17, 5  ;;  %v5037_v10 = vcombine.low %v6354_v3, %v6362_v14  ;;  %v5038_v26 = vcombine.low %v6403_v2, %v6408_v18  ;;  %v5039_v63 = vcombine.low %v6440_v20, %v6445_v33 }
  0x67   : > { %5859 = vmatpush3.bf16.msra.mxu1 %v1818_v6  ;;  %5796 = vmatprep.mubr.msk.bf16.mxu1 %vm704_vm3, %v5036_v54  ;;  %v5073_v54 = vrot.slane %v6516_v36, 9  ;;  %v5040_v0 = vcombine.low %v6475_v53, %v6485_v56  ;;  %v5088_v17 = vcombine.low %v1267_v8, %v1270_v50  ;;  %v5089_v23 = vcombine.low %v1274_v40, %v1277_v15  ;;  %v9074_v8 = vld [vmem:[#allocation12_spill] sm:$0xff] }
  0x68   : > { %6070 = vmatprep.subr.msk.bf16.mxu1 %vm753_vm0, %v6643_v31  ;;  %v1283_v27 = vrot.slane %v6526_v48, 5  ;;  %v1282_v3 = vrot.slane %v1280_v42, 4  ;;  %v5077_v14 = vrot.slane %v6380_v39, 9  ;;  %v1308_v2 = vrot.slane %v6387_v46, 5 }
  0x69   : > { %v1311_v18 = vrot.slane %v6395_v55, 5  ;;  %v1281_v20 = vsel %vm6559_vm7, %v5073_v54, %v1280_v42  ;;  %v1288_v33 = vsel %vm6559_vm7, %v5074_v9, %v1287_v12  ;;  %v1289_v53 = vrot.slane %v1287_v12, 4  ;;  %v9075_v54 = vld [vmem:[#allocation13_spill] sm:$0xff] }
  0x6a   : > { %5831 = vmatmul.mubr.msk.bf16.gmra.mxu0 %vm704_vm3, %v5086_v52  ;;  %v6689_v56 = vsel %vm6559_vm7, %v5077_v14, %v1308_v2  ;;  %v1310_v35 = vrot.slane %v1308_v2, 4  ;;  %v5078_v5 = vrot.slane %v6421_v44, 9  ;;  %v1315_v55 = vrot.slane %v6426_v4, 5 }
  0x6b   : > { %5834 = vmatprep.mubr.msk.bf16.mxu0 %vm704_vm3, %v5087_v19  ;;  %v1294_v58 = vrot.slane %v6296_v59, 5  ;;  %v1318_v37 = vrot.slane %v6435_v11, 5  ;;  %v5079_v6 = vrot.slane %v9070_v29, 9  ;;  %v1284_v7 = vsel %vm6559_vm7, %v1282_v3, %v1283_v27  ;;  %v9076_v3 = vld [vmem:[#allocation6_spill] sm:$0xff] }
  0x6c   : > { %v6703_v60 = vsel %vm6559_vm7, %v1310_v35, %v1311_v18  ;;  %v6707_v28 = vsel %vm6559_vm7, %v5078_v5, %v1315_v55  ;;  %v1317_v43 = vrot.slane %v1315_v55, 4  ;;  %v1322_v22 = vrot.slane %v6466_v34, 5  ;;  %v6862_v11 = vld [vmem:[%s6229_s25 + $0x40] sm:$0xf] }
  0x6d   : > { %v1325_v45 = vrot.slane %v9071_v30, 5  ;;  %v5080_v52 = vrot.slane %v9073_v21, 9  ;;  %v1329_v19 = vrot.slane %v9072_v41, 5  ;;  %v1332_v50 = vrot.slane %v9074_v8, 5  ;;  %v9080_v8 = vld [vmem:[#allocation7_spill] sm:$0xff]  ;;  %9084 = vst [vmem:[#allocation10_spill] sm:$0xff] %v6862_v11 }
  0x6e   : > { %5797 = vmatmul.mubr.msk.bf16.gmra.mxu1 %vm704_vm3, %v5037_v10  ;;  %v6717_v51 = vsel %vm6559_vm7, %v1317_v43, %v1318_v37  ;;  %v6727_v15 = vsel %vm6559_vm7, %v5079_v6, %v1322_v22  ;;  %v1324_v42 = vrot.slane %v1322_v22, 4  ;;  %v1291_v27 = vsel %vm6559_vm7, %v1289_v53, %v1290_v57  ;;  %v9078_v43 = vld [vmem:[#allocation4_spill] sm:$0xff] }
  0x6f   : > { %5800 = vmatprep.mubr.msk.bf16.mxu1 %vm704_vm3, %v5038_v26  ;;  %v6734_v12 = vsel %vm6559_vm7, %v5080_v52, %v1329_v19  ;;  %v1331_v10 = vrot.slane %v1329_v19, 4  ;;  %v5081_v26 = vrot.slane %v9075_v54, 9  ;;  %v1301_v14 = vrot.slane %v9076_v3, 5 }
  0x70   : > { %v6743_v2 = vsel %vm6559_vm7, %v1324_v42, %v1325_v45  ;;  %v5090_v5 = vcombine.low %v1281_v20, %v1284_v7  ;;  %v5091_v37 = vcombine.low %v1288_v33, %v1291_v27  ;;  %v1296_v6 = vrot.slane %v1294_v58, 4  ;;  %v9079_v45 = vld [vmem:[#allocation5_spill] sm:$0xff]  ;;  %v6773_v7 = vld [vmem:[%s6229_s25 + $0xc] sm:$0xf]  ;;  %v6779_v42 = vld [vmem:[%s6229_s25 + $0x10] sm:$0xf] }
  0x71   : > { %v6751_v35 = vsel %vm6559_vm7, %v1331_v10, %v1332_v50  ;;  %v1297_v22 = vrot.slane %v9078_v43, 5  ;;  %v5076_v52 = vrot.slane %v9079_v45, 9  ;;  %v1303_v19 = vrot.slane %v1301_v14, 4  ;;  %v6795_v27 = vld [vmem:[%s6229_s25 + $0x14] sm:$0x1] }
  0x72   : > { %5835 = vmatmul.mubr.msk.bf16.gmra.mxu0 %vm704_vm3, %v5088_v17  ;;  %v1336_v17 = vrot.slane %v6540_v47, 5  ;;  %v5041_v33 = vcombine.low %v6516_v36, %v6523_v61  ;;  %v5042_v50 = vcombine.low %v6251_v13, %v6256_v16  ;;  %v2014_v13 = vshrl.u32 %v6773_v7, 16  ;;  %9081 = vst [vmem:[#allocation8_spill] sm:$0xff] %v6795_v27 }
  0x73   : > { %5838 = vmatprep.mubr.msk.bf16.mxu0 %vm704_vm3, %v5089_v23  ;;  %v1339_v23 = vrot.slane %v6550_v24, 5  ;;  %v9077_v24 = vld [vmem:[#allocation3_spill] sm:$0xff]  ;;  %v1302_v36 = vsel %vm6559_vm7, %v5076_v52, %v1301_v14  ;;  %v2017_v16 = vshll.u32 %v6773_v7, 16  ;;  %v2033_v43 = vshll.u32 %v6795_v27, 16 }
  0x74   : > { %v6755_v57 = vsel %vm6559_vm7, %v5081_v26, %v1336_v17  ;;  %v1338_v53 = vrot.slane %v1336_v17, 4  ;;  %v5075_v55 = vrot.slane %v9077_v24, 9  ;;  %v1298_v26 = vsel %vm6559_vm7, %v1296_v6, %v1297_v22  ;;  %v6811_v52 = vld [vmem:[%s6229_s25 + $0x28] sm:$0xf] }
  0x75   : > { %v2027_v17 = vshrl.u32 %v6779_v42, 16  ;;  %v2019_v6 = vrot.slane %v2017_v16, 5  ;;  %v9087_v27 = vcombine.low %v6707_v28, %v6717_v51  ;;  %v9088_v28 = vcombine.low %v6380_v39, %v6387_v46 }
  0x76   : > { %5801 = vmatmul.mubr.msk.bf16.gmra.mxu1 %vm704_vm3, %v5039_v63  ;;  %v6764_v30 = vsel %vm6559_vm7, %v1338_v53, %v1339_v23  ;;  %v1295_v10 = vsel %vm6559_vm7, %v5075_v55, %v1294_v58  ;;  %v6798_v58 = vld [vmem:[%s6229_s25 + $0x18] sm:$0xf]  ;;  %v2023_v23 = vshll.u32 %v6779_v42, 16  ;;  %v6806_v55 = vld [vmem:[%s6229_s25 + $0x24] sm:$0xf] }
  0x77   : > { %5804 = vmatprep.mubr.msk.bf16.mxu1 %vm704_vm3, %v5040_v0  ;;  %v1304_v0 = vrot.slane %v9080_v8, 5  ;;  %v5092_v14 = vcombine.low %v1295_v10, %v1298_v26  ;;  %v2038_v22 = vshrl.u32 %v6798_v58, 16  ;;  %v5044_v8 = vcombine.low %v9079_v45, %v9076_v3 }
  0x78   : > { %v6823_v10 = vrot.slane %v2023_v23, 5  ;;  %v2041_v26 = vshll.u32 %v6798_v58, 16  ;;  %v2062_v3 = vshrl.u32 %v6806_v55, 16  ;;  %v2065_v45 = vshll.u32 %v6806_v55, 16  ;;  %v6841_v23 = vld [vmem:[%s6229_s25 + $0x20] sm:$0x1] }
  0x79   : > { %v1305_v61 = vsel %vm6559_vm7, %v1303_v19, %v1304_v0  ;;  %v5043_v19 = vcombine.low %v9077_v24, %v6296_v59  ;;  %v6829_v24 = vld [vmem:[%s6229_s25 + $0x34] sm:$0xf]  ;;  %9082 = vst [vmem:[#allocation9_spill] sm:$0xff] %v6841_v23  ;;  %v2040_v0 = vrot.slane %v2038_v22, 4  ;;  %v2057_v40 = vshll.u32 %v6841_v23, 16 }
  0x7a   : > { %5839 = vmatmul.mubr.msk.bf16.gmra.mxu0 %vm704_vm3, %v5090_v5  ;;  %v5093_v53 = vcombine.low %v1302_v36, %v1305_v61  ;;  %v6803_v5 = vld [vmem:[%s6229_s25 + $0x1c] sm:$0xf]  ;;  %v2075_v61 = vshrl.u32 %v6811_v52, 16  ;;  %v2099_v20 = vshrl.u32 %v6829_v24, 16  ;;  %v2064_v1 = vrot.slane %v2062_v3, 4 }
  0x7b   : > { %5842 = vmatprep.mubr.msk.bf16.mxu0 %vm704_vm3, %v5091_v37  ;;  %v2016_v37 = vrot.slane %v2014_v13, 4  ;;  %v2051_v36 = vshrl.u32 %v6803_v5, 16  ;;  %v2047_v59 = vshll.u32 %v6803_v5, 16  ;;  %v2071_v13 = vshll.u32 %v6811_v52, 16 }
  0x7c   : > { %v2067_v63 = vrot.slane %v2065_v45, 5  ;;  %v2077_v48 = vrot.slane %v2075_v61, 4  ;;  %v2101_v3 = vrot.slane %v2099_v20, 4  ;;  %v9086_v45 = vcombine.low %v6689_v56, %v6703_v60 }
  0x7d   : > { %v2020_v16 = vor.u32 %v2019_v6, %v2016_v37  ;;  %v2095_v37 = vshll.u32 %v6829_v24, 16  ;;  %v6849_v6 = vld [vmem:[%s6229_s25 + $0x3c] sm:$0xf]  ;;  %v6853_v22 = vrot.slane %v2047_v59, 5  ;;  %v6858_v18 = vrot.slane %v2071_v13, 5 }
  0x7e   : > { %5805 = vmatmul.mubr.msk.bf16.gmra.mxu1 %vm704_vm3, %v5041_v33  ;;  %v2029_v33 = vrot.slane %v2027_v17, 4  ;;  %v6836_v17 = vrot.slane %v2033_v43, 5  ;;  %9083 = vst [vmem:[#allocation11_spill] sm:$0xff] %v6849_v6  ;;  %v2081_v23 = vshll.u32 %v6856_v49, 16  ;;  %v2119_v56 = vshll.u32 %v6862_v11, 16 }
  0x7f   : > { %5808 = vmatprep.mubr.msk.bf16.mxu1 %vm704_vm3, %v5042_v50  ;;  %v6820_v50 = vld [vmem:[%s6229_s25 + $0x30] sm:$0xf]  ;;  %v2021_v62 = vrot.slane %v2020_v16, 4  ;;  %v6869_v25 = vrot.slane %v2095_v37, 5  ;;  %v2078_v20 = vor.u32 %v2077_v48, %v6858_v18  ;;  %v6886_v60 = vsel %vm753_vm0, %v6643_v31, 0 }
  0x80   : > { %v2089_v9 = vshll.u32 %v6820_v50, 16  ;;  %v2030_v43 = vor.u32 %v2029_v33, %v6823_v10  ;;  %v2113_v33 = vshll.u32 %v6849_v6, 16  ;;  %v6898_v31 = vld [vmem:[%s6229_s25 + $0x48] sm:$0xf] }
  0x81   : > { %v2026_v48 = vsel %vm6274_vm4, %v2021_v62, %v6823_v10  ;;  %9089 = vst [vmem:[#allocation13_spill] sm:$0xff] %v6898_v31  ;;  %v6908_v62 = vld [vmem:[%s6229_s25 + $0x4c] sm:$0xf]  ;;  %v2079_v10 = vrot.slane %v2078_v20, 4  ;;  %v6930_v20 = vsel %vm753_vm0, %v6628_v38, 0 }
  0x82   : > { %5843 = vmatmul.mubr.msk.bf16.gmra.mxu0 %vm704_vm3, %v5092_v14  ;;  %v2043_v14 = vrot.slane %v2041_v26, 5  ;;  %v6867_v26 = vld [vmem:[%s6229_s25 + $0x38] sm:$0x1]  ;;  %v2031_v61 = vrot.slane %v2030_v43, 4  ;;  %v2115_v37 = vrot.slane %v2113_v33, 5  ;;  %9091 = vst [vmem:[#allocation6_spill] sm:$0xff] %v6908_v62 }
  0x83   : > { %5846 = vmatprep.mubr.msk.bf16.mxu0 %vm704_vm3, %v5093_v53  ;;  %v2086_v53 = vshrl.u32 %v6820_v50, 16  ;;  %9085 = vst [vmem:[#allocation12_spill] sm:$0xff] %v6867_v26 }
  0x84   : > { %v2044_v13 = vor.u32 %v2043_v14, %v2040_v0  ;;  %v2105_v0 = vshll.u32 %v6867_v26, 16  ;;  %v2036_v39 = vsel %vm6274_vm4, %v2031_v61, %v6836_v17  ;;  %v2143_v61 = vshll.u32 %v6908_v62, 16  ;;  %v7242_v26 = vld [vmem:[%s6229_s25 + $0xc0] sm:$0xf] }
  0x85   : > { %v2088_v59 = vrot.slane %v2086_v53, 4  ;;  %v2123_v53 = vshrl.u32 %v6862_v11, 16 }
  0x86   : > { %5809 = vmatmul.mubr.msk.bf16.gmra.mxu1 %vm704_vm3, %v5043_v19  ;;  %v2053_v19 = vrot.slane %v2051_v36, 4  ;;  %v2091_v36 = vrot.slane %v2089_v9, 5  ;;  %v2068_v9 = vor.u32 %v2067_v63, %v2064_v1  ;;  %v2059_v1 = vrot.slane %v2057_v40, 5 }
  0x87   : > { %5812 = vmatprep.mubr.msk.bf16.mxu1 %vm704_vm3, %v5044_v8  ;;  %v2110_v8 = vshrl.u32 %v6849_v6, 16  ;;  %v2102_v63 = vor.u32 %v2101_v3, %v6869_v25  ;;  %v2045_v46 = vrot.slane %v2044_v13, 4  ;;  %v2125_v33 = vrot.slane %v2123_v53, 4 }
  0x88   : > { %v2054_v16 = vor.u32 %v2053_v19, %v6853_v22  ;;  %v2092_v51 = vor.u32 %v2091_v36, %v2088_v59  ;;  %v2083_v19 = vrot.slane %v2081_v23, 5  ;;  %v2069_v40 = vrot.slane %v2068_v9, 4  ;;  %v6913_v36 = vld [vmem:[%s6229_s25 + $0x44] sm:$0x1] }
  0x89   : > { %v2112_v14 = vrot.slane %v2110_v8, 4  ;;  %v6910_v8 = vrot.slane %v2119_v56, 5  ;;  %v2107_v59 = vrot.slane %v2105_v0, 5  ;;  %9092 = vst [vmem:[#allocation3_spill] sm:$0xff] %v6913_v36  ;;  %v2137_v3 = vshll.u32 %v6898_v31, 16 }
  0x8a   : > { %5847 = vmatmul.mubr.msk.bf16.gmra.mxu0 %vm704_vm3, %v9086_v45  ;;  %v2055_v43 = vrot.slane %v2054_v16, 4  ;;  %v2093_v45 = vrot.slane %v2092_v51, 4  ;;  %v2103_v17 = vrot.slane %v2102_v63, 4  ;;  %v2147_v23 = vshrl.u32 %v6908_v62, 16  ;;  %v6962_v63 = vld [vmem:[%s6229_s25 + $0x54] sm:$0xf] }
  0x8b   : > { %5850 = vmatprep.mubr.msk.bf16.mxu0 %vm704_vm3, %v9087_v27  ;;  %v9090_v27 = vcombine.low %v6421_v44, %v6426_v4  ;;  %v2116_v44 = vor.u32 %v2115_v37, %v2112_v14  ;;  %v2134_v4 = vshrl.u32 %v6898_v31, 16  ;;  %v9093_v13 = vcombine.low %v6727_v15, %v6743_v2  ;;  %9097 = vst [vmem:[#allocation5_spill] sm:$0xff] %v6962_v63 }
  0x8c   : > { %v2050_v16 = vsel %vm6274_vm4, %v2045_v46, %v6853_v22  ;;  %v2060_v9 = vsel %vm6274_vm4, %v2055_v43, %v2059_v1  ;;  %v5166_v53 = vcombine.low %v6806_v55, %v6811_v52  ;;  %v9094_v56 = vcombine.low %v6734_v12, %v6751_v35  ;;  %v6948_v12 = vld [vmem:[%s6229_s25 + $0x50] sm:$0x1]  ;;  %v6977_v46 = vld [vmem:[%s6229_s25 + $0x58] sm:$0xf]  ;;  %v6980_v43 = vld [vmem:[%s6229_s25 + $0x60] sm:$0xf] }
  0x8d   : > { %v2074_v15 = vsel %vm6274_vm4, %v2069_v40, %v6858_v18  ;;  %v2084_v2 = vsel %vm6274_vm4, %v2079_v10, %v2083_v19  ;;  %v2126_v22 = vor.u32 %v2125_v33, %v6910_v8  ;;  %v2129_v38 = vshll.u32 %v6913_v36, 16  ;;  %9095 = vst [vmem:[#allocation4_spill] sm:$0xff] %v6948_v12  ;;  %9099 = vst [vmem:[#allocation7_spill] sm:$0xff] %v6977_v46  ;;  %v6986_v10 = vld [vmem:[%s6229_s25 + $0x64] sm:$0xf] }
  0x8e   : > { %5813 = vmatmul.mubr.msk.bf16.gmra.mxu1 %vm704_vm3, %v9088_v28  ;;  %v5197_v0 = vcombine.low %v2026_v48, %v2036_v39  ;;  %v6945_v14 = vrot.slane %v2116_v44, 4  ;;  %v2136_v35 = vrot.slane %v2134_v4, 4  ;;  %v2139_v37 = vrot.slane %v2137_v3, 5  ;;  %9100 = vst [vmem:[#allocation15_spill] sm:$0xff] %v6980_v43  ;;  %9101 = vst [vmem:[#allocation16_spill] sm:$0xff] %v6986_v10 }
  0x8f   : > { %5816 = vmatprep.mubr.msk.bf16.mxu1 %vm704_vm3, %v9090_v27  ;;  %v9096_v28 = vcombine.low %v9070_v29, %v6466_v34  ;;  %v2098_v18 = vsel %vm6274_vm4, %v2093_v45, %v6869_v25  ;;  %v2108_v48 = vsel %vm6274_vm4, %v2103_v17, %v2107_v59  ;;  %v6959_v1 = vrot.slane %v2143_v61, 5  ;;  %v6996_v3 = vld [vmem:[%s6229_s25 + $0x6c] sm:$0xf]  ;;  %v7208_v36 = vld [vmem:[%s6229_s25 + $0xb8] sm:$0xf] }
  0x90   : > { %v2149_v51 = vrot.slane %v2147_v23, 4  ;;  %v9098_v27 = vcombine.low %v9073_v21, %v9072_v41  ;;  %v6968_v34 = vcombine.low %v2050_v16, %v2060_v9  ;;  %v6970_v29 = vcombine.low %v2074_v15, %v2084_v2 }
  0x91   : > { %v2127_v19 = vrot.slane %v2126_v22, 4  ;;  %v2131_v41 = vrot.slane %v2129_v38, 5  ;;  %v2153_v40 = vshll.u32 %v6948_v12, 16  ;;  %v6988_v33 = vcombine.low %v2098_v18, %v2108_v48 }
  0x92   : > { %5851 = vmatmul.mubr.msk.bf16.gmra.mxu0 %vm704_vm3, %v9093_v13  ;;  %v2122_v59 = vsel %vm6274_vm4, %v6945_v14, %v6910_v8  ;;  %v2140_v44 = vor.u32 %v2139_v37, %v2136_v35  ;;  %v2158_v4 = vshrl.u32 %v6962_v63, 16  ;;  %v2150_v45 = vor.u32 %v2149_v51, %v6959_v1  ;;  %v7003_v13 = vld [vmem:[%s6229_s25 + $0x70] sm:$0xf]  ;;  %v7023_v14 = vld [vmem:[%s6229_s25 + $0x5c] sm:$0x1] }
  0x93   : > { %5854 = vmatprep.mubr.msk.bf16.mxu0 %vm704_vm3, %v9094_v56  ;;  %v2161_v17 = vshll.u32 %v6962_v63, 16  ;;  %v2171_v23 = vshrl.u32 %v6977_v46, 16  ;;  %v2167_v61 = vshll.u32 %v6977_v46, 16  ;;  %v9102_v16 = vcombine.low %v6755_v57, %v6764_v30  ;;  %9103 = vst [vmem:[#allocation17_spill] sm:$0xff] %v7023_v14 }
  0x94   : > { %v2182_v8 = vshrl.u32 %v6980_v43, 16  ;;  %v2185_v9 = vshll.u32 %v6980_v43, 16  ;;  %v2195_v56 = vshrl.u32 %v6986_v10, 16  ;;  %v2191_v15 = vshll.u32 %v6986_v10, 16 }
  0x95   : > { %v2132_v2 = vsel %vm6274_vm4, %v2127_v19, %v2131_v41  ;;  %v7016_v22 = vrot.slane %v2153_v40, 5  ;;  %v2206_v57 = vshrl.u32 %v6996_v3, 16  ;;  %v2209_v30 = vshll.u32 %v6996_v3, 16  ;;  %v7039_v41 = vld [vmem:[%s6229_s25 + $0x7c] sm:$0xf] }
  0x96   : > { %5817 = vmatmul.mubr.msk.bf16.gmra.mxu1 %vm704_vm3, %v9096_v28  ;;  %v7020_v38 = vrot.slane %v2140_v44, 4  ;;  %v2160_v35 = vrot.slane %v2158_v4, 4  ;;  %v2219_v37 = vshrl.u32 %v7003_v13, 16  ;;  %v7028_v28 = vld [vmem:[%s6229_s25 + $0x78] sm:$0xf]  ;;  %v9104_v18 = vcombine.low %v9075_v54, %v6540_v47 }
  0x97   : > { %5820 = vmatprep.mubr.msk.bf16.mxu1 %vm704_vm3, %v9098_v27  ;;  %v7034_v48 = vrot.slane %v2150_v45, 4  ;;  %v2163_v51 = vrot.slane %v2161_v17, 5  ;;  %v7036_v27 = vrot.slane %v2167_v61, 5  ;;  %v2173_v19 = vrot.slane %v2171_v23, 4  ;;  %v7046_v44 = vld [vmem:[%s6229_s25 + $0x68] sm:$0x1] }
  0x98   : > { %v9105_v40 = vcombine.low %v6773_v7, %v6779_v42  ;;  %9106 = vst [vmem:[#allocation18_spill] sm:$0xff] %v7046_v44  ;;  %v2184_v4 = vrot.slane %v2182_v8, 4  ;;  %v2187_v47 = vrot.slane %v2185_v9, 5  ;;  %v7048_v54 = vrot.slane %v2191_v15, 5  ;;  %v7053_v61 = vld [vmem:[%s6229_s25 + $0x74] sm:$0x1] }
  0x99   : > { %v2208_v45 = vrot.slane %v2206_v57, 4  ;;  %v2230_v17 = vshrl.u32 %v7028_v28, 16  ;;  %v2233_v23 = vshll.u32 %v7028_v28, 16  ;;  %9107 = vst [vmem:[#allocation19_spill] sm:$0xff] %v7053_v61  ;;  %v2221_v39 = vrot.slane %v2219_v37, 4 }
  0x9a   : > { %5855 = vmatmul.mubr.msk.bf16.gmra.mxu0 %vm704_vm3, %v9102_v16  ;;  %v2197_v16 = vrot.slane %v2195_v56, 4  ;;  %v2239_v25 = vshll.u32 %v7039_v41, 16  ;;  %v2164_v8 = vor.u32 %v2163_v51, %v2160_v35  ;;  %v2174_v9 = vor.u32 %v2173_v19, %v7036_v27  ;;  %v7065_v57 = vld [vmem:[%s8977_s1 + $0x10] sm:$0x3]  ;;  %v7083_v19 = vld [vmem:[%s6229_s25 + $0x84] sm:$0xf] }
  0x9b   : > { %5894 = vmatprep.mubr.msk.bf16.mxu0 %vm704_vm3, %v5197_v0  ;;  %v2215_v0 = vshll.u32 %v7003_v13, 16  ;;  %v2177_v56 = vshll.u32 %v7023_v14, 16  ;;  %v2201_v15 = vshll.u32 %v7046_v44, 16  ;;  %v2146_v35 = vsel %vm6274_vm4, %v7020_v38, %v6959_v1 }
  0x9c   : > { %v2188_v37 = vor.u32 %v2187_v47, %v2184_v4  ;;  %v2235_v51 = vrot.slane %v2233_v23, 5  ;;  %v7086_v4 = vrot.slane %v2239_v25, 5  ;;  %v7089_v47 = vld [vmem:[%s6229_s25 + $0x88] sm:$0xf]  ;;  %v2254_v23 = vshrl.u32 %v7083_v19, 16 }
  0x9d   : > { %v7055_v21 = vrot.slane %v2215_v0, 5  ;;  %v2198_v0 = vor.u32 %v2197_v16, %v7048_v54  ;;  %v2179_v25 = vrot.slane %v2177_v56, 5  ;;  %v2203_v16 = vrot.slane %v2201_v15, 5 }
  0x9e   : > { %5821 = vmatmul.mubr.msk.bf16.gmra.mxu1 %vm704_vm3, %v9104_v18  ;;  %v2211_v18 = vrot.slane %v2209_v30, 5  ;;  %v5201_v30 = vcombine.low %v2122_v59, %v2132_v2  ;;  %v2225_v59 = vshll.u32 %v7053_v61, 16  ;;  %v2232_v2 = vrot.slane %v2230_v17, 4 }
  0x9f   : > { %5860 = vmatprep.mubr.msk.bf16.mxu1 %vm704_vm3, %v9105_v40  ;;  %v2243_v40 = vshrl.u32 %v7039_v41, 16  ;;  %v2222_v38 = vor.u32 %v2221_v39, %v7055_v21  ;;  %v2175_v39 = vrot.slane %v2174_v9, 4  ;;  %v2199_v17 = vrot.slane %v2198_v0, 4  ;;  %v7143_v0 = vld [vmem:[%s6229_s25 + $0x90] sm:$0xf] }
  0xa0   : > { %v2212_v1 = vor.u32 %v2211_v18, %v2208_v45  ;;  %v7103_v45 = vld [vmem:[%s6229_s25 + $0x80] sm:$0x1]  ;;  %v2189_v18 = vrot.slane %v2188_v37, 4  ;;  %v2267_v9 = vshrl.u32 %v7089_v47, 16  ;;  %v2263_v56 = vshll.u32 %v7089_v47, 16 }
  0xa1   : > { %9109 = vst [vmem:[#allocation20_spill] sm:$0xff] %v7103_v45  ;;  %v2223_v15 = vrot.slane %v2222_v38, 4  ;;  %v2249_v37 = vshll.u32 %v7103_v45, 16  ;;  %v2204_v38 = vsel %vm6274_vm4, %v2199_v17, %v2203_v16  ;;  %v7151_v17 = vld [vmem:[%s6229_s25 + $0x94] sm:$0xf] }
  0xa2   : > { %5895 = vmatmul.mubr.msk.bf16.vlgmr.msra.gmra.mxu0 %vm704_vm3, %v6968_v34  ;;  %v2156_v34 = vsel %vm6274_vm4, %v7034_v48, %v7016_v22  ;;  %v9108_v22 = vcombine.low %v6798_v58, %v6803_v5  ;;  %v2165_v48 = vrot.slane %v2164_v8, 4  ;;  %v2236_v8 = vor.u32 %v2235_v51, %v2232_v2  ;;  %v7202_v45 = vld [vmem:[%s6229_s25 + $0xb4] sm:$0xf] }
  0xa3   : > { %5961 = vmatpush3.bf16.msra.mxu0 %v6930_v20  ;;  %5898 = vmatprep.mubr.msk.bf16.mxu0 %vm704_vm3, %v6970_v29  ;;  %v2245_v20 = vrot.slane %v2243_v40, 4  ;;  %v7094_v29 = vld [vmem:[%s8977_s1 + $0xe] sm:$0x3]  ;;  %v2257_v40 = vshll.u32 %v7083_v19, 16  ;;  %v2180_v2 = vsel %vm6274_vm4, %v2175_v39, %v2179_v25  ;;  %v5202_v39 = vcombine.low %v2146_v35, %v2156_v34 }
  0xa4   : > { %6073 = vmatprep.subr.msk.bf16.mxu0 %vm753_vm0, %v7065_v57  ;;  %v7138_v25 = vrot.slane %v2236_v8, 4  ;;  %v2269_v51 = vrot.slane %v2267_v9, 4  ;;  %v9111_v35 = vcombine.low %v6820_v50, %v6829_v24  ;;  %v7167_v8 = vld [vmem:[%s6229_s25 + $0xa0] sm:$0xf]  ;;  %v9112_v9 = vcombine.low %v6849_v6, %v6862_v11 }
  0xa5   : > { %v9115_v11 = vcombine.low %v6962_v63, %v6977_v46 }
  0xa6   : > { %5861 = vmatmul.mubr.msk.bf16.vlgmr.msra.gmra.mxu1 %vm704_vm3, %v9108_v22  ;;  %v2227_v22 = vrot.slane %v2225_v59, 5  ;;  %v2170_v59 = vsel %vm6274_vm4, %v2165_v48, %v7036_v27  ;;  %v2256_v27 = vrot.slane %v2254_v23, 4  ;;  %v2259_v48 = vrot.slane %v2257_v40, 5 }
  0xa7   : > { %5927 = vmatpush3.bf16.msra.mxu1 %v6886_v60  ;;  %5864 = vmatprep.mubr.msk.bf16.mxu1 %vm704_vm3, %v5166_v53  ;;  %v2213_v60 = vrot.slane %v2212_v1, 4  ;;  %v2246_v53 = vor.u32 %v2245_v20, %v7086_v4  ;;  %v2194_v1 = vsel %vm6274_vm4, %v2189_v18, %v7048_v54  ;;  %v7135_v20 = vld [vmem:[%s6229_s25 + $0x8c] sm:$0x1]  ;;  %v5203_v34 = vcombine.low %v2170_v59, %v2180_v2 }
  0xa8   : > { %6072 = vmatprep.subr.msk.bf16.mxu1 %vm753_vm0, %v7094_v29  ;;  %9110 = vst [vmem:[#allocation21_spill] sm:$0xff] %v7135_v20  ;;  %v2228_v16 = vsel %vm6274_vm4, %v2223_v15, %v2227_v22  ;;  %v7157_v23 = vcombine.low %v2194_v1, %v2204_v38  ;;  %v7164_v22 = vld [vmem:[%s6229_s25 + $0x9c] sm:$0xf]  ;;  %v2278_v15 = vshrl.u32 %v7143_v0, 16  ;;  %v2242_v2 = vsel %vm6274_vm4, %v7138_v25, %v7086_v4 }
  0xa9   : > { %v2218_v54 = vsel %vm6274_vm4, %v2213_v60, %v7055_v21  ;;  %v2247_v18 = vrot.slane %v2246_v53, 4  ;;  %v2273_v60 = vshll.u32 %v7135_v20, 16  ;;  %v2281_v53 = vshll.u32 %v7143_v0, 16 }
  0xaa   : > { %5899 = vmatmul.mubr.msk.bf16.gmra.mxu0 %vm704_vm3, %v6988_v33  ;;  %v7140_v33 = vrot.slane %v2263_v56, 5  ;;  %v2260_v56 = vor.u32 %v2259_v48, %v2256_v27  ;;  %v5205_v59 = vcombine.low %v2218_v54, %v2228_v16  ;;  %v2291_v38 = vshrl.u32 %v7151_v17, 16  ;;  %v7191_v54 = vld [vmem:[%s6229_s25 + $0xac] sm:$0xf]  ;;  %v7194_v16 = vld [vmem:[%s6229_s25 + $0x98] sm:$0x1] }
  0xab   : > { %5902 = vmatprep.mubr.msk.bf16.mxu0 %vm704_vm3, %v5201_v30  ;;  %v2251_v30 = vrot.slane %v2249_v37, 5  ;;  %v7177_v37 = vld [vmem:[%s6229_s25 + $0xa8] sm:$0xf]  ;;  %v2287_v48 = vshll.u32 %v7151_v17, 16  ;;  %9113 = vst [vmem:[#allocation22_spill] sm:$0xff] %v7194_v16  ;;  %v2315_v4 = vshrl.u32 %v7167_v8, 16 }
  0xac   : > { %v2270_v1 = vor.u32 %v2269_v51, %v7140_v33  ;;  %v2311_v51 = vshll.u32 %v7167_v8, 16  ;;  %v2326_v25 = vshrl.u32 %v7177_v37, 16  ;;  %v2329_v21 = vshll.u32 %v7177_v37, 16 }
  0xad   : > { %v2252_v27 = vsel %vm6274_vm4, %v2247_v18, %v2251_v30  ;;  %v2261_v18 = vrot.slane %v2260_v56, 4  ;;  %v2275_v30 = vrot.slane %v2273_v60, 5  ;;  %v2280_v40 = vrot.slane %v2278_v15, 4 }
  0xae   : > { %5865 = vmatmul.mubr.msk.bf16.gmra.mxu1 %vm704_vm3, %v9111_v35  ;;  %v2302_v35 = vshrl.u32 %v7164_v22, 16  ;;  %v2283_v20 = vrot.slane %v2281_v53, 5  ;;  %v2271_v61 = vrot.slane %v2270_v1, 4  ;;  %v2293_v44 = vrot.slane %v2291_v38, 4 }
  0xaf   : > { %5868 = vmatprep.mubr.msk.bf16.mxu1 %vm704_vm3, %v9112_v9  ;;  %v2305_v9 = vshll.u32 %v7164_v22, 16  ;;  %v2339_v14 = vshrl.u32 %v7191_v54, 16  ;;  %v2335_v12 = vshll.u32 %v7191_v54, 16  ;;  %v7210_v6 = vrot.slane %v2287_v48, 5  ;;  %v7224_v48 = vld [vmem:[%s6229_s25 + $0xa4] sm:$0x1] }
  0xb0   : > { %v2304_v56 = vrot.slane %v2302_v35, 4  ;;  %v9114_v15 = vcombine.low %v6898_v31, %v6908_v62  ;;  %v2317_v53 = vrot.slane %v2315_v4, 4  ;;  %v2328_v1 = vrot.slane %v2326_v25, 4  ;;  %9116 = vst [vmem:[#allocation23_spill] sm:$0xff] %v7224_v48  ;;  %v7239_v62 = vld [vmem:[%s6229_s25 + $0xb0] sm:$0x1] }
  0xb1   : > { %v2307_v60 = vrot.slane %v2305_v9, 5  ;;  %v2331_v38 = vrot.slane %v2329_v21, 5  ;;  %v2350_v35 = vshrl.u32 %v7202_v45, 16  ;;  %v2353_v9 = vshll.u32 %v7202_v45, 16  ;;  %9117 = vst [vmem:[#allocation24_spill] sm:$0xff] %v7239_v62 }
  0xb2   : > { %5903 = vmatmul.mubr.msk.bf16.gmra.mxu0 %vm704_vm3, %v5202_v39  ;;  %v2297_v39 = vshll.u32 %v7194_v16, 16  ;;  %v2359_v4 = vshll.u32 %v7208_v36, 16  ;;  %v2266_v21 = vsel %vm6274_vm4, %v2261_v18, %v7140_v33  ;;  %v7233_v25 = vrot.slane %v2335_v12, 5  ;;  %v7247_v18 = vld [vmem:[%s6229_s25 + $0xc4] sm:$0xf] }
  0xb3   : > { %5906 = vmatprep.mubr.msk.bf16.mxu0 %vm704_vm3, %v5203_v34  ;;  %v7217_v34 = vrot.slane %v2311_v51, 5  ;;  %v5206_v51 = vcombine.low %v2242_v2, %v2252_v27  ;;  %v2341_v16 = vrot.slane %v2339_v14, 4  ;;  %v2284_v63 = vor.u32 %v2283_v20, %v2280_v40 }
  0xb4   : > { %v2294_v46 = vor.u32 %v2293_v44, %v7210_v6  ;;  %v2299_v31 = vrot.slane %v2297_v39, 5  ;;  %v2308_v2 = vor.u32 %v2307_v60, %v2304_v56  ;;  %v2321_v33 = vshll.u32 %v7224_v48, 16  ;;  %v7257_v39 = vld [vmem:[%s6229_s25 + $0xbc] sm:$0x1] }
  0xb5   : > { %v2318_v27 = vor.u32 %v2317_v53, %v7217_v34  ;;  %v2332_v12 = vor.u32 %v2331_v38, %v2328_v1  ;;  %v2352_v14 = vrot.slane %v2350_v35, 4  ;;  %v7251_v44 = vrot.slane %v2359_v4, 5 }
  0xb6   : > { %5869 = vmatmul.mubr.msk.bf16.gmra.mxu1 %vm704_vm3, %v9114_v15  ;;  %v2363_v15 = vshrl.u32 %v7208_v36, 16  ;;  %v2342_v40 = vor.u32 %v2341_v16, %v7233_v25  ;;  %v2374_v56 = vshrl.u32 %v7242_v26, 16  ;;  %v2377_v60 = vshll.u32 %v7242_v26, 16 }
  0xb7   : > { %5872 = vmatprep.mubr.msk.bf16.mxu1 %vm704_vm3, %v9115_v11  ;;  %v2276_v11 = vsel %vm6274_vm4, %v2271_v61, %v2275_v30  ;;  %v2355_v61 = vrot.slane %v2353_v9, 5  ;;  %v2345_v30 = vshll.u32 %v7239_v62, 16  ;;  %v2285_v1 = vrot.slane %v2284_v63, 4 }
  0xb8   : > { %v2365_v20 = vrot.slane %v2363_v15, 4  ;;  %v5207_v53 = vcombine.low %v2266_v21, %v2276_v11  ;;  %v2383_v38 = vshll.u32 %v7247_v18, 16  ;;  %v9118_v35 = vcombine.low %v6980_v43, %v6986_v10 }
  0xb9   : > { %v2309_v16 = vrot.slane %v2308_v2, 4  ;;  %v2319_v9 = vrot.slane %v2318_v27, 4  ;;  %v2323_v15 = vrot.slane %v2321_v33, 5  ;;  %v9119_v4 = vcombine.low %v6996_v3, %v7003_v13  ;;  %v7278_v27 = vld [vmem:[%s6229_s25 + $0xc8] sm:$0x1] }
  0xba   : > { %5907 = vmatmul.mubr.msk.bf16.gmra.mxu0 %vm704_vm3, %v7157_v23  ;;  %v2387_v23 = vshrl.u32 %v7247_v18, 16  ;;  %v2333_v63 = vrot.slane %v2332_v12, 4  ;;  %v2356_v21 = vor.u32 %v2355_v61, %v2352_v14  ;;  %v2366_v11 = vor.u32 %v2365_v20, %v7251_v44 }
  0xbb   : > { %5910 = vmatprep.mubr.msk.bf16.mxu0 %vm704_vm3, %v5205_v59  ;;  %v2295_v59 = vrot.slane %v2294_v46, 4  ;;  %v2369_v48 = vshll.u32 %v7257_v39, 16  ;;  %v2343_v62 = vrot.slane %v2342_v40, 4  ;;  %v2347_v43 = vrot.slane %v2345_v30, 5 }
  0xbc   : > { %v2376_v10 = vrot.slane %v2374_v56, 4  ;;  %v5174_v46 = vcombine.low %v7083_v19, %v7089_v47  ;;  %v5175_v2 = vcombine.low %v7143_v0, %v7151_v17  ;;  %v7280_v33 = vrot.slane %v2383_v38, 5 }
  0xbd   : > { %v2389_v12 = vrot.slane %v2387_v23, 4  ;;  %v2290_v14 = vsel %vm6274_vm4, %v2285_v1, %v7210_v6  ;;  %v2300_v61 = vsel %vm6274_vm4, %v2295_v59, %v2299_v31  ;;  %v2314_v20 = vsel %vm6274_vm4, %v2309_v16, %v7217_v34 }
  0xbe   : > { %5873 = vmatmul.mubr.msk.bf16.gmra.mxu1 %vm704_vm3, %v9118_v35  ;;  %v2379_v35 = vrot.slane %v2377_v60, 5  ;;  %v2324_v40 = vsel %vm6274_vm4, %v2319_v9, %v2323_v15  ;;  %v2338_v30 = vsel %vm6274_vm4, %v2333_v63, %v7233_v25  ;;  %v2357_v56 = vrot.slane %v2356_v21, 4  ;;  %v7326_v63 = vld [vmem:[%s6229_s25 + $0x1c] sm:$0xf] }
  0xbf   : > { %5876 = vmatprep.mubr.msk.bf16.mxu1 %vm704_vm3, %v9119_v4  ;;  %v2367_v60 = vrot.slane %v2366_v11, 4  ;;  %v2371_v23 = vrot.slane %v2369_v48, 5  ;;  %v2348_v6 = vsel %vm6274_vm4, %v2343_v62, %v2347_v43  ;;  %v2393_v34 = vshll.u32 %v7278_v27, 16  ;;  %v7323_v4 = vld [vmem:[%s6229_s25 + $0x18] sm:$0xf] }
  0xc0   : > { %v2380_v31 = vor.u32 %v2379_v35, %v2376_v10  ;;  %v2709_v1 = vrot.slane %v6779_v42, 5  ;;  %v5176_v38 = vcombine.low %v7164_v22, %v7167_v8  ;;  %v5177_v25 = vcombine.low %v7177_v37, %v7191_v54  ;;  %v9121_v35 = vld [vmem:[#allocation8_spill] sm:$0xff] }
  0xc1   : > { %v2390_v48 = vor.u32 %v2389_v12, %v7280_v33  ;;  %v5209_v62 = vcombine.low %v2314_v20, %v2324_v40  ;;  %v5178_v42 = vcombine.low %v7202_v45, %v7208_v36  ;;  %v2716_v10 = vrot.slane %v6803_v5, 5  ;;  %v7335_v40 = vld [vmem:[%s6229_s25 + $0x28] sm:$0xf] }
  0xc2   : > { %5911 = vmatmul.mubr.msk.bf16.gmra.mxu0 %vm704_vm3, %v5206_v51  ;;  %v5208_v51 = vcombine.low %v2290_v14, %v2300_v61  ;;  %v5210_v59 = vcombine.low %v2338_v30, %v2348_v6  ;;  %v2362_v16 = vsel %vm6274_vm4, %v2357_v56, %v7251_v44  ;;  %v2372_v9 = vsel %vm6274_vm4, %v2367_v60, %v2371_v23  ;;  %v9123_v44 = vld [vmem:[#allocation9_spill] sm:$0xff] }
  0xc3   : > { %5914 = vmatprep.mubr.msk.bf16.mxu0 %vm704_vm3, %v5207_v53  ;;  %v9120_v53 = vcombine.low %v7028_v28, %v7039_v41  ;;  %v5229_v15 = vrot.slane %v6773_v7, 9  ;;  %v2381_v21 = vrot.slane %v2380_v31, 4  ;;  %v2395_v11 = vrot.slane %v2393_v34, 5 }
  0xc4   : > { %v2711_v5 = vrot.slane %v2709_v1, 4  ;;  %v2712_v12 = vrot.slane %v9121_v35, 5  ;;  %v2391_v14 = vrot.slane %v2390_v48, 4  ;;  %v5230_v61 = vrot.slane %v6798_v58, 9  ;;  %v9139_v58 = vld [vmem:[#allocation4_spill] sm:$0xff] }
  0xc5   : > { %v2719_v20 = vrot.slane %v9123_v44, 5  ;;  %v2718_v30 = vrot.slane %v2716_v10, 4  ;;  %v3525_v60 = vshll.u32 %v7335_v40, 16  ;;  %v3529_v23 = vshrl.u32 %v7335_v40, 16 }
  0xc6   : > { %5877 = vmatmul.mubr.msk.bf16.gmra.mxu1 %vm704_vm3, %v9120_v53  ;;  %v5211_v6 = vcombine.low %v2362_v16, %v2372_v9  ;;  %v7344_v34 = vsel %vm6559_vm7, %v5229_v15, %v2709_v1  ;;  %v2386_v53 = vsel %vm6274_vm4, %v2381_v21, %v7280_v33  ;;  %v7355_v35 = vsel %vm6559_vm7, %v2711_v5, %v2712_v12  ;;  %v7462_v12 = vld [vmem:[%s6229_s25 + $0x48] sm:$0xf] }
  0xc7   : > { %5880 = vmatprep.mubr.msk.bf16.mxu1 %vm704_vm3, %v5174_v46  ;;  %v7330_v46 = vld [vmem:[%s6229_s25 + $0x24] sm:$0xf]  ;;  %v2723_v1 = vrot.slane %v6811_v52, 5  ;;  %v2396_v16 = vsel %vm6274_vm4, %v2391_v14, %v2395_v11  ;;  %v9021_v33 = vrot.slane %v7335_v40, 5  ;;  %v7369_v15 = vsel %vm6559_vm7, %v2718_v30, %v2719_v20  ;;  %v7381_v14 = vld [vmem:[%s6229_s25 + $0x30] sm:$0xf] }
  0xc8   : > { %9122 = vst [vmem:[#allocation8_spill] sm:$0xff] %v7330_v46  ;;  %v3516_v7 = vshrl.u32 %v7330_v46, 16  ;;  %v3519_v56 = vshll.u32 %v7330_v46, 16  ;;  %v7371_v5 = vrot.slane %v3525_v60, 5  ;;  %v3531_v52 = vrot.slane %v3529_v23, 4 }
  0xc9   : > { %v5212_v44 = vcombine.low %v2386_v53, %v2396_v16  ;;  %v2725_v20 = vrot.slane %v2723_v1, 4  ;;  %v7397_v60 = vsel %vm753_vm0, %v7094_v29, 0  ;;  %v5232_v29 = vrot.slane %v6820_v50, 9  ;;  %v7472_v11 = vld [vmem:[%s6229_s25 + $0x4c] sm:$0xf] }
  0xca   : > { %5915 = vmatmul.mubr.msk.bf16.gmra.mxu0 %vm704_vm3, %v5208_v51  ;;  %v3518_v9 = vrot.slane %v3516_v7, 4  ;;  %v3521_v21 = vrot.slane %v3519_v56, 5  ;;  %9125 = vst [vmem:[#allocation9_spill] sm:$0xff] %v7371_v5  ;;  %v2726_v7 = vrot.slane %v6856_v49, 5  ;;  %v3532_v53 = vor.u32 %v3531_v52, %v7371_v5  ;;  %v7415_v52 = vld [vmem:[%s6229_s25 + $0x3c] sm:$0xf] }
  0xcb   : > { %5918 = vmatprep.mubr.msk.bf16.mxu0 %vm704_vm3, %v5209_v62  ;;  %v7363_v62 = vsel %vm6559_vm7, %v5230_v61, %v2716_v10  ;;  %v7384_v61 = vld [vmem:[%s6229_s25 + $0x34] sm:$0xf]  ;;  %v7402_v49 = vsel %vm753_vm0, %v7065_v57, 0  ;;  %v3567_v50 = vshll.u32 %v7415_v52, 16  ;;  %v9131_v51 = vld [vmem:[#allocation6_spill] sm:$0xff]  ;;  %v9143_v5 = vld [vmem:[#allocation5_spill] sm:$0xff] }
  0xcc   : > { %v3522_v23 = vor.u32 %v3521_v21, %v3518_v9  ;;  %v9127_v9 = vld [vmem:[#allocation12_spill] sm:$0xff]  ;;  %v7420_v57 = vsel %vm6559_vm7, %v2725_v20, %v2726_v7  ;;  %v7437_v7 = vrot.slane %v3532_v53, 4  ;;  %v2744_v56 = vrot.slane %v9131_v51, 5  ;;  %v9132_v53 = vld [vmem:[#allocation11_spill] sm:$0xff] }
  0xcd   : > { %v2733_v21 = vrot.slane %v9127_v9, 5 }
  0xce   : > { %5881 = vmatmul.mubr.msk.bf16.gmra.mxu1 %vm704_vm3, %v5175_v2  ;;  %v5231_v2 = vrot.slane %v6806_v55, 9  ;;  %v7393_v55 = vrot.slane %v9021_v33, 4  ;;  %v7435_v20 = vrot.slane %v3522_v23, 4  ;;  %v2746_v43 = vrot.slane %v2744_v56, 4 }
  0xcf   : > { %5884 = vmatprep.mubr.msk.bf16.mxu1 %vm704_vm3, %v5176_v38  ;;  %v2730_v38 = vrot.slane %v6829_v24, 5  ;;  %v9134_v24 = vld [vmem:[#allocation3_spill] sm:$0xff] }
  0xd0   : > { %9126 = vst [vmem:[#allocation14_spill] sm:$0xff] %v7393_v55  ;;  %v7409_v16 = vsel %vm6559_vm7, %v5231_v2, %v2723_v1  ;;  %v3564_v1 = vshrl.u32 %v7415_v52, 16  ;;  %v9128_v2 = vld [vmem:[#allocation10_spill] sm:$0xff]  ;;  %9129 = vst [vmem:[#allocation12_spill] sm:$0xff] %v7435_v20  ;;  %v2740_v48 = vrot.slane %v9134_v24, 5  ;;  %v9144_v20 = vcombine.low %v7344_v34, %v7355_v35  ;;  %v9156_v55 = vld [vmem:[#allocation19_spill] sm:$0xff] }
  0xd1   : > { %v2732_v33 = vrot.slane %v2730_v38, 4  ;;  %v2737_v10 = vrot.slane %v9128_v2, 5  ;;  %9130 = vst [vmem:[#allocation10_spill] sm:$0xff] %v7437_v7  ;;  %v5233_v2 = vrot.slane %v9132_v53, 9  ;;  %v2747_v7 = vrot.slane %v9139_v58, 5 }
  0xd2   : > { %5919 = vmatmul.mubr.msk.bf16.gmra.mxu0 %vm704_vm3, %v5210_v59  ;;  %v7423_v59 = vld [vmem:[%s6229_s25 + $0x40] sm:$0xf]  ;;  %v7458_v30 = vrot.slane %v3564_v1, 4  ;;  %v7478_v24 = vld [vmem:[%s6229_s25 + $0x54] sm:$0xf]  ;;  %v9141_v58 = vcombine.low %v7323_v4, %v7326_v63 }
  0xd3   : > { %5922 = vmatprep.mubr.msk.bf16.mxu0 %vm704_vm3, %v5211_v6  ;;  %v3573_v9 = vshll.u32 %v7423_v59, 16  ;;  %v3577_v6 = vshrl.u32 %v7423_v59, 16  ;;  %v7456_v51 = vsel %vm6559_vm7, %v2732_v33, %v2733_v21  ;;  %v9138_v21 = vld [vmem:[#allocation13_spill] sm:$0xff]  ;;  %v3612_v53 = vshrl.u32 %v7478_v24, 16  ;;  %v9140_v33 = vld [vmem:[#allocation7_spill] sm:$0xff] }
  0xd4   : > { %9133 = vst [vmem:[#allocation6_spill] sm:$0xff] %v7458_v30  ;;  %v5234_v1 = vrot.slane %v9138_v21, 9  ;;  %v2751_v21 = vrot.slane %v9140_v33, 5  ;;  %v7518_v32 = vsel %vm6559_vm7, %v2746_v43, %v2747_v7  ;;  %v7531_v43 = vld [vmem:[%s6229_s25 + $0x60] sm:$0xf]  ;;  %v9146_v7 = vld [vmem:[#allocation16_spill] sm:$0xff] }
  0xd5   : > { %v7468_v23 = vrot.slane %v3577_v6, 4  ;;  %v7488_v6 = vld [vmem:[%s6229_s25 + $0x58] sm:$0xf]  ;;  %v7534_v33 = vrot.slane %v3612_v53, 4  ;;  %v7543_v35 = vld [vmem:[%s6229_s25 + $0x64] sm:$0xf] }
  0xd6   : > { %5885 = vmatmul.mubr.msk.bf16.gmra.mxu1 %vm704_vm3, %v5177_v25  ;;  %v7449_v25 = vsel %vm6559_vm7, %v5232_v29, %v2730_v38  ;;  %v7464_v38 = vrot.slane %v3567_v50, 5  ;;  %v7466_v29 = vrot.slane %v3573_v9, 5  ;;  %v7485_v9 = vsel %vm6559_vm7, %v5233_v2, %v2737_v10  ;;  %v7550_v30 = vld [vmem:[%s6229_s25 + $0x6c] sm:$0xf] }
  0xd7   : > { %5888 = vmatprep.mubr.msk.bf16.mxu1 %vm704_vm3, %v5178_v42  ;;  %v2739_v42 = vrot.slane %v2737_v10, 4  ;;  %9137 = vst [vmem:[#allocation25_spill] sm:$0xff] %v7468_v23  ;;  %v3615_v50 = vshll.u32 %v7478_v24, 16  ;;  %v3621_v10 = vshll.u32 %v7488_v6, 16  ;;  %v3625_v2 = vshrl.u32 %v7488_v6, 16  ;;  %9147 = vst [vmem:[#allocation13_spill] sm:$0xff] %v7534_v33 }
  0xd8   : > { %9135 = vst [vmem:[#allocation11_spill] sm:$0xff] %v7464_v38  ;;  %9136 = vst [vmem:[#allocation3_spill] sm:$0xff] %v7466_v29  ;;  %v2758_v29 = vrot.slane %v9146_v7, 5  ;;  %v2765_v53 = vrot.slane %v7003_v13, 5  ;;  %v9153_v7 = vld [vmem:[#allocation18_spill] sm:$0xff] }
  0xd9   : > { %v7536_v38 = vrot.slane %v3615_v50, 5  ;;  %v7540_v34 = vrot.slane %v3625_v2, 4 }
  0xda   : > { %5923 = vmatmul.mubr.msk.bf16.gmra.mxu0 %vm704_vm3, %v5212_v44  ;;  %v7498_v44 = vsel %vm6559_vm7, %v2739_v42, %v2740_v48  ;;  %v9142_v48 = vcombine.low %v7242_v26, %v7247_v18  ;;  %v7514_v42 = vsel %vm6559_vm7, %v5234_v1, %v2744_v56  ;;  %v2753_v56 = vrot.slane %v2751_v21, 4  ;;  %v9145_v1 = vld [vmem:[#allocation17_spill] sm:$0xff] }
  0xdb   : > { %5962 = vmatprep.mubr.msk.bf16.mxu0 %vm704_vm3, %v9141_v58  ;;  %v5235_v58 = vrot.slane %v9143_v5, 9  ;;  %v2754_v23 = vrot.slane %v9145_v1, 5  ;;  %9148 = vst [vmem:[#allocation4_spill] sm:$0xff] %v7536_v38  ;;  %v7538_v5 = vrot.slane %v3621_v10, 5  ;;  %9150 = vst [vmem:[#allocation5_spill] sm:$0xff] %v7540_v34  ;;  %v9152_v10 = vld [vmem:[#allocation15_spill] sm:$0xff]  ;;  %v9154_v1 = vcombine.low %v7330_v46, %v7335_v40 }
  0xdc   : > { %9151 = vst [vmem:[#allocation17_spill] sm:$0xff] %v7550_v30  ;;  %v5236_v2 = vrot.slane %v9152_v10, 9  ;;  %v2761_v34 = vrot.slane %v9153_v7, 5  ;;  %v9155_v10 = vcombine.low %v7381_v14, %v7384_v61  ;;  %v2767_v33 = vrot.slane %v2765_v53, 4 }
  0xdd   : > { %9149 = vst [vmem:[#allocation7_spill] sm:$0xff] %v7538_v5  ;;  %v7555_v50 = vsel %vm6559_vm7, %v5235_v58, %v2751_v21  ;;  %v7560_v5 = vld [vmem:[%s6229_s25 + $0x70] sm:$0xf]  ;;  %v7569_v13 = vsel %vm6559_vm7, %v2753_v56, %v2754_v23  ;;  %v3663_v21 = vshll.u32 %v7550_v30, 16  ;;  %v5237_v56 = vrot.slane %v6996_v3, 9 }
  0xde   : > { %5889 = vmatmul.mubr.msk.bf16.gmra.mxu1 %vm704_vm3, %v9142_v48  ;;  %v2760_v48 = vrot.slane %v2758_v29, 4  ;;  %v3669_v58 = vshll.u32 %v7560_v5, 16  ;;  %v2772_v46 = vrot.slane %v7039_v41, 5  ;;  %v7594_v3 = vsel %vm6559_vm7, %v5236_v2, %v2758_v29  ;;  %v7600_v41 = vld [vmem:[%s6229_s25 + $0x78] sm:$0xf] }
  0xdf   : > { %5928 = vmatprep.mubr.msk.bf16.mxu1 %vm704_vm3, %v9144_v20  ;;  %v3660_v20 = vshrl.u32 %v7550_v30, 16  ;;  %9158 = vst [vmem:[#allocation16_spill] sm:$0xff] %v7600_v41  ;;  %v7613_v2 = vrot.slane %v3663_v21, 5  ;;  %v7618_v23 = vld [vmem:[%s6229_s25 + $0x7c] sm:$0xf]  ;;  %v9176_v7 = vcombine.low %v7485_v9, %v7498_v44  ;;  %v9184_v9 = vcombine.low %v7478_v24, %v7488_v6 }
  0xe0   : > { %9161 = vst [vmem:[#allocation18_spill] sm:$0xff] %v7618_v23  ;;  %v7635_v21 = vld [vmem:[%s6229_s25 + $0x88] sm:$0xf]  ;;  %v7712_v44 = vld [vmem:[%s6229_s25 + $0x9c] sm:$0xf] }
  0xe1   : > { %v7611_v29 = vrot.slane %v3660_v20, 4  ;;  %v2774_v20 = vrot.slane %v2772_v46, 4 }
  0xe2   : > { %5963 = vmatmul.mubr.msk.bf16.vlgmr.msra.gmra.mxu0 %vm704_vm3, %v9154_v1 }
  0xe3   : > { %6029 = vmatpush3.bf16.msra.mxu0 %v7402_v49  ;;  %5966 = vmatprep.mubr.msk.bf16.mxu0 %vm704_vm3, %v9155_v10  ;;  %v2768_v49 = vrot.slane %v9156_v55, 5  ;;  %v9157_v10 = vcombine.low %v7363_v62, %v7369_v15  ;;  %v3673_v55 = vshrl.u32 %v7560_v5, 16  ;;  %v9159_v62 = vcombine.low %v7409_v16, %v7420_v57  ;;  %v9162_v57 = vld [vmem:[#allocation20_spill] sm:$0xff] }
  0xe4   : > { %v7609_v15 = vsel %vm6559_vm7, %v2760_v48, %v2761_v34  ;;  %v5238_v16 = vrot.slane %v7028_v28, 9  ;;  %v7628_v48 = vld [vmem:[%s6229_s25 + $0x84] sm:$0xf]  ;;  %9164 = vst [vmem:[#allocation20_spill] sm:$0xff] %v7635_v21  ;;  %v3721_v28 = vshrl.u32 %v7635_v21, 16 }
  0xe5   : > { %9163 = vst [vmem:[#allocation19_spill] sm:$0xff] %v7628_v48  ;;  %v7632_v34 = vsel %vm6559_vm7, %v2767_v33, %v2768_v49  ;;  %v3711_v38 = vshll.u32 %v7628_v48, 16  ;;  %v9166_v33 = vcombine.low %v7415_v52, %v7423_v59  ;;  %v9173_v49 = vcombine.low %v7449_v25, %v7456_v51 }
  0xe6   : > { %5929 = vmatmul.mubr.msk.bf16.vlgmr.msra.gmra.mxu1 %vm704_vm3, %v9157_v10  ;;  %v7615_v10 = vrot.slane %v3669_v58, 5  ;;  %v3708_v58 = vshrl.u32 %v7628_v48, 16  ;;  %v7652_v1 = vpop.f32.mrf.mxu0  ;;  %v7699_v25 = vrot.slane %v3721_v28, 4  ;;  %v2786_v28 = vrot.slane %v7151_v17, 5 }
  0xe7   : > { %5995 = vmatpush3.bf16.msra.mxu1 %v7397_v60  ;;  %5932 = vmatprep.mubr.msk.bf16.mxu1 %vm704_vm3, %v9159_v62  ;;  %v7623_v60 = vsel %vm6559_vm7, %v5237_v56, %v2765_v53  ;;  %v2775_v62 = vrot.slane %v9162_v57, 5  ;;  %v7641_v56 = vrot.slane %v3673_v55, 4  ;;  %v2779_v57 = vrot.slane %v7089_v47, 5  ;;  %9167 = vst [vmem:[#allocation27_spill] sm:$0xff] %v7652_v1  ;;  %v7682_v53 = vld [vmem:[%s6229_s25 + $0x94] sm:$0xf] }
  0xe8   : > { %9160 = vst [vmem:[#allocation15_spill] sm:$0xff] %v7615_v10  ;;  %v3717_v55 = vshll.u32 %v7635_v21, 16  ;;  %v9168_v47 = vcombine.low %v7462_v12, %v7472_v11  ;;  %v7668_v1 = vsel %vm6559_vm7, %v5238_v16, %v2772_v46  ;;  %v7674_v10 = vrot.slane %v3708_v58, 4  ;;  %9172 = vst [vmem:[#allocation31_spill] sm:$0xff] %v7682_v53  ;;  %v7701_v51 = vpop.f32.mrf.mxu0 }
  0xe9   : > { %9165 = vst [vmem:[#allocation26_spill] sm:$0xff] %v7641_v56  ;;  %v7672_v56 = vsel %vm6559_vm7, %v2774_v20, %v2775_v62  ;;  %v5239_v16 = vrot.slane %v7083_v19, 9  ;;  %v2781_v62 = vrot.slane %v2779_v57, 4  ;;  %v9175_v20 = vld [vmem:[#allocation21_spill] sm:$0xff]  ;;  %9178 = vst [vmem:[#allocation33_spill] sm:$0xff] %v7699_v25  ;;  %v9180_v19 = vld [vmem:[#allocation24_spill] sm:$0xff] }
  0xea   : > { %5967 = vmatmul.mubr.msk.bf16.gmra.mxu0 %vm704_vm3, %v9166_v33  ;;  %9169 = vst [vmem:[#allocation28_spill] sm:$0xff] %v7674_v10  ;;  %v7679_v33 = vld [vmem:[%s6229_s25 + $0x90] sm:$0xf]  ;;  %v2782_v58 = vrot.slane %v9175_v20, 5  ;;  %9179 = vst [vmem:[#allocation34_spill] sm:$0xff] %v7701_v51  ;;  %v5240_v17 = vrot.slane %v7143_v0, 9  ;;  %v9186_v0 = vcombine.low %v7531_v43, %v7543_v35 }
  0xeb   : > { %5970 = vmatprep.mubr.msk.bf16.mxu0 %vm704_vm3, %v9168_v47  ;;  %v7676_v47 = vrot.slane %v3711_v38, 5  ;;  %9171 = vst [vmem:[#allocation30_spill] sm:$0xff] %v7679_v33  ;;  %v7688_v46 = vpop.f32.mrf.mxu1  ;;  %v5242_v38 = vrot.slane %v7177_v37, 9  ;;  %9181 = vst [vmem:[#allocation24_spill] sm:$0xff] %v7712_v44  ;;  %v7727_v37 = vsel %vm6559_vm7, %v5239_v16, %v2779_v57  ;;  %v3756_v57 = vshrl.u32 %v7712_v44, 16 }
  0xec   : > { %9174 = vst [vmem:[#allocation32_spill] sm:$0xff] %v7688_v46  ;;  %v2803_v46 = vrot.slane %v9180_v19, 5  ;;  %v7731_v10 = vsel %vm6559_vm7, %v2781_v62, %v2782_v58  ;;  %v2793_v16 = vrot.slane %v7167_v8, 5  ;;  %v9187_v58 = vld [vmem:[#allocation22_spill] sm:$0xff]  ;;  %v5244_v8 = vrot.slane %v7242_v26, 9 }
  0xed   : > { %9170 = vst [vmem:[#allocation29_spill] sm:$0xff] %v7676_v47  ;;  %v7697_v47 = vrot.slane %v3717_v55, 5  ;;  %v7717_v55 = vld [vmem:[%s6229_s25 + $0xa0] sm:$0xf]  ;;  %v7723_v20 = vpop.f32.mrf.mxu1  ;;  %v2814_v25 = vrot.slane %v7247_v18, 5 }
  0xee   : > { %5933 = vmatmul.mubr.msk.bf16.gmra.mxu1 %vm704_vm3, %v9173_v49  ;;  %v2800_v49 = vrot.slane %v7191_v54, 5  ;;  %9182 = vst [vmem:[#allocation35_spill] sm:$0xff] %v7717_v55  ;;  %9183 = vst [vmem:[#allocation36_spill] sm:$0xff] %v7723_v20  ;;  %v5241_v20 = vrot.slane %v7164_v22, 9  ;;  %v2817_v22 = vrot.slane %v7278_v27, 5 }
  0xef   : > { %5936 = vmatprep.mubr.msk.bf16.mxu1 %vm704_vm3, %v9176_v7  ;;  %9177 = vst [vmem:[#allocation21_spill] sm:$0xff] %v7697_v47  ;;  %v2789_v7 = vrot.slane %v9187_v58, 5  ;;  %v7766_v58 = vpop.f32.mrf.mxu1  ;;  %v9190_v47 = vcombine.low %v7555_v50, %v7569_v13  ;;  %v7788_v18 = vld [vmem:[%s6229_s25 + $0xa8] sm:$0xf]  ;;  %v2807_v50 = vrot.slane %v7208_v36, 5  ;;  %v7793_v13 = vsel %vm6559_vm7, %v5244_v8, %v2814_v25 }
  0xf0   : > { %v7721_v54 = vsel %vm6559_vm7, %v5242_v38, %v2800_v49  ;;  %v2802_v19 = vrot.slane %v2800_v49, 4  ;;  %v7739_v38 = vpop.f32.mrf.mxu0  ;;  %v3759_v49 = vshll.u32 %v7712_v44, 16  ;;  %9189 = vst [vmem:[#allocation22_spill] sm:$0xff] %v7766_v58  ;;  %v7811_v36 = vsel %vm6559_vm7, %v5241_v20, %v2793_v16  ;;  %v7814_v8 = vld [vmem:[%s6229_s25 + $0xac] sm:$0xf] }
  0xf1   : > { %9185 = vst [vmem:[#allocation37_spill] sm:$0xff] %v7739_v38  ;;  %v3769_v38 = vshrl.u32 %v7717_v55, 16 }
  0xf2   : > { %5971 = vmatmul.mubr.msk.bf16.gmra.mxu0 %vm704_vm3, %v9184_v9  ;;  %v7746_v62 = vsel %vm6559_vm7, %v2802_v19, %v2803_v46  ;;  %v2788_v46 = vrot.slane %v2786_v28, 4  ;;  %v3765_v19 = vshll.u32 %v7717_v55, 16  ;;  %v7770_v9 = vsel %vm6559_vm7, %v5240_v17, %v2786_v28  ;;  %v9193_v28 = vld [vmem:[#allocation23_spill] sm:$0xff] }
  0xf3   : > { %5974 = vmatprep.mubr.msk.bf16.mxu0 %vm704_vm3, %v9186_v0  ;;  %v9188_v0 = vcombine.low %v7514_v42, %v7518_v32  ;;  %v7779_v32 = vpop.f32.mrf.mxu0  ;;  %v7781_v42 = vrot.slane %v3756_v57, 4  ;;  %v2796_v17 = vrot.slane %v9193_v28, 5  ;;  %v7785_v26 = vrot.slane %v3759_v49, 5  ;;  %v7805_v49 = vld [vmem:[%s6229_s25 + $0xb4] sm:$0xf] }
  0xf4   : > { %9191 = vst [vmem:[#allocation38_spill] sm:$0xff] %v7779_v32  ;;  %v7797_v57 = vsel %vm6559_vm7, %v2788_v46, %v2789_v7  ;;  %v7799_v58 = vrot.slane %v3765_v19, 5  ;;  %v7801_v28 = vrot.slane %v3769_v38, 4  ;;  %v3804_v7 = vshrl.u32 %v7805_v49, 16  ;;  %v7868_v32 = vld [vmem:[%s6229_s25 + $0xc4] sm:$0xf] }
  0xf5   : > { %9192 = vst [vmem:[#allocation39_spill] sm:$0xff] %v7781_v42  ;;  %9194 = vst [vmem:[#allocation23_spill] sm:$0xff] %v7785_v26  ;;  %v7807_v26 = vpop.f32.mrf.mxu1  ;;  %v3807_v46 = vshll.u32 %v7805_v49, 16  ;;  %v9198_v19 = vcombine.low %v7550_v30, %v7560_v5  ;;  %v7885_v42 = vld [vmem:[%s6229_s25 + $0xcc] sm:$0xf] }
  0xf6   : > { %5937 = vmatmul.mubr.msk.bf16.gmra.mxu1 %vm704_vm3, %v9188_v0  ;;  %v2795_v0 = vrot.slane %v2793_v16, 4  ;;  %9195 = vst [vmem:[#allocation40_spill] sm:$0xff] %v7799_v58  ;;  %9196 = vst [vmem:[#allocation41_spill] sm:$0xff] %v7801_v28  ;;  %v7865_v28 = vld [vmem:[%s6229_s25 + $0xc0] sm:$0xf] }
  0xf7   : > { %5940 = vmatprep.mubr.msk.bf16.mxu1 %vm704_vm3, %v9190_v47  ;;  %v2816_v47 = vrot.slane %v2814_v25, 4  ;;  %9197 = vst [vmem:[#allocation42_spill] sm:$0xff] %v7807_v26  ;;  %v7817_v25 = vld [vmem:[%s6229_s25 + $0xb8] sm:$0xf]  ;;  %v7829_v27 = vpop.f32.mrf.mxu0 }
  0xf8   : > { %9199 = vst [vmem:[#allocation43_spill] sm:$0xff] %v7829_v27  ;;  %v7833_v20 = vsel %vm6559_vm7, %v2795_v0, %v2796_v17  ;;  %v3813_v16 = vshll.u32 %v7817_v25, 16  ;;  %v3817_v26 = vshrl.u32 %v7817_v25, 16  ;;  %v2809_v0 = vrot.slane %v2807_v50, 4 }
  0xf9   : > { %v7823_v38 = vsel %vm6559_vm7, %v2816_v47, %v2817_v22  ;;  %v9200_v22 = vcombine.low %v7600_v41, %v7618_v23  ;;  %v2810_v17 = vrot.slane %v7257_v39, 5  ;;  %v3501_v27 = vshll.u32 %v7326_v63, 16  ;;  %v7968_v41 = vld [vmem:[%s6229_s25 + $0x44] sm:$0x1] }
  0xfa   : > { %5975 = vmatmul.mubr.msk.bf16.gmra.mxu0 %vm704_vm3, %v9198_v19  ;;  %v5243_v19 = vrot.slane %v7202_v45, 9  ;;  %v7878_v47 = vrot.slane %v3807_v46, 5  ;;  %v7880_v58 = vrot.slane %v3813_v16, 5  ;;  %v7882_v39 = vrot.slane %v3817_v26, 4  ;;  %v5280_v16 = vld [vmem:[%s6229_s25 + $0x20] sm:$0x1] }
  0xfb   : > { %5978 = vmatprep.mubr.msk.bf16.mxu0 %vm704_vm3, %v9200_v22  ;;  %v9201_v22 = vcombine.low %v7594_v3, %v7609_v15  ;;  %v7856_v45 = vpop.f32.mrf.mxu1  ;;  %v9203_v3 = vcombine.low %v7623_v60, %v7632_v34  ;;  %v7874_v15 = vpop.f32.mrf.mxu0  ;;  %v7894_v34 = vsel %vm6559_vm7, %v2809_v0, %v2810_v17  ;;  %v3852_v46 = vshrl.u32 %v7885_v42, 16 }
  0xfc   : > { %9202 = vst [vmem:[#allocation44_spill] sm:$0xff] %v7856_v45  ;;  %9204 = vst [vmem:[#allocation45_spill] sm:$0xff] %v7874_v15  ;;  %v7890_v60 = vsel %vm6559_vm7, %v5243_v19, %v2807_v50  ;;  %v9209_v26 = vshrl.u32 %v7323_v4, 16  ;;  %v7905_v45 = vrot.slane %v3501_v27, 5  ;;  %v9211_v50 = vshrl.u32 %v7326_v63, 16 }
  0xfd   : > { %9206 = vst [vmem:[#allocation47_spill] sm:$0xff] %v7878_v47  ;;  %9207 = vst [vmem:[#allocation48_spill] sm:$0xff] %v7880_v58  ;;  %v7909_v47 = vpop.f32.mrf.mxu1  ;;  %v3855_v15 = vshll.u32 %v7885_v42, 16  ;;  %v7921_v27 = vpop.f32.mrf.mxu0  ;;  %v4187_v17 = vrot.slane %v7326_v63, 5  ;;  %v3511_v0 = vshll.u32 %v5280_v16, 16 }
  0xfe   : > { %5941 = vmatmul.mubr.msk.bf16.gmra.mxu1 %vm704_vm3, %v9201_v22  ;;  %v7876_v22 = vrot.slane %v3804_v7, 4  ;;  %9208 = vst [vmem:[#allocation49_spill] sm:$0xff] %v7882_v39  ;;  %v7897_v7 = vld [vmem:[%s6229_s25 + $0xd0] sm:$0xf]  ;;  %v9210_v39 = vshll.u32 %v7323_v4, 16  ;;  %v3507_v19 = vrot.slane %v9211_v50, 4 }
  0xff   : > { %5944 = vmatprep.mubr.msk.bf16.mxu1 %vm704_vm3, %v9203_v3  ;;  %v3494_v3 = vrot.slane %v9209_v26, 4  ;;  %9212 = vst [vmem:[#allocation50_spill] sm:$0xff] %v7909_v47  ;;  %v5283_v26 = vld [vmem:[%s6229_s25 + $0x2c] sm:$0x1]  ;;  %9214 = vst [vmem:[#allocation51_spill] sm:$0xff] %v7921_v27  ;;  %v3861_v27 = vshll.u32 %v7897_v7, 16 }
 0x100   : > { %9205 = vst [vmem:[#allocation46_spill] sm:$0xff] %v7876_v22  ;;  %v3497_v58 = vrot.slane %v9210_v39, 5  ;;  %v9213_v39 = vcombine.low %v7628_v48, %v7635_v21  ;;  %v9215_v22 = vcombine.low %v7679_v33, %v7682_v53  ;;  %v3549_v50 = vshll.u32 %v7384_v61, 16 }
 0x101   : > { %v3508_v21 = vor.u32 %v3507_v19, %v7905_v45  ;;  %v3535_v63 = vshll.u32 %v5283_v26, 16  ;;  %v9217_v33 = vcombine.low %v7668_v1, %v7672_v56  ;;  %v7945_v48 = vrot.slane %v3855_v15, 5 }
 0x102   : > { %5979 = vmatmul.mubr.msk.bf16.gmra.mxu0 %vm704_vm3, %v9213_v39  ;;  %v7934_v39 = vrot.slane %v3852_v46, 4  ;;  %v3498_v47 = vor.u32 %v3497_v58, %v3494_v3  ;;  %v3865_v46 = vshrl.u32 %v7897_v7, 16  ;;  %v4190_v53 = vrot.slane %v5280_v16, 5  ;;  %v7953_v3 = vpop.f32.mrf.mxu0  ;;  %v5286_v16 = vld [vmem:[%s6229_s25 + $0x38] sm:$0x1] }
 0x103   : > { %5982 = vmatprep.mubr.msk.bf16.mxu0 %vm704_vm3, %v9215_v22  ;;  %v7943_v22 = vpop.f32.mrf.mxu1  ;;  %9219 = vst [vmem:[#allocation54_spill] sm:$0xff] %v7945_v48  ;;  %v9220_v58 = vcombine.low %v7727_v37, %v7731_v10  ;;  %9221 = vst [vmem:[#allocation55_spill] sm:$0xff] %v7953_v3  ;;  %v4189_v1 = vrot.slane %v4187_v17, 4  ;;  %v4197_v56 = vrot.slane %v5283_v26, 5  ;;  %v9223_v15 = vshll.u32 %v7381_v14, 16 }
 0x104   : > { %9216 = vst [vmem:[#allocation52_spill] sm:$0xff] %v7934_v39  ;;  %9218 = vst [vmem:[#allocation53_spill] sm:$0xff] %v7943_v22  ;;  %v5392_v39 = vrot.slane %v7323_v4, 9  ;;  %v7959_v48 = vrot.slane %v3861_v27, 5  ;;  %v7963_v51 = vrot.slane %v3549_v50, 5  ;;  %v9225_v10 = vshrl.u32 %v7384_v61, 16 }
 0x105   : > { %v3545_v22 = vrot.slane %v9223_v15, 5  ;;  %v3509_v3 = vrot.slane %v3508_v21, 4  ;;  %v3513_v30 = vrot.slane %v3511_v0, 5  ;;  %v3537_v26 = vrot.slane %v3535_v63, 5  ;;  %v9229_v15 = vld [vmem:[#allocation8_spill] sm:$0xff] }
 0x106   : > { %5945 = vmatmul.mubr.msk.bf16.gmra.mxu1 %vm704_vm3, %v9217_v33  ;;  %v9222_v33 = vshrl.u32 %v7381_v14, 16  ;;  %9224 = vst [vmem:[#allocation56_spill] sm:$0xff] %v7959_v48  ;;  %v3555_v37 = vrot.slane %v9225_v10, 4  ;;  %v7972_v23 = vrot.slane %v3865_v46, 4  ;;  %v7976_v27 = vsel %vm6559_vm7, %v5392_v39, %v4187_v17  ;;  %v9240_v48 = vld [vmem:[#allocation12_spill] sm:$0xff] }
 0x107   : > { %5948 = vmatprep.mubr.msk.bf16.mxu1 %vm704_vm3, %v9220_v58  ;;  %v3499_v58 = vrot.slane %v3498_v47, 4  ;;  %v9228_v50 = vrot.slane %v7335_v40, 5  ;;  %v9230_v4 = vrot.slane %v9229_v15, 9  ;;  %v4201_v21 = vrot.slane %v7384_v61, 5  ;;  %v9232_v40 = vld [vmem:[#allocation14_spill] sm:$0xff]  ;;  %v9235_v15 = vld [vmem:[#allocation11_spill] sm:$0xff] }
 0x108   : > { %v3542_v19 = vrot.slane %v9222_v33, 4  ;;  %v7970_v33 = vpop.f32.mrf.mxu1  ;;  %9227 = vst [vmem:[#allocation58_spill] sm:$0xff] %v7972_v23  ;;  %v9231_v0 = vcombine.low %v7712_v44, %v7717_v55  ;;  %v7991_v63 = vpop.f32.mrf.mxu0  ;;  %v7995_v17 = vsel %vm6559_vm7, %v4189_v1, %v4190_v53  ;;  %v8000_v39 = vsel %vm6559_vm7, %v9232_v40, %v4197_v56  ;;  %v9237_v53 = vld [vmem:[#allocation25_spill] sm:$0xff] }
 0x109   : > { %9226 = vst [vmem:[#allocation57_spill] sm:$0xff] %v7970_v33  ;;  %v7984_v47 = vsel %vm6559_vm7, %v9230_v4, %v9228_v50  ;;  %v3559_v4 = vshll.u32 %v5286_v16, 16  ;;  %v9233_v61 = vcombine.low %v7788_v18, %v7814_v8  ;;  %v3556_v10 = vor.u32 %v3555_v37, %v7963_v51  ;;  %v9234_v50 = vld [vmem:[#allocation6_spill] sm:$0xff]  ;;  %v9236_v33 = vld [vmem:[#allocation3_spill] sm:$0xff]  ;;  %v9239_v40 = vld [vmem:[#allocation9_spill] sm:$0xff] }
 0x10a   : > { %5983 = vmatmul.mubr.msk.bf16.gmra.mxu0 %vm704_vm3, %v9231_v0  ;;  %v3546_v46 = vor.u32 %v3545_v22, %v3542_v19  ;;  %v3570_v0 = vor.u32 %v9235_v15, %v9234_v50  ;;  %v3580_v1 = vor.u32 %v9237_v53, %v9236_v33  ;;  %v3583_v23 = vshll.u32 %v7968_v41, 16 }
 0x10b   : > { %5986 = vmatprep.mubr.msk.bf16.mxu0 %vm704_vm3, %v9233_v61  ;;  %v3504_v22 = vsel %vm6274_vm4, %v3499_v58, %v7905_v45  ;;  %v3514_v19 = vsel %vm6274_vm4, %v3509_v3, %v3513_v30  ;;  %v3528_v37 = vsel %vm6274_vm4, %v9240_v48, %v9239_v40  ;;  %v9241_v61 = vld [vmem:[#allocation10_spill] sm:$0xff]  ;;  %v9242_v15 = vcombine.low %v7770_v9, %v7797_v57  ;;  %v8036_v40 = vpop.f32.mrf.mxu0 }
 0x10c   : > { %v3538_v50 = vsel %vm6274_vm4, %v9241_v61, %v3537_v26  ;;  %v5394_v45 = vrot.slane %v7381_v14, 9  ;;  %v4203_v58 = vrot.slane %v4201_v21, 4  ;;  %v4204_v30 = vrot.slane %v5286_v16, 5  ;;  %9245 = vst [vmem:[#allocation14_spill] sm:$0xff] %v8036_v40 }
 0x10d   : > { %v8028_v53 = vpop.f32.mrf.mxu1  ;;  %v3597_v3 = vshll.u32 %v7472_v11, 16  ;;  %v9244_v48 = vcombine.low %v7811_v36, %v7833_v20  ;;  %v3547_v26 = vrot.slane %v3546_v46, 4  ;;  %v3561_v14 = vrot.slane %v3559_v4, 5  ;;  %v8061_v4 = vld [vmem:[%s6229_s25 + $0x50] sm:$0x1] }
 0x10e   : > { %5949 = vmatmul.mubr.msk.bf16.gmra.mxu1 %vm704_vm3, %v9242_v15  ;;  %9243 = vst [vmem:[#allocation8_spill] sm:$0xff] %v8028_v53  ;;  %v3557_v61 = vrot.slane %v3556_v10, 4  ;;  %v3571_v16 = vrot.slane %v3570_v0, 4  ;;  %v3581_v15 = vrot.slane %v3580_v1, 4  ;;  %v3585_v53 = vrot.slane %v3583_v23, 5 }
 0x10f   : > { %5952 = vmatprep.mubr.msk.bf16.mxu1 %vm704_vm3, %v9244_v48  ;;  %v8042_v44 = vcombine.low %v3504_v22, %v3514_v19  ;;  %v8044_v36 = vcombine.low %v3528_v37, %v3538_v50  ;;  %v9246_v20 = vshrl.u32 %v7462_v12, 16  ;;  %v9247_v55 = vshll.u32 %v7462_v12, 16  ;;  %v8050_v40 = vpop.f32.mrf.mxu1  ;;  %v8071_v22 = vpop.f32.mrf.mxu0 }
 0x110   : > { %9248 = vst [vmem:[#allocation6_spill] sm:$0xff] %v8050_v40  ;;  %v8054_v46 = vsel %vm6559_vm7, %v5394_v45, %v4201_v21  ;;  %v8058_v23 = vsel %vm6559_vm7, %v4203_v58, %v4204_v30  ;;  %v8063_v10 = vrot.slane %v3597_v3, 5  ;;  %v9249_v0 = vshrl.u32 %v7472_v11, 16  ;;  %v8088_v3 = vld [vmem:[%s6229_s25 + $0x5c] sm:$0x1] }
 0x111   : > { %v3590_v48 = vrot.slane %v9246_v20, 4  ;;  %v3593_v9 = vrot.slane %v9247_v55, 5  ;;  %v9250_v55 = vcombine.low %v7805_v49, %v7817_v25  ;;  %v3552_v21 = vsel %vm6274_vm4, %v3547_v26, %v7963_v51  ;;  %v8146_v40 = vld [vmem:[%s6229_s25 + $0x74] sm:$0x1] }
 0x112   : > { %v3603_v1 = vrot.slane %v9249_v0, 4  ;;  %v9251_v19 = vrot.slane %v7423_v59, 5  ;;  %v9252_v37 = vrot.slane %v7415_v52, 9  ;;  %v4211_v30 = vrot.slane %v7968_v41, 5 }
 0x113   : > { %5987 = vmatmul.mubr.msk.bf16.gmra.mxu0 %vm704_vm3, %v9250_v55  ;;  %v9254_v20 = vcombine.low %v7865_v28, %v7868_v32  ;;  %v3562_v51 = vsel %vm6274_vm4, %v3557_v61, %v3561_v14  ;;  %v3576_v52 = vsel %vm6274_vm4, %v3571_v16, %v9236_v33  ;;  %v3586_v59 = vsel %vm6274_vm4, %v3581_v15, %v3585_v53  ;;  %v8110_v61 = vpop.f32.mrf.mxu1  ;;  %v9257_v53 = vld [vmem:[#allocation13_spill] sm:$0xff]  ;;  %v9258_v16 = vld [vmem:[#allocation4_spill] sm:$0xff] }
 0x114   : > { %v8082_v50 = vsel %vm6559_vm7, %v9252_v37, %v9251_v19  ;;  %v9253_v45 = vmov %v9251_v19  ;;  %v3645_v26 = vshll.u32 %v7543_v35, 16  ;;  %v3594_v0 = vor.u32 %v3593_v9, %v3590_v48  ;;  %9256 = vst [vmem:[#allocation11_spill] sm:$0xff] %v8110_v61  ;;  %v9259_v37 = vld [vmem:[#allocation7_spill] sm:$0xff]  ;;  %v8118_v48 = vpop.f32.mrf.mxu0 }
 0x115   : > { %v4210_v58 = vrot.slane %v9253_v45, 4  ;;  %5990 = vmatprep.mubr.msk.bf16.mxu0 %vm704_vm3, %v9254_v20  ;;  %v3607_v55 = vshll.u32 %v8061_v4, 16  ;;  %v4215_v19 = vrot.slane %v7472_v11, 5  ;;  %v9255_v14 = vcombine.low %v7721_v54, %v7746_v62  ;;  %v9260_v45 = vld [vmem:[#allocation5_spill] sm:$0xff] }
 0x116   : > { %v3604_v33 = vor.u32 %v3603_v1, %v8063_v10  ;;  %v3618_v15 = vor.u32 %v9258_v16, %v9257_v53  ;;  %v3628_v20 = vor.u32 %v9260_v45, %v9259_v37  ;;  %v3631_v9 = vshll.u32 %v8088_v3, 16 }
 0x117   : > { %5953 = vmatmul.mubr.msk.bf16.gmra.mxu1 %vm704_vm3, %v9255_v14  ;;  %v9261_v11 = vcombine.low %v7890_v60, %v7894_v34  ;;  %v8124_v54 = vcombine.low %v3552_v21, %v3562_v51  ;;  %v8126_v62 = vcombine.low %v3576_v52, %v3586_v59  ;;  %v8130_v1 = vsel %vm6559_vm7, %v4210_v58, %v4211_v30  ;;  %v5298_v30 = vld [vmem:[%s6229_s25 + $0x68] sm:$0x1] }
 0x118   : > { %v5396_v14 = vrot.slane %v7462_v12, 9  ;;  %v9262_v53 = vshrl.u32 %v7531_v43, 16  ;;  %v9263_v45 = vshll.u32 %v7531_v43, 16  ;;  %v8137_v60 = vrot.slane %v3645_v26, 5 }
 0x119   : > { %5956 = vmatprep.mubr.msk.bf16.mxu1 %vm704_vm3, %v9261_v11  ;;  %v9264_v34 = vshrl.u32 %v7543_v35, 16  ;;  %v3595_v51 = vrot.slane %v3594_v0, 4  ;;  %v3609_v52 = vrot.slane %v3607_v55, 5  ;;  %v4217_v59 = vrot.slane %v4215_v19, 4  ;;  %v8143_v11 = vpop.f32.mrf.mxu1 }
 0x11a   : > { %v3638_v16 = vrot.slane %v9262_v53, 4  ;;  %v3641_v41 = vrot.slane %v9263_v45, 5  ;;  %v4218_v58 = vrot.slane %v8061_v4, 5  ;;  %9265 = vst [vmem:[#allocation3_spill] sm:$0xff] %v8143_v11  ;;  %v3605_v12 = vrot.slane %v3604_v33, 4  ;;  %v8148_v45 = vpop.f32.mrf.mxu0 }
 0x11b   : > { %v3651_v21 = vrot.slane %v9264_v34, 4  ;;  %v3619_v57 = vrot.slane %v3618_v15, 4  ;;  %v3629_v61 = vrot.slane %v3628_v20, 4  ;;  %v3633_v53 = vrot.slane %v3631_v9, 5 }
 0x11c   : > { %v9266_v26 = vcombine.low %v7885_v42, %v7897_v7  ;;  %v8156_v0 = vsel %vm6559_vm7, %v5396_v14, %v4215_v19  ;;  %v9267_v4 = vrot.slane %v7488_v6, 5  ;;  %v4225_v33 = vrot.slane %v8088_v3, 5  ;;  %v8169_v14 = vpop.f32.mrf.mxu0 }
 0x11d   : > { %v4229_v15 = vrot.slane %v7543_v35, 5  ;;  %v9268_v20 = vcombine.low %v7976_v27, %v7995_v17  ;;  %v3642_v9 = vor.u32 %v3641_v41, %v3638_v16  ;;  %v3652_v34 = vor.u32 %v3651_v21, %v8137_v60  ;;  %v9271_v17 = vld [vmem:[#allocation15_spill] sm:$0xff]  ;;  %v9272_v41 = vld [vmem:[#allocation26_spill] sm:$0xff] }
 0x11e   : > { %5991 = vmatmul.mubr.msk.bf16.gmra.mxu0 %vm704_vm3, %v9266_v26  ;;  %v4224_v55 = vrot.slane %v9267_v4, 4  ;;  %v3655_v26 = vshll.u32 %v5298_v30, 16  ;;  %v3666_v19 = vor.u32 %v7613_v2, %v7611_v29  ;;  %v3600_v3 = vsel %vm6274_vm4, %v3595_v51, %v8063_v10  ;;  %v8185_v29 = vpop.f32.mrf.mxu1 }
 0x11f   : > { %6030 = vmatprep.mubr.msk.bf16.mxu0 %vm704_vm3, %v9268_v20  ;;  %v9269_v35 = vmov %v9267_v4  ;;  %v9270_v4 = vrot.slane %v7478_v24, 9  ;;  %v3676_v16 = vor.u32 %v9272_v41, %v9271_v17  ;;  %v3679_v21 = vshll.u32 %v8146_v40, 16  ;;  %9273 = vst [vmem:[#allocation25_spill] sm:$0xff] %v8185_v29  ;;  %v8202_v20 = vpop.f32.mrf.mxu0 }
 0x120   : > { %v9274_v2 = vcombine.low %v7793_v13, %v7823_v38  ;;  %v3610_v6 = vsel %vm6274_vm4, %v3605_v12, %v3609_v52  ;;  %v8195_v24 = vsel %vm6559_vm7, %v4217_v59, %v4218_v58  ;;  %v3624_v10 = vsel %vm6274_vm4, %v3619_v57, %v9259_v37  ;;  %v8211_v58 = vpop.f32.mrf.mxu1 }
 0x121   : > { %v8180_v27 = vsel %vm6559_vm7, %v9270_v4, %v9269_v35  ;;  %v3634_v51 = vsel %vm6274_vm4, %v3629_v61, %v3633_v53  ;;  %v8208_v13 = vsel %vm6559_vm7, %v4224_v55, %v4225_v33  ;;  %v5398_v38 = vrot.slane %v7531_v43, 9  ;;  %9275 = vst [vmem:[#allocation2_spill] sm:$0xff] %v8211_v58  ;;  %v8213_v61 = vpop.f32.mrf.mxu0  ;;  %v9358_v56 = vld [vmem:[#allocation3_spill] sm:$0xff] }
 0x122   : > { %5957 = vmatmul.mubr.msk.bf16.gmra.mxu1 %vm704_vm3, %v9274_v2  ;;  %v4231_v52 = vrot.slane %v4229_v15, 4  ;;  %v4232_v59 = vrot.slane %v5298_v30, 5  ;;  %v3643_v12 = vrot.slane %v3642_v9, 4  ;;  %v3653_v57 = vrot.slane %v3652_v34, 4  ;;  %v8218_v33 = vpop.f32.mrf.mxu1  ;;  %v9278_v34 = vld [vmem:[#allocation18_spill] sm:$0xff] }
 0x123   : > { %5996 = vmatprep.mubr.msk.bf16.mxu1 %vm704_vm3, %v8042_v44  ;;  %v3657_v37 = vrot.slane %v3655_v26, 5  ;;  %v3667_v35 = vrot.slane %v3666_v19, 4  ;;  %v3677_v53 = vrot.slane %v3676_v16, 4  ;;  %v3681_v4 = vrot.slane %v3679_v21, 5  ;;  %9277 = vst [vmem:[#allocation9_spill] sm:$0xff] %v8218_v33  ;;  %v5828_v19 = vpop.f32.mrf.mxu0 }
 0x124   : > { %v9276_v44 = vrot.slane %v7560_v5, 5  ;;  %v4239_v55 = vrot.slane %v8146_v40, 5  ;;  %v5412_v43 = vcombine.low %v8082_v50, %v8130_v1  ;;  %v8222_v30 = vcombine.low %v3600_v3, %v3610_v6  ;;  %v9280_v1 = vld [vmem:[#allocation16_spill] sm:$0xff]  ;;  %v8243_v6 = vpop.f32.mrf.mxu1 }
 0x125   : > { %v5413_v9 = vcombine.low %v8156_v0, %v8195_v24  ;;  %v3693_v26 = vshll.u32 %v9278_v34, 16  ;;  %v9279_v16 = vcombine.low %v7984_v47, %v8000_v39  ;;  %v8233_v40 = vsel %vm6559_vm7, %v5398_v38, %v4229_v15  ;;  %9283 = vst [vmem:[#allocation12_spill] sm:$0xff] %v8243_v6 }
 0x126   : > { %v4238_v41 = vrot.slane %v9276_v44, 4  ;;  %v8237_v50 = vsel %vm6559_vm7, %v4231_v52, %v4232_v59  ;;  %v9281_v3 = vshrl.u32 %v9280_v1, 16  ;;  %v9282_v0 = vshll.u32 %v9280_v1, 16  ;;  %v5304_v52 = vld [vmem:[%s6229_s25 + $0x80] sm:$0x1]  ;;  %v1476_v59 = vpop.f32.mrf.mxu0 }
 0x127   : > { %6031 = vmatmul.mubr.msk.bf16.vlgmr.msra.gmra.mxu0 %vm704_vm3, %v9279_v16  ;;  %v9284_v47 = vcombine.low %v8054_v46, %v8058_v23  ;;  %v8249_v39 = vcombine.low %v3624_v10, %v3634_v51  ;;  %v3648_v24 = vsel %vm6274_vm4, %v3643_v12, %v8137_v60  ;;  %v3658_v38 = vsel %vm6274_vm4, %v3653_v57, %v3657_v37  ;;  %v9286_v51 = vld [vmem:[#allocation17_spill] sm:$0xff]  ;;  %v5794_v12 = vpop.f32.mrf.mxu1 }
 0x128   : > { %v3686_v21 = vrot.slane %v9281_v3, 4  ;;  %v3689_v2 = vrot.slane %v9282_v0, 5  ;;  %v3672_v46 = vsel %vm6274_vm4, %v3667_v35, %v9271_v17  ;;  %v3682_v23 = vsel %vm6274_vm4, %v3677_v53, %v3681_v4  ;;  %v8286_v53 = vld [vmem:[%s6229_s25 + $0x8c] sm:$0x1] }
 0x129   : > { %6034 = vmatprep.mubr.msk.bf16.mxu0 %vm704_vm3, %v9284_v47  ;;  %v9285_v10 = vmov %v9276_v44  ;;  %v9287_v44 = vrot.slane %v9286_v51, 9  ;;  %v8274_v60 = vsel %vm6559_vm7, %v4238_v41, %v4239_v55  ;;  %v8280_v57 = vrot.slane %v3693_v26, 5  ;;  %v9289_v4 = vld [vmem:[#allocation27_spill] sm:$0xff]  ;;  %v5829_v41 = vpop.f32.mrf.mxu0  ;;  %v1083_v47 = vpop.f32.mrf.mxu1  ;;  %v9290_v51 = vld [vmem:[#allocation28_spill] sm:$0xff] }
 0x12a   : > { %5997 = vmatmul.mubr.msk.bf16.vlgmr.msra.gmra.mxu1 %vm704_vm3, %v8044_v36  ;;  %v9288_v5 = vshrl.u32 %v9278_v34, 16  ;;  %v4243_v35 = vrot.slane %v9278_v34, 5  ;;  %v1092_v3 = vadd.f32 %v5794_v12, %v9289_v4  ;;  %v8291_v55 = vcombine.low %v3648_v24, %v3658_v38  ;;  %v9293_v4 = vld [vmem:[#allocation34_spill] sm:$0xff]  ;;  %v9294_v24 = vld [vmem:[#allocation21_spill] sm:$0xff] }
 0x12b   : > { %v8270_v16 = vsel %vm6559_vm7, %v9287_v44, %v9285_v10  ;;  %6000 = vmatprep.mubr.msk.bf16.mxu1 %vm704_vm3, %v8124_v54  ;;  %v3690_v36 = vor.u32 %v3689_v2, %v3686_v21  ;;  %v3703_v0 = vshll.u32 %v5304_v52, 16  ;;  %v8293_v26 = vcombine.low %v3672_v46, %v3682_v23  ;;  %v9291_v44 = vld [vmem:[#allocation29_spill] sm:$0xff]  ;;  %v1479_v54 = vpop.f32.mrf.mxu0  ;;  %v5795_v46 = vpop.f32.mrf.mxu1 }
 0x12c   : > { %v3699_v37 = vrot.slane %v9288_v5, 4  ;;  %v5400_v34 = vrot.slane %v9280_v1, 9  ;;  %v3714_v5 = vor.u32 %v9291_v44, %v9290_v51  ;;  %v8300_v12 = vadd.f32 %v5828_v19, %v1092_v3  ;;  %v9295_v38 = vld [vmem:[#allocation33_spill] sm:$0xff]  ;;  %v9296_v1 = vld [vmem:[#allocation31_spill] sm:$0xff] }
 0x12d   : > { %v1084_v17 = vadd.f32 %v1083_v47, %v9293_v4  ;;  %v3724_v21 = vor.u32 %v9295_v38, %v9294_v24  ;;  %v3727_v2 = vshll.u32 %v8286_v53, 16  ;;  %v4245_v10 = vrot.slane %v4243_v35, 4  ;;  %v9298_v19 = vld [vmem:[#allocation37_spill] sm:$0xff]  ;;  %v5832_v51 = vpop.f32.mrf.mxu0  ;;  %v1086_v4 = vpop.f32.mrf.mxu1 }
 0x12e   : > { %9292 = vst [vmem:[#allocation10_spill] sm:$0xff] %v8300_v12  ;;  %v3700_v23 = vor.u32 %v3699_v37, %v8280_v57  ;;  %v4246_v15 = vrot.slane %v5304_v52, 5  ;;  %v3741_v6 = vshll.u32 %v9296_v1, 16  ;;  %v1095_v3 = vadd.f32 %v5795_v46, %v9298_v19 }
 0x12f   : > { %v8308_v33 = vadd.f32 %v1476_v59, %v1084_v17  ;;  %6035 = vmatmul.mubr.msk.bf16.gmra.mxu0 %vm704_vm3, %v5412_v43  ;;  %v8312_v47 = vrot.slane %v3690_v36, 4  ;;  %v8314_v44 = vrot.slane %v3703_v0, 5  ;;  %v8319_v37 = vsel %vm6559_vm7, %v5400_v34, %v4243_v35  ;;  %v8324_v59 = vld [vmem:[%s6229_s25 + $0x98] sm:$0x1]  ;;  %v9299_v17 = vld [vmem:[#allocation30_spill] sm:$0xff]  ;;  %v1492_v12 = vpop.f32.mrf.mxu0  ;;  %v5798_v35 = vpop.f32.mrf.mxu1 }
 0x130   : > { %6038 = vmatprep.mubr.msk.bf16.mxu0 %vm704_vm3, %v5413_v9  ;;  %v8321_v52 = vrot.slane %v3714_v5, 4  ;;  %v9300_v38 = vshrl.u32 %v9299_v17, 16  ;;  %v9301_v43 = vshll.u32 %v9299_v17, 16  ;;  %v8330_v19 = vadd.f32 %v5829_v41, %v1095_v3  ;;  %v9303_v0 = vld [vmem:[#allocation38_spill] sm:$0xff] }
 0x131   : > { %9297 = vst [vmem:[#allocation13_spill] sm:$0xff] %v8308_v33  ;;  %v1087_v33 = vadd.f32 %v1086_v4, %v9303_v0  ;;  %v8333_v9 = vrot.slane %v3724_v21, 4  ;;  %v8335_v58 = vrot.slane %v3727_v2, 5  ;;  %v3701_v34 = vrot.slane %v3700_v23, 4  ;;  %v9306_v21 = vld [vmem:[#allocation43_spill] sm:$0xff]  ;;  %v5833_v2 = vpop.f32.mrf.mxu0 }
 0x132   : > { %v3734_v46 = vrot.slane %v9300_v38, 4  ;;  %v3737_v36 = vrot.slane %v9301_v43, 5  ;;  %9302 = vst [vmem:[#allocation4_spill] sm:$0xff] %v8330_v19  ;;  %6001 = vmatmul.mubr.msk.bf16.gmra.mxu1 %vm704_vm3, %v8126_v62  ;;  %v8341_v5 = vsel %vm6559_vm7, %v4245_v10, %v4246_v15  ;;  %v8343_v38 = vrot.slane %v3741_v6, 5  ;;  %v1099_v6 = vpop.f32.mrf.mxu1  ;;  %v9307_v10 = vld [vmem:[#allocation20_spill] sm:$0xff]  ;;  %v9309_v23 = vld [vmem:[#allocation19_spill] sm:$0xff] }
 0x133   : > { %v9304_v41 = vshrl.u32 %v9296_v1, 16  ;;  %v8347_v4 = vadd.f32 %v1479_v54, %v1087_v33  ;;  %v1108_v43 = vadd.f32 %v5798_v35, %v9306_v21  ;;  %6004 = vmatprep.mubr.msk.bf16.mxu1 %vm704_vm3, %v8222_v30  ;;  %v3696_v62 = vsel %vm6274_vm4, %v8312_v47, %v8280_v57 }
 0x134   : > { %v3751_v15 = vshll.u32 %v8324_v59, 16  ;;  %v9308_v54 = vrot.slane %v9307_v10, 5  ;;  %v9310_v0 = vrot.slane %v9309_v23, 9  ;;  %v3738_v35 = vor.u32 %v3737_v36, %v3734_v46  ;;  %v5799_v11 = vpop.f32.mrf.mxu1  ;;  %v8387_v36 = vld [vmem:[%s6229_s25 + $0xa4] sm:$0x1]  ;;  %v9317_v10 = vld [vmem:[#allocation23_spill] sm:$0xff] }
 0x135   : > { %v3747_v3 = vrot.slane %v9304_v41, 4  ;;  %9305 = vst [vmem:[#allocation7_spill] sm:$0xff] %v8347_v4  ;;  %v4257_v57 = vrot.slane %v9296_v1, 5  ;;  %v8370_v47 = vadd.f32 %v5832_v51, %v1108_v43  ;;  %v9311_v41 = vld [vmem:[#allocation45_spill] sm:$0xff]  ;;  %v1495_v4 = vpop.f32.mrf.mxu0  ;;  %v5417_v19 = vcombine.low %v8319_v37, %v8341_v5  ;;  %v9313_v5 = vld [vmem:[#allocation51_spill] sm:$0xff] }
 0x136   : > { %v8367_v30 = vsel %vm6559_vm7, %v9310_v0, %v9308_v54  ;;  %v1100_v21 = vadd.f32 %v1099_v6, %v9311_v41  ;;  %v9312_v33 = vmov %v9308_v54  ;;  %v3706_v54 = vsel %vm6274_vm4, %v3701_v34, %v8314_v44  ;;  %v9319_v41 = vld [vmem:[#allocation40_spill] sm:$0xff] }
 0x137   : > { %v4252_v29 = vrot.slane %v9312_v33, 4  ;;  %v3730_v1 = vsel %vm6274_vm4, %v8333_v9, %v8335_v58  ;;  %v4253_v51 = vrot.slane %v8286_v53, 5  ;;  %v3748_v46 = vor.u32 %v3747_v3, %v8343_v38  ;;  %v5836_v6 = vpop.f32.mrf.mxu0  ;;  %v1102_v58 = vpop.f32.mrf.mxu1 }
 0x138   : > { %v8389_v37 = vadd.f32 %v1492_v12, %v1100_v21  ;;  %v1111_v43 = vadd.f32 %v5799_v11, %v9313_v5  ;;  %v9314_v33 = vcombine.low %v8180_v27, %v8208_v13  ;;  %v3753_v44 = vrot.slane %v3751_v15, 5  ;;  %v9316_v11 = vld [vmem:[#allocation39_spill] sm:$0xff] }
 0x139   : > { %v5402_v34 = vrot.slane %v9299_v17, 9  ;;  %v9315_v53 = vcombine.low %v8233_v40, %v8237_v50  ;;  %v3739_v9 = vrot.slane %v3738_v35, 4  ;;  %v4259_v12 = vrot.slane %v4257_v57, 4  ;;  %v9318_v27 = vld [vmem:[#allocation55_spill] sm:$0xff]  ;;  %v1508_v15 = vpop.f32.mrf.mxu0  ;;  %v9320_v17 = vld [vmem:[#allocation41_spill] sm:$0xff]  ;;  %v5802_v40 = vpop.f32.mrf.mxu1 }
 0x13a   : > { %6039 = vmatmul.mubr.msk.bf16.gmra.mxu0 %vm704_vm3, %v9314_v33  ;;  %v4260_v3 = vrot.slane %v8324_v59, 5  ;;  %v3762_v23 = vor.u32 %v9317_v10, %v9316_v11  ;;  %v8404_v0 = vadd.f32 %v5833_v2, %v1111_v43  ;;  %v1103_v13 = vadd.f32 %v1102_v58, %v9318_v27  ;;  %6005 = vmatmul.mubr.msk.bf16.gmra.mxu1 %vm704_vm3, %v8249_v39 }
 0x13b   : > { %6042 = vmatprep.mubr.msk.bf16.mxu0 %vm704_vm3, %v9315_v53  ;;  %v3772_v21 = vor.u32 %v9320_v17, %v9319_v41  ;;  %v3775_v5 = vshll.u32 %v8387_v36, 16  ;;  %v3749_v50 = vrot.slane %v3748_v46, 4  ;;  %v9321_v59 = vshrl.u32 %v7788_v18, 16  ;;  %v5837_v11 = vpop.f32.mrf.mxu0  ;;  %6008 = vmatprep.mubr.msk.bf16.mxu1 %vm704_vm3, %v8291_v55  ;;  %v1115_v46 = vpop.f32.mrf.mxu1 }
 0x13c   : > { %v9322_v33 = vshll.u32 %v7788_v18, 16  ;;  %v3789_v43 = vshll.u32 %v7814_v8, 16  ;;  %v8417_v58 = vadd.f32 %v1495_v4, %v1103_v13  ;;  %v1124_v53 = vadd.f32 %v5802_v40, %v7991_v63 }
 0x13d   : > { %v3782_v35 = vrot.slane %v9321_v59, 4  ;;  %v5368_v10 = vcombine.low %v3696_v62, %v3706_v54  ;;  %v8424_v39 = vsel %vm6559_vm7, %v4252_v29, %v4253_v51  ;;  %v3744_v27 = vsel %vm6274_vm4, %v3739_v9, %v8343_v38  ;;  %v9323_v62 = vld [vmem:[#allocation14_spill] sm:$0xff]  ;;  %v1511_v54 = vpop.f32.mrf.mxu0  ;;  %v5803_v40 = vpop.f32.mrf.mxu1 }
 0x13e   : > { %v3785_v2 = vrot.slane %v9322_v33, 5  ;;  %v8431_v4 = vsel %vm6559_vm7, %v5402_v34, %v4257_v57  ;;  %v8435_v63 = vsel %vm6559_vm7, %v4259_v12, %v4260_v3  ;;  %v3763_v13 = vrot.slane %v3762_v23, 4 }
 0x13f   : > { %v8437_v55 = vadd.f32 %v5836_v6, %v1124_v53  ;;  %v1116_v29 = vadd.f32 %v1115_v46, %v9323_v62  ;;  %v3773_v51 = vrot.slane %v3772_v21, 4  ;;  %v3777_v17 = vrot.slane %v3775_v5, 5  ;;  %v5840_v23 = vpop.f32.mrf.mxu0  ;;  %v9326_v21 = vld [vmem:[#allocation35_spill] sm:$0xff] }
 0x140   : > { %v3754_v38 = vsel %vm6274_vm4, %v3749_v50, %v3753_v44  ;;  %v3786_v9 = vor.u32 %v3785_v2, %v3782_v35  ;;  %v8442_v57 = vrot.slane %v3789_v43, 5  ;;  %v9324_v34 = vshrl.u32 %v7814_v8, 16  ;;  %v5316_v50 = vld [vmem:[%s6229_s25 + $0xb0] sm:$0x1]  ;;  %v1118_v35 = vpop.f32.mrf.mxu1 }
 0x141   : > { %v8446_v3 = vadd.f32 %v1508_v15, %v1116_v29  ;;  %v1127_v6 = vadd.f32 %v5803_v40, %v8071_v22  ;;  %v9325_v59 = vcombine.low %v8270_v16, %v8274_v60  ;;  %v9327_v5 = vrot.slane %v9326_v21, 5  ;;  %v1524_v43 = vpop.f32.mrf.mxu0  ;;  %v9332_v29 = vld [vmem:[#allocation46_spill] sm:$0xff] }
 0x142   : > { %v3795_v12 = vrot.slane %v9324_v34, 4  ;;  %v4267_v44 = vrot.slane %v8387_v36, 5  ;;  %v9328_v22 = vsel %vm6274_vm4, %v8321_v52, %v9294_v24  ;;  %v5418_v16 = vcombine.low %v8367_v30, %v8424_v39  ;;  %v5806_v52 = vpop.f32.mrf.mxu1  ;;  %6009 = vmatmul.mubr.msk.bf16.gmra.mxu1 %vm704_vm3, %v8293_v26 }
 0x143   : > { %6043 = vmatmul.mubr.msk.bf16.gmra.mxu0 %vm704_vm3, %v9325_v59  ;;  %v4266_v33 = vrot.slane %v9327_v5, 4  ;;  %v5369_v15 = vcombine.low %v9328_v22, %v3730_v1  ;;  %v5419_v60 = vcombine.low %v8431_v4, %v8435_v63  ;;  %v3768_v36 = vsel %vm6274_vm4, %v3763_v13, %v9319_v41  ;;  %v5841_v46 = vpop.f32.mrf.mxu0  ;;  %6012 = vmatprep.mubr.msk.bf16.mxu1 %vm704_vm3, %v5368_v10 }
 0x144   : > { %6046 = vmatprep.mubr.msk.bf16.mxu0 %vm704_vm3, %v5417_v19  ;;  %v8470_v2 = vadd.f32 %v5837_v11, %v1127_v6  ;;  %v1119_v19 = vadd.f32 %v1118_v35, %v8118_v48  ;;  %v3778_v53 = vsel %vm6274_vm4, %v3773_v51, %v3777_v17  ;;  %v4271_v24 = vrot.slane %v7814_v8, 5  ;;  %v9330_v8 = vld [vmem:[#allocation24_spill] sm:$0xff]  ;;  %v1131_v13 = vpop.f32.mrf.mxu1 }
 0x145   : > { %v5370_v30 = vcombine.low %v3744_v27, %v3754_v38  ;;  %v8478_v1 = vrot.slane %v3786_v9, 4  ;;  %v3796_v39 = vor.u32 %v3795_v12, %v8442_v57  ;;  %v3799_v41 = vshll.u32 %v5316_v50, 16  ;;  %v1527_v38 = vpop.f32.mrf.mxu0 }
 0x146   : > { %v8481_v11 = vadd.f32 %v1511_v54, %v1119_v19  ;;  %v1140_v48 = vadd.f32 %v5806_v52, %v8148_v45  ;;  %v9329_v4 = vmov %v9327_v5  ;;  %v9331_v63 = vrot.slane %v9330_v8, 9  ;;  %v9333_v54 = vld [vmem:[#allocation47_spill] sm:$0xff]  ;;  %v5807_v12 = vpop.f32.mrf.mxu1  ;;  %v9338_v8 = vld [vmem:[#allocation49_spill] sm:$0xff] }
 0x147   : > { %v8495_v27 = vsel %vm6559_vm7, %v4266_v33, %v4267_v44  ;;  %v8497_v62 = vcombine.low %v3768_v36, %v3778_v53  ;;  %v5404_v45 = vrot.slane %v7788_v18, 9  ;;  %v3810_v10 = vor.u32 %v9333_v54, %v9332_v29  ;;  %v5319_v33 = vld [vmem:[%s6229_s25 + $0xbc] sm:$0x1] }
 0x148   : > { %v8491_v26 = vsel %vm6559_vm7, %v9331_v63, %v9329_v4  ;;  %v3837_v51 = vshll.u32 %v7868_v32, 16  ;;  %v8503_v17 = vadd.f32 %v5840_v23, %v1140_v48  ;;  %v1132_v40 = vadd.f32 %v1131_v13, %v8169_v14  ;;  %v5844_v14 = vpop.f32.mrf.mxu0  ;;  %v1134_v36 = vpop.f32.mrf.mxu1  ;;  %v9337_v4 = vld [vmem:[#allocation48_spill] sm:$0xff] }
 0x149   : > { %v4273_v9 = vrot.slane %v4271_v24, 4  ;;  %v4274_v34 = vrot.slane %v5316_v50, 5  ;;  %v5420_v6 = vcombine.low %v8491_v26, %v8495_v27  ;;  %v3792_v18 = vsel %vm6274_vm4, %v8478_v1, %v8442_v57  ;;  %v9340_v13 = vld [vmem:[#allocation32_spill] sm:$0xff] }
 0x14a   : > { %v3797_v59 = vrot.slane %v3796_v39, 4  ;;  %v3801_v21 = vrot.slane %v3799_v41, 5  ;;  %v8512_v5 = vadd.f32 %v1524_v43, %v1132_v40  ;;  %v1143_v23 = vadd.f32 %v5807_v12, %v8202_v20  ;;  %v1540_v1 = vpop.f32.mrf.mxu0  ;;  %v5322_v41 = vld [vmem:[%s6229_s25 + $0xc8] sm:$0x1]  ;;  %v5810_v48 = vpop.f32.mrf.mxu1  ;;  %6013 = vmatmul.mubr.msk.bf16.gmra.mxu1 %vm704_vm3, %v5369_v15  ;;  %v9341_v12 = vld [vmem:[#allocation36_spill] sm:$0xff] }
 0x14b   : > { %6047 = vmatmul.mubr.msk.bf16.gmra.mxu0 %vm704_vm3, %v5418_v16  ;;  %v9334_v44 = vshrl.u32 %v7865_v28, 16  ;;  %v9335_v35 = vshll.u32 %v7865_v28, 16  ;;  %v4272_v57 = vsel %vm6559_vm7, %v5404_v45, %v4271_v24  ;;  %v8524_v19 = vrot.slane %v3810_v10, 4  ;;  %6016 = vmatprep.mubr.msk.bf16.mxu1 %vm704_vm3, %v5370_v30 }
 0x14c   : > { %6050 = vmatprep.mubr.msk.bf16.mxu0 %vm704_vm3, %v5419_v60  ;;  %v8526_v20 = vrot.slane %v3837_v51, 5  ;;  %v9336_v43 = vshrl.u32 %v7868_v32, 16  ;;  %v8530_v53 = vadd.f32 %v5841_v46, %v1143_v23  ;;  %v1135_v52 = vadd.f32 %v1134_v36, %v8213_v61  ;;  %v5845_v29 = vpop.f32.mrf.mxu0  ;;  %v1147_v15 = vpop.f32.mrf.mxu1 }
 0x14d   : > { %v3830_v50 = vrot.slane %v9334_v44, 4  ;;  %v3833_v22 = vrot.slane %v9335_v35, 5  ;;  %v4275_v39 = vsel %vm6559_vm7, %v4273_v9, %v4274_v34  ;;  %v4285_v60 = vrot.slane %v7868_v32, 5 }
 0x14e   : > { %v3843_v16 = vrot.slane %v9336_v43, 4  ;;  %v3802_v24 = vsel %vm6274_vm4, %v3797_v59, %v3801_v21  ;;  %v3820_v63 = vor.u32 %v9338_v8, %v9337_v4  ;;  %v3823_v46 = vshll.u32 %v5319_v33, 16  ;;  %v5811_v44 = vpop.f32.mrf.mxu1 }
 0x14f   : > { %v9339_v26 = vrot.slane %v7817_v25, 5  ;;  %v8544_v27 = vadd.f32 %v1527_v38, %v1135_v52  ;;  %v1156_v45 = vadd.f32 %v5810_v48, %v9340_v13  ;;  %v4281_v32 = vrot.slane %v5319_v33, 5  ;;  %v1543_v38 = vpop.f32.mrf.mxu0 }
 0x150   : > { %v3834_v54 = vor.u32 %v3833_v22, %v3830_v50  ;;  %v5421_v10 = vcombine.low %v4272_v57, %v4275_v39  ;;  %v3844_v51 = vor.u32 %v3843_v16, %v8526_v20  ;;  %v3847_v40 = vshll.u32 %v5322_v41, 16  ;;  %v1150_v39 = vpop.f32.mrf.mxu1 }
 0x151   : > { %v4280_v61 = vrot.slane %v9339_v26, 4  ;;  %v5406_v9 = vrot.slane %v7865_v28, 9  ;;  %v8550_v34 = vadd.f32 %v5844_v14, %v1156_v45  ;;  %v1148_v59 = vadd.f32 %v1147_v15, %v9341_v12  ;;  %v9344_v14 = vld [vmem:[#allocation22_spill] sm:$0xff]  ;;  %v5848_v43 = vpop.f32.mrf.mxu0  ;;  %v9348_v45 = vld [vmem:[#allocation56_spill] sm:$0xff] }
 0x152   : > { %v4287_v21 = vrot.slane %v4285_v60, 4  ;;  %v4288_v23 = vrot.slane %v5322_v41, 5  ;;  %v5372_v35 = vcombine.low %v3792_v18, %v3802_v24  ;;  %v3821_v30 = vrot.slane %v3820_v63, 4  ;;  %v5325_v41 = vld [vmem:[%s6229_s25 + $0xd4] sm:$0x1]  ;;  %6017 = vmatmul.mubr.msk.bf16.gmra.mxu1 %vm704_vm3, %v8497_v62 }
 0x153   : > { %v3825_v33 = vrot.slane %v3823_v46, 5  ;;  %v9342_v50 = vmov %v9339_v26  ;;  %v9343_v22 = vrot.slane %v7805_v49, 9  ;;  %v8559_v28 = vadd.f32 %v1540_v1, %v1148_v59  ;;  %6051 = vmatmul.mubr.msk.bf16.gmra.mxu0 %vm704_vm3, %v5420_v6  ;;  %v9345_v6 = vld [vmem:[#allocation42_spill] sm:$0xff]  ;;  %v1556_v8 = vpop.f32.mrf.mxu0  ;;  %v5814_v46 = vpop.f32.mrf.mxu1  ;;  %v9346_v26 = vld [vmem:[#allocation52_spill] sm:$0xff] }
 0x154   : > { %v1159_v57 = vadd.f32 %v5811_v44, %v9344_v14  ;;  %v4282_v18 = vsel %vm6559_vm7, %v4280_v61, %v4281_v32  ;;  %v3835_v16 = vrot.slane %v3834_v54, 4  ;;  %v4292_v52 = vrot.slane %v7897_v7, 5  ;;  %6054 = vmatprep.mubr.msk.bf16.mxu0 %vm704_vm3, %v5421_v10  ;;  %v9347_v61 = vld [vmem:[#allocation54_spill] sm:$0xff]  ;;  %6020 = vmatprep.mubr.msk.bf16.mxu1 %vm704_vm3, %v5372_v35 }
 0x155   : > { %v4279_v36 = vsel %vm6559_vm7, %v9343_v22, %v9342_v50  ;;  %v3816_v49 = vsel %vm6274_vm4, %v8524_v19, %v9337_v4  ;;  %v3845_v25 = vrot.slane %v3844_v51, 4  ;;  %v3849_v1 = vrot.slane %v3847_v40, 5  ;;  %v5849_v10 = vpop.f32.mrf.mxu0  ;;  %v1163_v40 = vpop.f32.mrf.mxu1 }
 0x156   : > { %v8572_v48 = vadd.f32 %v5845_v29, %v1159_v57  ;;  %v1151_v24 = vadd.f32 %v1150_v39, %v9345_v6  ;;  %v4286_v63 = vsel %vm6559_vm7, %v5406_v9, %v4285_v60  ;;  %v4289_v7 = vsel %vm6559_vm7, %v4287_v21, %v4288_v23  ;;  %v9349_v29 = vld [vmem:[#allocation58_spill] sm:$0xff]  ;;  %v9350_v60 = vld [vmem:[#allocation44_spill] sm:$0xff] }
 0x157   : > { %v3826_v19 = vsel %vm6274_vm4, %v3821_v30, %v3825_v33  ;;  %v5422_v4 = vcombine.low %v4279_v36, %v4282_v18  ;;  %v3858_v13 = vor.u32 %v9347_v61, %v9346_v26  ;;  %v3868_v32 = vor.u32 %v9349_v29, %v9348_v45  ;;  %v1559_v30 = vpop.f32.mrf.mxu0  ;;  %v5815_v33 = vpop.f32.mrf.mxu1  ;;  %v9356_v61 = vld [vmem:[#allocation6_spill] sm:$0xff] }
 0x158   : > { %v8587_v54 = vadd.f32 %v1543_v38, %v1151_v24  ;;  %v1172_v15 = vadd.f32 %v5814_v46, %v9350_v60  ;;  %v3840_v62 = vsel %vm6274_vm4, %v3835_v16, %v8526_v20  ;;  %v3871_v51 = vshll.u32 %v5325_v41, 16  ;;  %v9351_v38 = vld [vmem:[#allocation50_spill] sm:$0xff]  ;;  %v9352_v20 = vld [vmem:[#allocation53_spill] sm:$0xff] }
 0x159   : > { %v3850_v9 = vsel %vm6274_vm4, %v3845_v25, %v3849_v1  ;;  %v5423_v12 = vcombine.low %v4286_v63, %v4289_v7  ;;  %v4294_v59 = vrot.slane %v4292_v52, 4  ;;  %v4295_v21 = vrot.slane %v5325_v41, 5  ;;  %v5852_v57 = vpop.f32.mrf.mxu0  ;;  %v1166_v39 = vpop.f32.mrf.mxu1  ;;  %v9354_v41 = vld [vmem:[#allocation57_spill] sm:$0xff] }
 0x15a   : > { %v8596_v23 = vadd.f32 %v5848_v43, %v1172_v15  ;;  %v1164_v44 = vadd.f32 %v1163_v40, %v9351_v38  ;;  %v5373_v50 = vcombine.low %v3816_v49, %v3826_v19  ;;  %v3859_v35 = vrot.slane %v3858_v13, 4  ;;  %v9357_v15 = vld [vmem:[#allocation11_spill] sm:$0xff]  ;;  %v9359_v38 = vld [vmem:[#allocation25_spill] sm:$0xff] }
 0x15b   : > { %v3869_v22 = vrot.slane %v3868_v32, 4  ;;  %v1175_v14 = vadd.f32 %v5815_v33, %v9352_v20  ;;  %6055 = vmatmul.mubr.msk.bf16.gmra.mxu0 %vm704_vm3, %v5422_v4  ;;  %v5374_v18 = vcombine.low %v3840_v62, %v3850_v9  ;;  %v3873_v16 = vrot.slane %v3871_v51, 5  ;;  %v1572_v24 = vpop.f32.mrf.mxu0 }
 0x15c   : > { %v8599_v36 = vadd.f32 %v1556_v8, %v1164_v44  ;;  %6058 = vmatprep.mubr.msk.bf16.mxu0 %vm704_vm3, %v5423_v12  ;;  %v9353_v43 = vrot.slane %v7885_v42, 9  ;;  %v4296_v49 = vsel %vm6559_vm7, %v4294_v59, %v4295_v21  ;;  %v1167_v6 = vadd.f32 %v1166_v39, %v9354_v41  ;;  %v5818_v8 = vpop.f32.mrf.mxu1  ;;  %6021 = vmatmul.mubr.msk.bf16.gmra.mxu1 %vm704_vm3, %v5373_v50  ;;  %v9355_v42 = vld [vmem:[#allocation8_spill] sm:$0xff] }
 0x15d   : > { %v8610_v1 = vadd.f32 %v5849_v10, %v1175_v14  ;;  %v3864_v63 = vsel %vm6274_vm4, %v3859_v35, %v9348_v45  ;;  %v1188_v46 = vadd.f32 %v5818_v8, %v9355_v42  ;;  %6024 = vmatprep.mubr.msk.bf16.mxu1 %vm704_vm3, %v5374_v18  ;;  %v3874_v31 = vsel %vm6274_vm4, %v3869_v22, %v3873_v16  ;;  %v9360_v35 = vld [vmem:[#allocation2_spill] sm:$0xff]  ;;  %v9361_v18 = vld [vmem:[#allocation9_spill] sm:$0xff] }
 0x15e   : > { %v4293_v25 = vsel %vm6559_vm7, %v9353_v43, %v4292_v52  ;;  %v8617_v7 = vadd.f32 %v1559_v30, %v1167_v6  ;;  %v5853_v52 = vpop.f32.mrf.mxu0  ;;  %v1179_v4 = vpop.f32.mrf.mxu1  ;;  %v5375_v60 = vcombine.low %v3864_v63, %v3874_v31  ;;  %v9363_v63 = vld [vmem:[#allocation10_spill] sm:$0xff] }
 0x15f   : > { %v5424_v19 = vcombine.low %v4293_v25, %v4296_v49  ;;  %v8623_v26 = vadd.f32 %v5852_v57, %v1188_v46  ;;  %v1180_v13 = vadd.f32 %v1179_v4, %v9356_v61  ;;  %v9362_v49 = vld [vmem:[#allocation12_spill] sm:$0xff] }
 0x160   : > { %v1575_v29 = vpop.f32.mrf.mxu0  ;;  %v5819_v32 = vpop.f32.mrf.mxu1 }
 0x161   : > { %v8626_v45 = vadd.f32 %v1572_v24, %v1180_v13  ;;  %v1191_v10 = vadd.f32 %v5819_v32, %v9357_v15  ;;  %v9365_v32 = vld [vmem:[#allocation4_spill] sm:$0xff] }
 0x162   : > { %v5856_v62 = vpop.f32.mrf.mxu0  ;;  %v1182_v51 = vpop.f32.mrf.mxu1 }
 0x163   : > { %6059 = vmatmul.mubr.msk.bf16.gmra.mxu0 %vm704_vm3, %v5424_v19  ;;  %v8630_v40 = vadd.f32 %v5853_v52, %v1191_v10  ;;  %v1183_v9 = vadd.f32 %v1182_v51, %v9358_v56  ;;  %v9364_v19 = vld [vmem:[#allocation13_spill] sm:$0xff]  ;;  %v9366_v51 = vld [vmem:[#allocation7_spill] sm:$0xff] }
 0x164   : > { %v1588_v12 = vpop.f32.mrf.mxu0  ;;  %v5822_v59 = vpop.f32.mrf.mxu1  ;;  %6025 = vmatmul.mubr.msk.bf16.gmra.mxu1 %vm704_vm3, %v5375_v60 }
 0x165   : > { %v8634_v21 = vadd.f32 %v1575_v29, %v1183_v9  ;;  %v1204_v44 = vadd.f32 %v5822_v59, %v9359_v38 }
 0x166   : > { %v5857_v30 = vpop.f32.mrf.mxu0  ;;  %v1195_v33 = vpop.f32.mrf.mxu1 }
 0x167   : > { %v8637_v50 = vadd.f32 %v5856_v62, %v1204_v44  ;;  %v1196_v22 = vadd.f32 %v1195_v33, %v9360_v35 }
 0x168   : > { %v1591_v20 = vpop.f32.mrf.mxu0  ;;  %v5823_v14 = vpop.f32.mrf.mxu1 }
 0x169   : > { %v8640_v57 = vadd.f32 %v1588_v12, %v1196_v22  ;;  %v1207_v16 = vadd.f32 %v5823_v14, %v9361_v18 }
 0x16a   : > { %v5896_v39 = vpop.f32.mrf.mxu0  ;;  %v1198_v43 = vpop.f32.mrf.mxu1 }
 0x16b   : > { %v8643_v25 = vadd.f32 %v5857_v30, %v1207_v16  ;;  %v1199_v41 = vadd.f32 %v1198_v43, %v9362_v49 }
 0x16c   : > { %v2532_v6 = vpop.f32.mrf.mxu0  ;;  %v5862_v24 = vpop.f32.mrf.mxu1 }
 0x16d   : > { %v8646_v8 = vadd.f32 %v1591_v20, %v1199_v41  ;;  %v1983_v42 = vadd.f32 %v5862_v24, %v9363_v63 }
 0x16e   : > { %v5897_v46 = vpop.f32.mrf.mxu0  ;;  %v1854_v52 = vpop.f32.mrf.mxu1 }
 0x16f   : > { %v8649_v31 = vadd.f32 %v5896_v39, %v1983_v42  ;;  %v1981_v4 = vadd.f32 %v1854_v52, %v9364_v19 }
 0x170   : > { %v2535_v61 = vpop.f32.mrf.mxu0  ;;  %v5863_v13 = vpop.f32.mrf.mxu1 }
 0x171   : > { %v8652_v29 = vadd.f32 %v2532_v6, %v1981_v4  ;;  %v1984_v60 = vadd.f32 %v5863_v13, %v9365_v32 }
 0x172   : > { %v5900_v15 = vpop.f32.mrf.mxu0  ;;  %v1857_v10 = vpop.f32.mrf.mxu1 }
 0x173   : > { %v8655_v62 = vadd.f32 %v5897_v46, %v1984_v60  ;;  %v1982_v56 = vadd.f32 %v1857_v10, %v9366_v51 }
 0x174   : > { %v2548_v9 = vpop.f32.mrf.mxu0  ;;  %v5866_v12 = vpop.f32.mrf.mxu1 }
 0x175   : > { %v8658_v59 = vadd.f32 %v2535_v61, %v1982_v56  ;;  %v1987_v38 = vadd.f32 %v5866_v12, %v8370_v47 }
 0x176   : > { %v5901_v44 = vpop.f32.mrf.mxu0  ;;  %v1870_v30 = vpop.f32.mrf.mxu1 }
 0x177   : > { %v8661_v33 = vadd.f32 %v5900_v15, %v1987_v38  ;;  %v1985_v35 = vadd.f32 %v1870_v30, %v8389_v37 }
 0x178   : > { %v2551_v22 = vpop.f32.mrf.mxu0  ;;  %v5867_v20 = vpop.f32.mrf.mxu1 }
 0x179   : > { %v8664_v14 = vadd.f32 %v2548_v9, %v1985_v35  ;;  %v1988_v18 = vadd.f32 %v5867_v20, %v8404_v0 }
 0x17a   : > { %v5904_v16 = vpop.f32.mrf.mxu0  ;;  %v1873_v39 = vpop.f32.mrf.mxu1 }
 0x17b   : > { %v8667_v43 = vadd.f32 %v5901_v44, %v1988_v18  ;;  %v1986_v49 = vadd.f32 %v1873_v39, %v8417_v58 }
 0x17c   : > { %v2564_v41 = vpop.f32.mrf.mxu0  ;;  %v5870_v47 = vpop.f32.mrf.mxu1 }
 0x17d   : > { %v8670_v6 = vadd.f32 %v2551_v22, %v1986_v49  ;;  %v1991_v24 = vadd.f32 %v5870_v47, %v8437_v55 }
 0x17e   : > { %v5905_v63 = vpop.f32.mrf.mxu0  ;;  %v1886_v37 = vpop.f32.mrf.mxu1 }
 0x17f   : > { %v8673_v42 = vadd.f32 %v5904_v16, %v1991_v24  ;;  %v1989_v46 = vadd.f32 %v1886_v37, %v8446_v3 }
 0x180   : > { %v2567_v52 = vpop.f32.mrf.mxu0  ;;  %v5871_v0 = vpop.f32.mrf.mxu1 }
 0x181   : > { %v8676_v19 = vadd.f32 %v2564_v41, %v1989_v46  ;;  %v1992_v4 = vadd.f32 %v5871_v0, %v8470_v2 }
 0x182   : > { %v5908_v61 = vpop.f32.mrf.mxu0  ;;  %v1889_v58 = vpop.f32.mrf.mxu1 }
 0x183   : > { %v8679_v13 = vadd.f32 %v5905_v63, %v1992_v4  ;;  %v1990_v32 = vadd.f32 %v1889_v58, %v8481_v11 }
 0x184   : > { %v2580_v60 = vpop.f32.mrf.mxu0  ;;  %v5874_v55 = vpop.f32.mrf.mxu1 }
 0x185   : > { %v8682_v15 = vadd.f32 %v2567_v52, %v1990_v32  ;;  %v1995_v10 = vadd.f32 %v5874_v55, %v8503_v17 }
 0x186   : > { %v5909_v51 = vpop.f32.mrf.mxu0  ;;  %v1902_v3 = vpop.f32.mrf.mxu1 }
 0x187   : > { %v8685_v56 = vadd.f32 %v5908_v61, %v1995_v10  ;;  %v1993_v9 = vadd.f32 %v1902_v3, %v8512_v5 }
 0x188   : > { %v2583_v12 = vpop.f32.mrf.mxu0  ;;  %v5875_v2 = vpop.f32.mrf.mxu1 }
 0x189   : > { %v8688_v38 = vadd.f32 %v2580_v60, %v1993_v9  ;;  %v1996_v44 = vadd.f32 %v5875_v2, %v8530_v53 }
 0x18a   : > { %v5912_v30 = vpop.f32.mrf.mxu0  ;;  %v1905_v11 = vpop.f32.mrf.mxu1 }
 0x18b   : > { %v8691_v35 = vadd.f32 %v5909_v51, %v1996_v44  ;;  %v1994_v22 = vadd.f32 %v1905_v11, %v8544_v27 }
 0x18c   : > { %v2596_v20 = vpop.f32.mrf.mxu0  ;;  %v5878_v17 = vpop.f32.mrf.mxu1 }
 0x18d   : > { %v8694_v18 = vadd.f32 %v2583_v12, %v1994_v22  ;;  %v1999_v16 = vadd.f32 %v5878_v17, %v8550_v34 }
 0x18e   : > { %v5913_v39 = vpop.f32.mrf.mxu0  ;;  %v1918_v5 = vpop.f32.mrf.mxu1 }
 0x18f   : > { %v8697_v49 = vadd.f32 %v5912_v30, %v1999_v16  ;;  %v1997_v41 = vadd.f32 %v1918_v5, %v8559_v28 }
 0x190   : > { %v2599_v47 = vpop.f32.mrf.mxu0  ;;  %v5879_v53 = vpop.f32.mrf.mxu1 }
 0x191   : > { %v8700_v24 = vadd.f32 %v2596_v20, %v1997_v41  ;;  %v2000_v63 = vadd.f32 %v5879_v53, %v8572_v48 }
 0x192   : > { %v5916_v37 = vpop.f32.mrf.mxu0  ;;  %v1921_v27 = vpop.f32.mrf.mxu1 }
 0x193   : > { %v8703_v46 = vadd.f32 %v5913_v39, %v2000_v63  ;;  %v1998_v52 = vadd.f32 %v1921_v27, %v8587_v54 }
 0x194   : > { %v2612_v0 = vpop.f32.mrf.mxu0  ;;  %v5882_v34 = vpop.f32.mrf.mxu1 }
 0x195   : > { %v8706_v4 = vadd.f32 %v2599_v47, %v1998_v52  ;;  %v2003_v61 = vadd.f32 %v5882_v34, %v8596_v23 }
 0x196   : > { %v5917_v58 = vpop.f32.mrf.mxu0  ;;  %v1934_v28 = vpop.f32.mrf.mxu1 }
 0x197   : > { %v8709_v32 = vadd.f32 %v5916_v37, %v2003_v61  ;;  %v2001_v60 = vadd.f32 %v1934_v28, %v8599_v36 }
 0x198   : > { %v2615_v55 = vpop.f32.mrf.mxu0  ;;  %v5883_v48 = vpop.f32.mrf.mxu1 }
 0x199   : > { %v8712_v10 = vadd.f32 %v2612_v0, %v2001_v60  ;;  %v2004_v51 = vadd.f32 %v5883_v48, %v8610_v1 }
 0x19a   : > { %v5920_v3 = vpop.f32.mrf.mxu0  ;;  %v1937_v54 = vpop.f32.mrf.mxu1 }
 0x19b   : > { %9367 = vst [vmem:[#allocation5_spill] sm:$0xff] %v8712_v10  ;;  %v8715_v9 = vadd.f32 %v5917_v58, %v2004_v51  ;;  %v2002_v12 = vadd.f32 %v1937_v54, %v8617_v7 }
 0x19c   : > { %v2628_v2 = vpop.f32.mrf.mxu0  ;;  %v5886_v23 = vpop.f32.mrf.mxu1 }
 0x19d   : > { %9368 = vst [vmem:[#allocation15_spill] sm:$0xff] %v8715_v9  ;;  %v8718_v44 = vadd.f32 %v2615_v55, %v2002_v12  ;;  %v2007_v30 = vadd.f32 %v5886_v23, %v8623_v26 }
 0x19e   : > { %v5921_v11 = vpop.f32.mrf.mxu0  ;;  %v1950_v36 = vpop.f32.mrf.mxu1 }
 0x19f   : > { %9369 = vst [vmem:[#allocation26_spill] sm:$0xff] %v8718_v44  ;;  %v8721_v22 = vadd.f32 %v5920_v3, %v2007_v30  ;;  %v2005_v20 = vadd.f32 %v1950_v36, %v8626_v45 }
 0x1a0   : > { %v2631_v17 = vpop.f32.mrf.mxu0  ;;  %v5887_v1 = vpop.f32.mrf.mxu1 }
 0x1a1   : > { %v8724_v16 = vadd.f32 %v2628_v2, %v2005_v20  ;;  %v2008_v39 = vadd.f32 %v5887_v1, %v8630_v40 }
 0x1a2   : > { %v5924_v5 = vpop.f32.mrf.mxu0  ;;  %v1953_v7 = vpop.f32.mrf.mxu1 }
 0x1a3   : > { %9370 = vst [vmem:[#allocation18_spill] sm:$0xff] %v8724_v16  ;;  %v8727_v41 = vadd.f32 %v5921_v11, %v2008_v39  ;;  %v2006_v47 = vadd.f32 %v1953_v7, %v8634_v21 }
 0x1a4   : > { %v2644_v53 = vpop.f32.mrf.mxu0  ;;  %v5890_v26 = vpop.f32.mrf.mxu1 }
 0x1a5   : > { %9371 = vst [vmem:[#allocation16_spill] sm:$0xff] %v8727_v41  ;;  %v8730_v63 = vadd.f32 %v2631_v17, %v2006_v47  ;;  %v2011_v37 = vadd.f32 %v5890_v26, %v8637_v50 }
 0x1a6   : > { %v5925_v27 = vpop.f32.mrf.mxu0  ;;  %v1966_v45 = vpop.f32.mrf.mxu1 }
 0x1a7   : > { %9372 = vst [vmem:[#allocation17_spill] sm:$0xff] %v8730_v63  ;;  %v8733_v52 = vadd.f32 %v5924_v5, %v2011_v37  ;;  %v2009_v0 = vadd.f32 %v1966_v45, %v8640_v57 }
 0x1a8   : > { %v2647_v34 = vpop.f32.mrf.mxu0  ;;  %v5891_v40 = vpop.f32.mrf.mxu1 }
 0x1a9   : > { %v8736_v61 = vadd.f32 %v2644_v53, %v2009_v0  ;;  %v2012_v58 = vadd.f32 %v5891_v40, %v8643_v25 }
 0x1aa   : > { %v5964_v28 = vpop.f32.mrf.mxu0  ;;  %v1969_v21 = vpop.f32.mrf.mxu1 }
 0x1ab   : > { %9373 = vst [vmem:[#allocation27_spill] sm:$0xff] %v8736_v61  ;;  %v8739_v60 = vadd.f32 %v5925_v27, %v2012_v58  ;;  %v2010_v55 = vadd.f32 %v1969_v21, %v8646_v8 }
 0x1ac   : > { %v3332_v48 = vpop.f32.mrf.mxu0  ;;  %v5930_v50 = vpop.f32.mrf.mxu1 }
 0x1ad   : > { %9374 = vst [vmem:[#allocation28_spill] sm:$0xff] %v8739_v60  ;;  %v8742_v51 = vadd.f32 %v2647_v34, %v2010_v55  ;;  %v3083_v3 = vadd.f32 %v5930_v50, %v8649_v31 }
 0x1ae   : > { %v8745_v54 = vpop.f32.mrf.mxu0  ;;  %v2954_v57 = vpop.f32.mrf.mxu1 }
 0x1af   : > { %9375 = vst [vmem:[#allocation29_spill] sm:$0xff] %v8742_v51  ;;  %v8747_v12 = vadd.f32 %v5964_v28, %v3083_v3  ;;  %v3081_v2 = vadd.f32 %v2954_v57, %v8652_v29 }
 0x1b0   : > { %v8750_v25 = vpop.f32.mrf.mxu0  ;;  %v8752_v23 = vpop.f32.mrf.mxu1 }
 0x1b1   : > { %v8754_v30 = vadd.f32 %v3332_v48, %v3081_v2 }
 0x1b2   : > { %v5968_v8 = vpop.f32.mrf.mxu0  ;;  %v8756_v11 = vpop.f32.mrf.mxu1 }
 0x1b4   : > { %v8758_v36 = vpop.f32.mrf.mxu0  ;;  %v5934_v20 = vpop.f32.mrf.mxu1 }
 0x1b5   : > { %v3087_v31 = vadd.f32 %v5934_v20, %v8661_v33 }
 0x1b6   : > { %v8761_v17 = vpop.f32.mrf.mxu0  ;;  %v8763_v1 = vpop.f32.mrf.mxu1 }
 0x1b7   : > { %v8765_v39 = vadd.f32 %v5968_v8, %v3087_v31 }
 0x1b8   : > { %v8767_v29 = vpop.f32.mrf.mxu0  ;;  %v8769_v5 = vpop.f32.mrf.mxu1 }
 0x1ba   : > { %v5972_v7 = vpop.f32.mrf.mxu0  ;;  %v8771_v47 = vpop.f32.mrf.mxu1 }
 0x1bc   : > { %v8773_v53 = vpop.f32.mrf.mxu0  ;;  %v5938_v26 = vpop.f32.mrf.mxu1 }
 0x1bd   : > { %v3091_v37 = vadd.f32 %v5938_v26, %v8673_v42 }
 0x1be   : > { %v8776_v27 = vpop.f32.mrf.mxu0  ;;  %v8778_v33 = vpop.f32.mrf.mxu1 }
 0x1bf   : > { %v8780_v45 = vadd.f32 %v5972_v7, %v3091_v37 }
 0x1c0   : > { %v8782_v0 = vpop.f32.mrf.mxu0  ;;  %v8784_v34 = vpop.f32.mrf.mxu1 }
 0x1c2   : > { %v5976_v40 = vpop.f32.mrf.mxu0  ;;  %v8786_v58 = vpop.f32.mrf.mxu1 }
 0x1c4   : > { %v8788_v28 = vpop.f32.mrf.mxu0  ;;  %v5942_v21 = vpop.f32.mrf.mxu1 }
 0x1c5   : > { %v3095_v55 = vadd.f32 %v5942_v21, %v8685_v56 }
 0x1c6   : > { %v8791_v48 = vpop.f32.mrf.mxu0  ;;  %v8793_v42 = vpop.f32.mrf.mxu1 }
 0x1c7   : > { %v8795_v50 = vadd.f32 %v5976_v40, %v3095_v55 }
 0x1c8   : > { %v8797_v3 = vpop.f32.mrf.mxu0  ;;  %v8799_v57 = vpop.f32.mrf.mxu1 }
 0x1ca   : > { %v5980_v2 = vpop.f32.mrf.mxu0  ;;  %v8801_v8 = vpop.f32.mrf.mxu1 }
 0x1cc   : > { %v8803_v20 = vpop.f32.mrf.mxu0  ;;  %v5946_v31 = vpop.f32.mrf.mxu1 }
 0x1cd   : > { %v3099_v7 = vadd.f32 %v5946_v31, %v8697_v49 }
 0x1ce   : > { %v8806_v26 = vpop.f32.mrf.mxu0  ;;  %v8808_v56 = vpop.f32.mrf.mxu1 }
 0x1cf   : > { %v8810_v37 = vadd.f32 %v5980_v2, %v3099_v7 }
 0x1d0   : > { %v8812_v40 = vpop.f32.mrf.mxu0  ;;  %v8814_v21 = vpop.f32.mrf.mxu1 }
 0x1d1   : > { %9376 = vst [vmem:[#allocation34_spill] sm:$0xff] %v8812_v40 }
 0x1d2   : > { %v5984_v55 = vpop.f32.mrf.mxu0  ;;  %v8816_v51 = vpop.f32.mrf.mxu1 }
 0x1d4   : > { %v8818_v60 = vpop.f32.mrf.mxu0  ;;  %v5950_v61 = vpop.f32.mrf.mxu1 }
 0x1d5   : > { %9377 = vst [vmem:[#allocation21_spill] sm:$0xff] %v8818_v60  ;;  %v3103_v63 = vadd.f32 %v5950_v61, %v8709_v32 }
 0x1d6   : > { %v8821_v41 = vpop.f32.mrf.mxu0  ;;  %v8823_v49 = vpop.f32.mrf.mxu1 }
 0x1d7   : > { %9378 = vst [vmem:[#allocation33_spill] sm:$0xff] %v8821_v41  ;;  %v8825_v31 = vadd.f32 %v5984_v55, %v3103_v63 }
 0x1d8   : > { %v8827_v2 = vpop.f32.mrf.mxu0  ;;  %v8829_v7 = vpop.f32.mrf.mxu1 }
 0x1d9   : > { %9379 = vst [vmem:[#allocation31_spill] sm:$0xff] %v8825_v31  ;;  %9380 = vst [vmem:[#allocation37_spill] sm:$0xff] %v8827_v2 }
 0x1da   : > { %9381 = vst [vmem:[#allocation30_spill] sm:$0xff] %v8829_v7  ;;  %v5988_v16 = vpop.f32.mrf.mxu0  ;;  %v8831_v44 = vpop.f32.mrf.mxu1 }
 0x1db   : > { %9382 = vst [vmem:[#allocation38_spill] sm:$0xff] %v8831_v44 }
 0x1dc   : > { %v8833_v9 = vpop.f32.mrf.mxu0  ;;  %v5954_v10 = vpop.f32.mrf.mxu1 }
 0x1dd   : > { %9383 = vst [vmem:[#allocation43_spill] sm:$0xff] %v8833_v9  ;;  %v3107_v60 = vadd.f32 %v5954_v10, %v8721_v22 }
 0x1de   : > { %v8836_v40 = vpop.f32.mrf.mxu0  ;;  %v8838_v32 = vpop.f32.mrf.mxu1 }
 0x1df   : > { %9384 = vst [vmem:[#allocation20_spill] sm:$0xff] %v8836_v40  ;;  %v8840_v61 = vadd.f32 %v5988_v16, %v3107_v60 }
 0x1e0   : > { %v8842_v63 = vpop.f32.mrf.mxu0  ;;  %v8844_v55 = vpop.f32.mrf.mxu1 }
 0x1e1   : > { %9385 = vst [vmem:[#allocation19_spill] sm:$0xff] %v8840_v61  ;;  %9386 = vst [vmem:[#allocation45_spill] sm:$0xff] %v8842_v63 }
 0x1e2   : > { %9387 = vst [vmem:[#allocation51_spill] sm:$0xff] %v8844_v55  ;;  %v5992_v2 = vpop.f32.mrf.mxu0  ;;  %v8846_v31 = vpop.f32.mrf.mxu1 }
 0x1e3   : > { %9388 = vst [vmem:[#allocation39_spill] sm:$0xff] %v8846_v31 }
 0x1e4   : > { %v8848_v41 = vpop.f32.mrf.mxu0  ;;  %v5958_v44 = vpop.f32.mrf.mxu1 }
 0x1e5   : > { %9389 = vst [vmem:[#allocation23_spill] sm:$0xff] %v8848_v41  ;;  %v3111_v9 = vadd.f32 %v5958_v44, %v8733_v52  ;;  %v3084_v41 = vadd.f32 %v8752_v23, %v8655_v62  ;;  %v3082_v44 = vadd.f32 %v8756_v11, %v8658_v59  ;;  %v3085_v23 = vadd.f32 %v8763_v1, %v8664_v14 }
 0x1e6   : > { %v8851_v7 = vpop.f32.mrf.mxu0  ;;  %v8853_v10 = vpop.f32.mrf.mxu1  ;;  %v3088_v59 = vadd.f32 %v8769_v5, %v8667_v43 }
 0x1e7   : > { %9390 = vst [vmem:[#allocation55_spill] sm:$0xff] %v8851_v7  ;;  %9391 = vst [vmem:[#allocation40_spill] sm:$0xff] %v8853_v10  ;;  %v8855_v22 = vadd.f32 %v5992_v2, %v3111_v9  ;;  %v3462_v9 = vadd.f32 %v8745_v54, %v3084_v41  ;;  %v3463_v43 = vadd.f32 %v8758_v36, %v3085_v23 }
 0x1e8   : > { %v8857_v16 = vpop.f32.mrf.mxu0  ;;  %v8859_v60 = vpop.f32.mrf.mxu1  ;;  %v3466_v5 = vadd.f32 %v8761_v17, %v3088_v59  ;;  %v3092_v23 = vadd.f32 %v8784_v34, %v8679_v13 }
 0x1e9   : > { %9392 = vst [vmem:[#allocation41_spill] sm:$0xff] %v8855_v22  ;;  %9393 = vst [vmem:[#allocation14_spill] sm:$0xff] %v8857_v16 }
 0x1ea   : > { %9394 = vst [vmem:[#allocation35_spill] sm:$0xff] %v8859_v60  ;;  %v6032_v63 = vpop.f32.mrf.mxu0  ;;  %v8861_v61 = vpop.f32.mrf.mxu1 }
 0x1eb   : > { %9395 = vst [vmem:[#allocation24_spill] sm:$0xff] %v8861_v61  ;;  %v3460_v61 = vadd.f32 %v8750_v25, %v3082_v44 }
 0x1ec   : > { %v4432_v40 = vpop.f32.mrf.mxu0  ;;  %v5998_v31 = vpop.f32.mrf.mxu1 }
 0x1ed   : > { %v4139_v2 = vadd.f32 %v5998_v31, %v8747_v12 }
 0x1ee   : > { %v6033_v52 = vpop.f32.mrf.mxu0  ;;  %v4010_v7 = vpop.f32.mrf.mxu1 }
 0x1ef   : > { %v4137_v16 = vadd.f32 %v4010_v7, %v8754_v30  ;;  %v4561_v55 = vadd.f32 %v6032_v63, %v4139_v2  ;;  %v3086_v30 = vadd.f32 %v8771_v47, %v8670_v6 }
 0x1f0   : > { %v4435_v22 = vpop.f32.mrf.mxu0  ;;  %v5999_v60 = vpop.f32.mrf.mxu1 }
 0x1f1   : > { %v4140_v10 = vadd.f32 %v5999_v60, %v3462_v9  ;;  %v4559_v41 = vadd.f32 %v4432_v40, %v4137_v16  ;;  %v3464_v60 = vadd.f32 %v8767_v29, %v3086_v30  ;;  %v4630_v36 = vmul.f32 %v4561_v55, %v4561_v55 }
 0x1f2   : > { %v6036_v62 = vpop.f32.mrf.mxu0  ;;  %v4013_v11 = vpop.f32.mrf.mxu1 }
 0x1f3   : > { %v4562_v54 = vadd.f32 %v6033_v52, %v4140_v10  ;;  %v4138_v12 = vadd.f32 %v4013_v11, %v3460_v61  ;;  %v4628_v63 = vmul.f32 %v4559_v41, %v4559_v41 }
 0x1f4   : > { %v4448_v31 = vpop.f32.mrf.mxu0  ;;  %v6002_v25 = vpop.f32.mrf.mxu1 }
 0x1f5   : > { %v5516_v14 = vpack.c.bf16 %v4562_v54, %v4561_v55  ;;  %v4560_v1 = vadd.f32 %v4435_v22, %v4138_v12  ;;  %v4143_v40 = vadd.f32 %v6002_v25, %v8765_v39  ;;  %v3089_v22 = vadd.f32 %v8778_v33, %v8676_v19 }
 0x1f6   : > { %v6037_v7 = vpop.f32.mrf.mxu0  ;;  %v4026_v61 = vpop.f32.mrf.mxu1  ;;  %v4631_v59 = vmul.f32 %v4562_v54, %v4562_v54 }
 0x1f7   : > { %5588 = vst [vmem:[%s8881_s18 + $0x8] sm:$0xff] %v5516_v14   ;;  %v4591_v6 = vadd.f32 %v4560_v1, %v4559_v41  ;;  %v4629_v47 = vmul.f32 %v4560_v1, %v4560_v1  ;;  %v5511_v10 = vpack.c.bf16 %v4560_v1, %v4559_v41  ;;  %v4141_v44 = vadd.f32 %v4026_v61, %v3463_v43 }
 0x1f8   : > { %v4451_v16 = vpop.f32.mrf.mxu0  ;;  %v6003_v52 = vpop.f32.mrf.mxu1  ;;  %v4565_v11 = vadd.f32 %v6036_v62, %v4143_v40  ;;  %v3467_v14 = vadd.f32 %v8773_v53, %v3089_v22  ;;  %v3470_v40 = vadd.f32 %v8776_v27, %v3092_v23 }
 0x1f9   : > { %v4592_v9 = vadd.f32 %v4591_v6, %v4561_v55  ;;  %v4660_v17 = vadd.f32 %v4629_v47, %v4628_v63  ;;  %5512 = vst [vmem:[%s8881_s18] sm:$0xff] %v5511_v10   ;;  %v4144_v2 = vadd.f32 %v6003_v52, %v3466_v5  ;;  %v4563_v41 = vadd.f32 %v4448_v31, %v4141_v44 }
 0x1fa   : > { %v6040_v39 = vpop.f32.mrf.mxu0  ;;  %v4029_v12 = vpop.f32.mrf.mxu1  ;;  %v3090_v55 = vadd.f32 %v8786_v58, %v8682_v15  ;;  %v4634_v44 = vmul.f32 %v4565_v11, %v4565_v11 }
 0x1fb   : > { %v4661_v25 = vadd.f32 %v4660_v17, %v4630_v36  ;;  %v4593_v29 = vadd.f32 %v4592_v9, %v4562_v54  ;;  %v4566_v30 = vadd.f32 %v6037_v7, %v4144_v2  ;;  %v4142_v19 = vadd.f32 %v4029_v12, %v3464_v60 }
 0x1fc   : > { %v4464_v33 = vpop.f32.mrf.mxu0  ;;  %v6006_v1 = vpop.f32.mrf.mxu1  ;;  %v4632_v5 = vmul.f32 %v4563_v41, %v4563_v41  ;;  %v3468_v10 = vadd.f32 %v8782_v0, %v3090_v55  ;;  %v3093_v60 = vadd.f32 %v8793_v42, %v8688_v38 }
 0x1fd   : > { %v4594_v43 = vadd.f32 %v4593_v29, %v4563_v41  ;;  %v4662_v61 = vadd.f32 %v4661_v25, %v4631_v59  ;;  %v5526_v13 = vpack.c.bf16 %v4566_v30, %v4565_v11  ;;  %v4564_v62 = vadd.f32 %v4451_v16, %v4142_v19 }
 0x1fe   : > { %v6041_v34 = vpop.f32.mrf.mxu0  ;;  %v4042_v31 = vpop.f32.mrf.mxu1  ;;  %v4147_v7 = vadd.f32 %v6006_v1, %v8780_v45  ;;  %v3096_v16 = vadd.f32 %v8799_v57, %v8691_v35  ;;  %v4635_v0 = vmul.f32 %v4566_v30, %v4566_v30  ;;  %v3471_v42 = vadd.f32 %v8788_v28, %v3093_v60 }
 0x1ff   : > { %v4663_v54 = vadd.f32 %v4662_v61, %v4632_v5  ;;  %5590 = vst [vmem:[%s8881_s18 + $0x18] sm:$0xff] %v5526_v13   ;;  %v4145_v63 = vadd.f32 %v4042_v31, %v3467_v14  ;;  %v4595_v6 = vadd.f32 %v4594_v43, %v4564_v62  ;;  %v4633_v47 = vmul.f32 %v4564_v62, %v4564_v62 }
 0x200   : > { %v4467_v53 = vpop.f32.mrf.mxu0  ;;  %v5521_v15 = vpack.c.bf16 %v4564_v62, %v4563_v41  ;;  %v6007_v58 = vpop.f32.mrf.mxu1  ;;  %v4569_v17 = vadd.f32 %v6040_v39, %v4147_v7  ;;  %v3094_v35 = vadd.f32 %v8801_v8, %v8694_v18  ;;  %v3474_v29 = vadd.f32 %v8791_v48, %v3096_v16 }
 0x201   : > { %v4148_v27 = vadd.f32 %v6007_v58, %v3470_v40  ;;  %v4596_v52 = vadd.f32 %v4595_v6, %v4565_v11  ;;  %v4664_v36 = vadd.f32 %v4663_v54, %v4633_v47  ;;  %v4567_v45 = vadd.f32 %v4464_v33, %v4145_v63 }
 0x202   : > { %5589 = vst [vmem:[%s8881_s18 + $0x10] sm:$0xff] %v5521_v15   ;;  %v4045_v9 = vpop.f32.mrf.mxu1  ;;  %v3472_v8 = vadd.f32 %v8797_v3, %v3094_v35  ;;  %v3097_v48 = vadd.f32 %v8808_v56, %v8700_v24  ;;  %v3100_v13 = vadd.f32 %v8814_v21, %v8703_v46  ;;  %v4638_v31 = vmul.f32 %v4569_v17, %v4569_v17 }
 0x203   : > { %v6044_v22 = vpop.f32.mrf.mxu0  ;;  %v4570_v2 = vadd.f32 %v6041_v34, %v4148_v27  ;;  %v4146_v23 = vadd.f32 %v4045_v9, %v3468_v10  ;;  %v4665_v41 = vadd.f32 %v4664_v36, %v4634_v44  ;;  %v4597_v12 = vadd.f32 %v4596_v52, %v4566_v30 }
 0x204   : > { %v6010_v38 = vpop.f32.mrf.mxu1  ;;  %v4636_v39 = vmul.f32 %v4567_v45, %v4567_v45  ;;  %v3475_v56 = vadd.f32 %v8803_v20, %v3097_v48  ;;  %v3098_v46 = vadd.f32 %v8816_v51, %v8706_v4  ;;  %v3478_v16 = vadd.f32 %v8806_v26, %v3100_v13  ;;  %v9396_v51 = vld [vmem:[#allocation34_spill] sm:$0xff] }
 0x205   : > { %v4480_v59 = vpop.f32.mrf.mxu0  ;;  %v5536_v57 = vpack.c.bf16 %v4570_v2, %v4569_v17  ;;  %v4568_v11 = vadd.f32 %v4467_v53, %v4146_v23  ;;  %v4598_v19 = vadd.f32 %v4597_v12, %v4567_v45  ;;  %v4666_v33 = vadd.f32 %v4665_v41, %v4635_v0  ;;  %v9397_v0 = vld [vmem:[#allocation5_spill] sm:$0xff]  ;;  %v9398_v41 = vld [vmem:[#allocation15_spill] sm:$0xff]  ;;  %v9399_v12 = vld [vmem:[#allocation30_spill] sm:$0xff] }
 0x206   : > { %v4058_v14 = vpop.f32.mrf.mxu1  ;;  %v4151_v30 = vadd.f32 %v6010_v38, %v8795_v50  ;;  %v4639_v3 = vmul.f32 %v4570_v2, %v4570_v2  ;;  %v3101_v26 = vadd.f32 %v8823_v49, %v9397_v0  ;;  %v3104_v38 = vadd.f32 %v9399_v12, %v9398_v41  ;;  %v9410_v12 = vld [vmem:[#allocation17_spill] sm:$0xff] }
 0x207   : > { %v6045_v25 = vpop.f32.mrf.mxu0  ;;  %5592 = vst [vmem:[%s8881_s18 + $0x28] sm:$0xff] %v5536_v57   ;;  %v4637_v55 = vmul.f32 %v4568_v11, %v4568_v11  ;;  %v5531_v1 = vpack.c.bf16 %v4568_v11, %v4567_v45  ;;  %v4149_v43 = vadd.f32 %v4058_v14, %v3471_v42  ;;  %v4667_v5 = vadd.f32 %v4666_v33, %v4636_v39 }
 0x208   : > { %v4599_v61 = vadd.f32 %v4598_v19, %v4568_v11  ;;  %v6011_v18 = vpop.f32.mrf.mxu1  ;;  %v4573_v63 = vadd.f32 %v6044_v22, %v4151_v30 }
 0x209   : > { %v4483_v28 = vpop.f32.mrf.mxu0  ;;  %5591 = vst [vmem:[%s8881_s18 + $0x20] sm:$0xff] %v5531_v1   ;;  %v4152_v34 = vadd.f32 %v6011_v18, %v3474_v29  ;;  %v4668_v54 = vadd.f32 %v4667_v5, %v4637_v55  ;;  %v4571_v50 = vadd.f32 %v4480_v59, %v4149_v43  ;;  %v3476_v59 = vadd.f32 %v9396_v51, %v3098_v46  ;;  %v9400_v43 = vld [vmem:[#allocation21_spill] sm:$0xff]  ;;  %v9401_v5 = vld [vmem:[#allocation26_spill] sm:$0xff] }
 0x20a   : > { %v4600_v40 = vadd.f32 %v4599_v61, %v4569_v17  ;;  %v4061_v7 = vpop.f32.mrf.mxu1  ;;  %v4642_v57 = vmul.f32 %v4573_v63, %v4573_v63  ;;  %v9402_v61 = vld [vmem:[#allocation38_spill] sm:$0xff] }
 0x20b   : > { %v6048_v62 = vpop.f32.mrf.mxu0  ;;  %v4574_v53 = vadd.f32 %v6045_v25, %v4152_v34  ;;  %v4150_v6 = vadd.f32 %v4061_v7, %v3472_v8  ;;  %v4669_v15 = vadd.f32 %v4668_v54, %v4638_v31  ;;  %v4640_v22 = vmul.f32 %v4571_v50, %v4571_v50  ;;  %v9403_v34 = vld [vmem:[#allocation33_spill] sm:$0xff] }
 0x20c   : > { %v4601_v58 = vadd.f32 %v4600_v40, %v4570_v2  ;;  %v6014_v24 = vpop.f32.mrf.mxu1  ;;  %v3102_v18 = vadd.f32 %v9402_v61, %v9401_v5  ;;  %v3482_v31 = vadd.f32 %v9403_v34, %v3104_v38  ;;  %v9411_v38 = vld [vmem:[#allocation39_spill] sm:$0xff] }
 0x20d   : > { %v4496_v47 = vpop.f32.mrf.mxu0  ;;  %v5546_v21 = vpack.c.bf16 %v4574_v53, %v4573_v63  ;;  %v4572_v10 = vadd.f32 %v4483_v28, %v4150_v6  ;;  %v4670_v44 = vadd.f32 %v4669_v15, %v4639_v3  ;;  %v4155_v9 = vadd.f32 %v6014_v24, %v8810_v37 }
 0x20e   : > { %v4602_v27 = vadd.f32 %v4601_v58, %v4571_v50  ;;  %v4074_v52 = vpop.f32.mrf.mxu1  ;;  %v4643_v55 = vmul.f32 %v4574_v53, %v4574_v53  ;;  %v3479_v28 = vadd.f32 %v9400_v43, %v3101_v26  ;;  %v9409_v26 = vld [vmem:[#allocation43_spill] sm:$0xff] }
 0x20f   : > { %v6049_v60 = vpop.f32.mrf.mxu0  ;;  %5594 = vst [vmem:[%s8881_s18 + $0x38] sm:$0xff] %v5546_v21   ;;  %v4641_v36 = vmul.f32 %v4572_v10, %v4572_v10  ;;  %v5541_v45 = vpack.c.bf16 %v4572_v10, %v4571_v50  ;;  %v4153_v17 = vadd.f32 %v4074_v52, %v3475_v56  ;;  %v4671_v2 = vadd.f32 %v4670_v44, %v4640_v22  ;;  %v9405_v56 = vld [vmem:[#allocation37_spill] sm:$0xff]  ;;  %v9406_v21 = vld [vmem:[#allocation18_spill] sm:$0xff] }
 0x210   : > { %v4603_v23 = vadd.f32 %v4602_v27, %v4572_v10  ;;  %v6015_v4 = vpop.f32.mrf.mxu1  ;;  %v4577_v19 = vadd.f32 %v6048_v62, %v4155_v9  ;;  %v3480_v46 = vadd.f32 %v9405_v56, %v3102_v18  ;;  %v3105_v10 = vadd.f32 %v8838_v32, %v9406_v21  ;;  %v9414_v18 = vld [vmem:[#allocation45_spill] sm:$0xff] }
 0x211   : > { %v4499_v20 = vpop.f32.mrf.mxu0  ;;  %5593 = vst [vmem:[%s8881_s18 + $0x30] sm:$0xff] %v5541_v45   ;;  %v4156_v42 = vadd.f32 %v6015_v4, %v3478_v16  ;;  %v4672_v25 = vadd.f32 %v4671_v2, %v4641_v36  ;;  %v4575_v37 = vadd.f32 %v4496_v47, %v4153_v17  ;;  %v9408_v16 = vld [vmem:[#allocation51_spill] sm:$0xff] }
 0x212   : > { %v4604_v11 = vadd.f32 %v4603_v23, %v4573_v63  ;;  %v4077_v29 = vpop.f32.mrf.mxu1  ;;  %v4646_v52 = vmul.f32 %v4577_v19, %v4577_v19  ;;  %v3483_v41 = vadd.f32 %v9409_v26, %v3105_v10 }
 0x213   : > { %v6052_v35 = vpop.f32.mrf.mxu0  ;;  %v4578_v39 = vadd.f32 %v6049_v60, %v4156_v42  ;;  %v4154_v33 = vadd.f32 %v4077_v29, %v3476_v59  ;;  %v4673_v1 = vadd.f32 %v4672_v25, %v4642_v57  ;;  %v4644_v62 = vmul.f32 %v4575_v37, %v4575_v37  ;;  %v9407_v60 = vld [vmem:[#allocation16_spill] sm:$0xff] }
 0x214   : > { %v4605_v30 = vadd.f32 %v4604_v11, %v4574_v53  ;;  %v6018_v49 = vpop.f32.mrf.mxu1  ;;  %v9404_v53 = vld [vmem:[#allocation31_spill] sm:$0xff]  ;;  %v3108_v27 = vadd.f32 %v9408_v16, %v9407_v60  ;;  %v3106_v42 = vadd.f32 %v9411_v38, %v9410_v12 }
 0x215   : > { %v4512_v14 = vpop.f32.mrf.mxu0  ;;  %v5556_v8 = vpack.c.bf16 %v4578_v39, %v4577_v19  ;;  %v4576_v48 = vadd.f32 %v4499_v20, %v4154_v33  ;;  %v4674_v54 = vadd.f32 %v4673_v1, %v4643_v55  ;;  %v4159_v6 = vadd.f32 %v6018_v49, %v9404_v53  ;;  %v9419_v60 = vld [vmem:[#allocation23_spill] sm:$0xff] }
 0x216   : > { %v4606_v40 = vadd.f32 %v4605_v30, %v4575_v37  ;;  %v4090_v50 = vpop.f32.mrf.mxu1  ;;  %v4647_v51 = vmul.f32 %v4578_v39, %v4578_v39 }
 0x217   : > { %v6053_v13 = vpop.f32.mrf.mxu0  ;;  %5596 = vst [vmem:[%s8881_s18 + $0x48] sm:$0xff] %v5556_v8   ;;  %v4645_v7 = vmul.f32 %v4576_v48, %v4576_v48  ;;  %v5551_v63 = vpack.c.bf16 %v4576_v48, %v4575_v37  ;;  %v4157_v47 = vadd.f32 %v4090_v50, %v3479_v28  ;;  %v4675_v15 = vadd.f32 %v4674_v54, %v4644_v62  ;;  %v9412_v37 = vld [vmem:[#allocation20_spill] sm:$0xff] }
 0x218   : > { %v4607_v58 = vadd.f32 %v4606_v40, %v4576_v48  ;;  %v6019_v24 = vpop.f32.mrf.mxu1  ;;  %v4581_v20 = vadd.f32 %v6052_v35, %v4159_v6  ;;  %v3486_v29 = vadd.f32 %v9412_v37, %v3108_v27  ;;  %v3484_v8 = vadd.f32 %v9414_v18, %v3106_v42  ;;  %v9415_v48 = vld [vmem:[#allocation27_spill] sm:$0xff]  ;;  %v9420_v27 = vld [vmem:[#allocation29_spill] sm:$0xff]  ;;  %v9424_v42 = vld [vmem:[#allocation14_spill] sm:$0xff] }
 0x219   : > { %v4515_v3 = vpop.f32.mrf.mxu0  ;;  %5595 = vst [vmem:[%s8881_s18 + $0x40] sm:$0xff] %v5551_v63   ;;  %v4160_v22 = vadd.f32 %v6019_v24, %v3482_v31  ;;  %v4676_v45 = vadd.f32 %v4675_v15, %v4645_v7  ;;  %v4579_v9 = vadd.f32 %v4512_v14, %v4157_v47  ;;  %v9417_v31 = vld [vmem:[#allocation28_spill] sm:$0xff]  ;;  %v9418_v40 = vld [vmem:[#allocation35_spill] sm:$0xff] }
 0x21a   : > { %v4608_v36 = vadd.f32 %v4607_v58, %v4577_v19  ;;  %v4093_v17 = vpop.f32.mrf.mxu1  ;;  %v3112_v62 = vadd.f32 %v9418_v40, %v9417_v31  ;;  %v4650_v7 = vmul.f32 %v4581_v20, %v4581_v20 }
 0x21b   : > { %v6056_v44 = vpop.f32.mrf.mxu0  ;;  %v4582_v2 = vadd.f32 %v6053_v13, %v4160_v22  ;;  %v4158_v23 = vadd.f32 %v4093_v17, %v3480_v46  ;;  %v4677_v59 = vadd.f32 %v4676_v45, %v4646_v52  ;;  %v4648_v35 = vmul.f32 %v4579_v9, %v4579_v9  ;;  %v9416_v13 = vld [vmem:[#allocation40_spill] sm:$0xff] }
 0x21c   : > { %v4609_v0 = vadd.f32 %v4608_v36, %v4578_v39  ;;  %v6022_v32 = vpop.f32.mrf.mxu1  ;;  %v9413_v39 = vld [vmem:[#allocation19_spill] sm:$0xff]  ;;  %v3109_v34 = vadd.f32 %v9416_v13, %v9415_v48  ;;  %v9421_v22 = vld [vmem:[#allocation24_spill] sm:$0xff] }
 0x21d   : > { %v4528_v4 = vpop.f32.mrf.mxu0  ;;  %v5566_v57 = vpack.c.bf16 %v4582_v2, %v4581_v20  ;;  %v4580_v11 = vadd.f32 %v4515_v3, %v4158_v23  ;;  %v4678_v33 = vadd.f32 %v4677_v59, %v4647_v51  ;;  %v4163_v30 = vadd.f32 %v6022_v32, %v9413_v39 }
 0x21e   : > { %v4610_v19 = vadd.f32 %v4609_v0, %v4579_v9  ;;  %v4106_v14 = vpop.f32.mrf.mxu1  ;;  %v4651_v24 = vmul.f32 %v4582_v2, %v4582_v2  ;;  %v3487_v16 = vadd.f32 %v9419_v60, %v3109_v34  ;;  %v3110_v52 = vadd.f32 %v9421_v22, %v9420_v27 }
 0x21f   : > { %v6057_v25 = vpop.f32.mrf.mxu0  ;;  %5598 = vst [vmem:[%s8881_s18 + $0x58] sm:$0xff] %v5566_v57   ;;  %v4649_v55 = vmul.f32 %v4580_v11, %v4580_v11  ;;  %v5561_v1 = vpack.c.bf16 %v4580_v11, %v4579_v9  ;;  %v4161_v49 = vadd.f32 %v4106_v14, %v3483_v41  ;;  %v4679_v28 = vadd.f32 %v4678_v33, %v4648_v35  ;;  %v9422_v9 = vld [vmem:[#allocation55_spill] sm:$0xff] }
 0x220   : > { %v4611_v5 = vadd.f32 %v4610_v19, %v4580_v11  ;;  %v6023_v61 = vpop.f32.mrf.mxu1  ;;  %v4585_v3 = vadd.f32 %v6056_v44, %v4163_v30  ;;  %v3490_v17 = vadd.f32 %v9422_v9, %v3112_v62  ;;  %v3488_v57 = vadd.f32 %v9424_v42, %v3110_v52 }
 0x221   : > { %v4531_v43 = vpop.f32.mrf.mxu0  ;;  %5597 = vst [vmem:[%s8881_s18 + $0x50] sm:$0xff] %v5561_v1   ;;  %v4164_v54 = vadd.f32 %v6023_v61, %v3486_v29  ;;  %v4680_v53 = vadd.f32 %v4679_v28, %v4649_v55  ;;  %v4583_v6 = vadd.f32 %v4528_v4, %v4161_v49 }
 0x222   : > { %v4612_v63 = vadd.f32 %v4611_v5, %v4581_v20  ;;  %v4109_v47 = vpop.f32.mrf.mxu1 }
 0x223   : > { %v6060_v50 = vpop.f32.mrf.mxu0  ;;  %v4586_v15 = vadd.f32 %v6057_v25, %v4164_v54  ;;  %v4162_v58 = vadd.f32 %v4109_v47, %v3484_v8  ;;  %v4681_v56 = vadd.f32 %v4680_v53, %v4650_v7  ;;  %v4652_v44 = vmul.f32 %v4583_v6, %v4583_v6 }
 0x224   : > { %v4613_v46 = vadd.f32 %v4612_v63, %v4582_v2  ;;  %v6026_v21 = vpop.f32.mrf.mxu1  ;;  %v9423_v2 = vld [vmem:[#allocation41_spill] sm:$0xff]  ;;  %v4654_v25 = vmul.f32 %v4585_v3, %v4585_v3 }
 0x225   : > { %v4544_v10 = vpop.f32.mrf.mxu0  ;;  %v5576_v36 = vpack.c.bf16 %v4586_v15, %v4585_v3  ;;  %v4584_v45 = vadd.f32 %v4531_v43, %v4162_v58  ;;  %v4682_v23 = vadd.f32 %v4681_v56, %v4651_v24  ;;  %v4167_v0 = vadd.f32 %v6026_v21, %v9423_v2 }
 0x226   : > { %v4614_v20 = vadd.f32 %v4613_v46, %v4583_v6  ;;  %v4122_v4 = vpop.f32.mrf.mxu1  ;;  %v4655_v1 = vmul.f32 %v4586_v15, %v4586_v15 }
 0x227   : > { %5600 = vst [vmem:[%s8881_s18 + $0x68] sm:$0xff] %v5576_v36   ;;  %v4653_v51 = vmul.f32 %v4584_v45, %v4584_v45  ;;  %v5571_v59 = vpack.c.bf16 %v4584_v45, %v4583_v6  ;;  %v4165_v32 = vadd.f32 %v4122_v4, %v3487_v16  ;;  %v4683_v26 = vadd.f32 %v4682_v23, %v4652_v44  ;;  %v6061_v38 = vpop.f32.mrf.mxu0 }
 0x228   : > { %v4615_v41 = vadd.f32 %v4614_v20, %v4584_v45  ;;  %v6027_v12 = vpop.f32.mrf.mxu1  ;;  %v4589_v33 = vadd.f32 %v6060_v50, %v4167_v0 }
 0x229   : > { %5599 = vst [vmem:[%s8881_s18 + $0x60] sm:$0xff] %v5571_v59   ;;  %v4168_v11 = vadd.f32 %v6027_v12, %v3490_v17  ;;  %v4684_v29 = vadd.f32 %v4683_v26, %v4653_v51  ;;  %v4587_v19 = vadd.f32 %v4544_v10, %v4165_v32  ;;  %v4547_v49 = vpop.f32.mrf.mxu0 }
 0x22a   : > { %v4616_v37 = vadd.f32 %v4615_v41, %v4585_v3  ;;  %v4125_v35 = vpop.f32.mrf.mxu1  ;;  %v4658_v31 = vmul.f32 %v4589_v33, %v4589_v33 }
 0x22b   : > { %v4590_v14 = vadd.f32 %v6061_v38, %v4168_v11  ;;  %v4166_v55 = vadd.f32 %v4125_v35, %v3488_v57  ;;  %v4685_v39 = vadd.f32 %v4684_v29, %v4654_v25  ;;  %v4656_v61 = vmul.f32 %v4587_v19, %v4587_v19 }
 0x22c   : > { %v4617_v30 = vadd.f32 %v4616_v37, %v4586_v15 }
 0x22d   : > { %v5586_v43 = vpack.c.bf16 %v4590_v14, %v4589_v33  ;;  %v4588_v28 = vadd.f32 %v4547_v49, %v4166_v55  ;;  %v4686_v18 = vadd.f32 %v4685_v39, %v4655_v1  ;;  %v4659_v54 = vmul.f32 %v4590_v14, %v4590_v14 }
 0x22e   : > { %v4618_v5 = vadd.f32 %v4617_v30, %v4587_v19 }
 0x22f   : > { %5602 = vst [vmem:[%s8881_s18 + $0x78] sm:$0xff] %v5586_v43   ;;  %v4657_v8 = vmul.f32 %v4588_v28, %v4588_v28  ;;  %v5581_v48 = vpack.c.bf16 %v4588_v28, %v4587_v19  ;;  %v4687_v13 = vadd.f32 %v4686_v18, %v4656_v61 }
 0x230   : > { %v4619_v34 = vadd.f32 %v4618_v5, %v4588_v28 }
 0x231   : > { %5601 = vst [vmem:[%s8881_s18 + $0x70] sm:$0xff] %v5581_v48   ;;  %v4688_v62 = vadd.f32 %v4687_v13, %v4657_v8 }
 0x232   : > { %v4620_v40 = vadd.f32 %v4619_v34, %v4589_v33 }
 0x233   : > { %v4689_v7 = vadd.f32 %v4688_v62, %v4658_v31 }
 0x234   : > { %v4621_v50 = vadd.f32 %v4620_v40, %v4590_v14 }
 0x235   : > { %v4690_v53 = vadd.f32 %v4689_v7, %v4659_v54 }
 0x236   : > { %v4622_v63 = vrot.slane %v4621_v50, 4 }
 0x237   : > { %v4691_v47 = vrot.slane %v4690_v53, 4 }
 0x238   : > { %v4623_v6 = vadd.f32 %v4622_v63, %v4621_v50 }
 0x239   : > { %v4692_v15 = vadd.f32 %v4691_v47, %v4690_v53 }
 0x23a   : > { %v4624_v3 = vrot.slane %v4623_v6, 2 }
 0x23b   : > { %v4693_v24 = vrot.slane %v4692_v15, 2 }
 0x23c   : > { %v4625_v58 = vadd.f32 %v4624_v3, %v4623_v6 }
 0x23d   : > { %v4694_v46 = vadd.f32 %v4693_v24, %v4692_v15 }
 0x23e   : > { %v4626_v56 = vrot.slane %v4625_v58, 1 }
 0x23f   : > { %v4695_v21 = vrot.slane %v4694_v46, 1 }
 0x240   : > { %v4627_v10 = vadd.f32 %v4626_v56, %v4625_v58 }
 0x241   : > { %v4696_v60 = vadd.f32 %v4695_v21, %v4694_v46 }
 0x243   : > { %v4698_v16 = vsel %vm4697_vm8, %v4627_v10, %v4696_v60 }
 0x244   : > { %4699 = vst [vmem:[%s212_s22] sm:$0x3] %v4698_v16 }
 0x245 PF: > { %s14_s14 = sadd.s32 1, %s6169_s14   ;;  %s9425_s12 = smov %s6165_s13 }
 0x246   : > { %p11_p5 = scmp.ge.s32.totalorder %s14_s14, 4   ;;  %s9426_s13 = smov %s9428_s15 }
 0x248   :  { %13 = sbr.rel (!%p11_p5) target bundleno = 2 (0x2), region = 81 }

</bundles_post_ra>
